<compile_context>
chip_gen: v7x
topology: tpu7x:2x2x1
jax: 0.10.0
libtpu: 0.0.40
codegen_flags: <defaults>
</compile_context>

<pallas_src>
import math

import jax
import jax.numpy as jnp
import numpy as np
from jax.experimental import pallas as pl
from jax.experimental.pallas import tpu as pltpu

# ----------------------------- configuration --------------------------------
IN = 8                      # in_irreps dim ("8x0e")
SH = 4                      # sh_irreps dim ("4x0e")
OUT = 16                    # out_irreps dim ("16x0e")
NEF = 8                     # n_edge_features
HID = 8                     # hidden_features (defaults to n_edge_features)
WNUM = IN * SH * OUT        # tp.weight_numel = 512
TP_NORM = 1.0 / math.sqrt(IN * SH)   # e3nn 'element' path-normalization (scalars)
BN_EPS = 1e-5

N_NODES = 16
N_EDGES = 32


# ------------------------------- kernel --------------------------------------
def _fused_tpconv_kernel(src_ref, dst_ref, eattr_ref, nattr_ref, esh_ref,
                         w1_ref, b1_ref, w2p_ref, b2p_ref,
                         pad_ref, gamma_ref, beta_ref, o_ref):
    """fc MLP + tensor product + scatter-mean + residual + BatchNorm, fused."""
    te = eattr_ref.shape[0]
    n_nodes = nattr_ref.shape[0]

    # --- fc(edge_attr): Linear -> ReLU -> Dropout(p=0.0, identity) -----------
    h = jnp.dot(eattr_ref[...], w1_ref[...],
                preferred_element_type=jnp.float32) + b1_ref[...]        # (TE, HID)
    h = jnp.maximum(h, 0.0)

    # --- gather node_attr[edge_dst] via one-hot matmul (no transpose) --------
    edge_node_iota = jax.lax.broadcasted_iota(jnp.int32, (te, n_nodes), 1)
    dst_onehot = (dst_ref[...] == edge_node_iota).astype(jnp.float32)    # (TE, N)
    x = jnp.dot(dst_onehot, nattr_ref[...],
                preferred_element_type=jnp.float32)                       # (TE, IN)

    # --- scalar-irrep tensor product, Kronecker-fused with fc second layer ---
    # tp is linear in the per-edge weights, so
    #   tp = ((h ⊗ outer) @ W2' + outer @ b2') * TP_NORM
    outer = (x[:, :, None] * esh_ref[...][:, None, :]).reshape(te, IN * SH)   # (TE, 32)
    z = (h[:, :, None] * outer[:, None, :]).reshape(te, HID * IN * SH)        # (TE, 256)
    tp = (jnp.dot(z, w2p_ref[...], preferred_element_type=jnp.float32)
          + jnp.dot(outer, b2p_ref[...], preferred_element_type=jnp.float32)
          ) * TP_NORM                                                         # (TE, OUT)

    # --- scatter(mean) over edge_src: one-hot built directly as (N, TE) ------
    node_edge_iota = jax.lax.broadcasted_iota(jnp.int32, (n_nodes, te), 0)
    src_onehot = (src_ref[...] == node_edge_iota).astype(jnp.float32)     # (N, TE)
    ssum = jnp.dot(src_onehot, tp, preferred_element_type=jnp.float32)    # (N, OUT)
    cnt = jnp.sum(src_onehot, axis=1, keepdims=True)                      # (N, 1)
    mean = ssum / jnp.maximum(cnt, 1.0)            # scatter(..., reduce='mean')

    # --- residual with F.pad(node_attr) + e3nn BatchNorm (batch stats) -------
    xr = mean + pad_ref[...]
    mu = jnp.mean(xr, axis=0, keepdims=True)
    xc = xr - mu
    var = jnp.mean(xc * xc, axis=0, keepdims=True)          # 'component' norm
    o_ref[...] = xc * jax.lax.rsqrt(var + BN_EPS) * gamma_ref[...] + beta_ref[...]


# ------------------------------- wrapper --------------------------------------
@jax.jit
def tensor_product_conv_layer(node_attr, edge_index, edge_attr, edge_sh,
                              w1, b1, w2, b2, bn_gamma, bn_beta):
    n_nodes = node_attr.shape[0]
    n_edges = edge_attr.shape[0]
    # src as a (1, E) lane-row -> scatter one-hot built directly in (N, E);
    # dst as a (E, 1) column  -> gather one-hot built directly in (E, N).
    src = edge_index[0].astype(jnp.int32).reshape(1, n_edges)
    dst = edge_index[1].astype(jnp.int32).reshape(n_edges, 1)

    # Kronecker-fused second fc layer parameters (reshaped once, outside kernel)
    w2p = w2.reshape(HID, IN * SH, OUT).reshape(HID * IN * SH, OUT)   # (256, OUT)
    b2p = b2.reshape(IN * SH, OUT)                                    # (32, OUT)

    # residual: F.pad(node_attr, (0, OUT - IN))
    padded = jnp.pad(node_attr, ((0, 0), (0, OUT - IN)))

    out = pl.pallas_call(
        _fused_tpconv_kernel,
        out_shape=jax.ShapeDtypeStruct((n_nodes, OUT), jnp.float32),
        grid=(1,),
        in_specs=[
            pl.BlockSpec((1, n_edges), lambda i: (0, 0)),            # edge_src row
            pl.BlockSpec((n_edges, 1), lambda i: (0, 0)),            # edge_dst col
            pl.BlockSpec((n_edges, NEF), lambda i: (0, 0)),          # edge_attr
            pl.BlockSpec((n_nodes, IN), lambda i: (0, 0)),           # node_attr
            pl.BlockSpec((n_edges, SH), lambda i: (0, 0)),           # edge_sh
            pl.BlockSpec((NEF, HID), lambda i: (0, 0)),              # fc.0 weight
            pl.BlockSpec((1, HID), lambda i: (0, 0)),                # fc.0 bias
            pl.BlockSpec((HID * IN * SH, OUT), lambda i: (0, 0)),    # fused fc.3 weight
            pl.BlockSpec((IN * SH, OUT), lambda i: (0, 0)),          # fused fc.3 bias
            pl.BlockSpec((n_nodes, OUT), lambda i: (0, 0)),          # padded residual
            pl.BlockSpec((1, OUT), lambda i: (0, 0)),                # bn gamma
            pl.BlockSpec((1, OUT), lambda i: (0, 0)),                # bn beta
        ],
        out_specs=pl.BlockSpec((n_nodes, OUT), lambda i: (0, 0)),
        compiler_params=pltpu.CompilerParams(
            dimension_semantics=("arbitrary",)),
    )(src, dst, edge_attr, node_attr, edge_sh, w1, b1, w2p, b2p,
      padded, bn_gamma, bn_beta)
    return out


# ------------------------------ reference ------------------------------------
def _reference(node_attr, edge_index, edge_attr, edge_sh,
               w1, b1, w2, b2, bn_gamma, bn_beta):
    src, dst = edge_index[0], edge_index[1]
    n_nodes = node_attr.shape[0]
    n_edges = edge_attr.shape[0]
    h = jax.nn.relu(edge_attr @ w1 + b1)
    w = h @ w2 + b2
    x = node_attr[dst]
    outer = (x[:, :, None] * edge_sh[:, None, :]).reshape(n_edges, IN * SH)
    tp = jnp.einsum('ep,epw->ew', outer, w.reshape(n_edges, IN * SH, OUT)) * TP_NORM
    out_sum = jax.ops.segment_sum(tp, src, num_segments=n_nodes)
    cnt = jax.ops.segment_sum(jnp.ones((n_edges,), jnp.float32), src,
                              num_segments=n_nodes)
    out = out_sum / jnp.maximum(cnt, 1.0)[:, None]
    out = out + jnp.pad(node_attr, ((0, 0), (0, OUT - IN)))
    mu = out.mean(0, keepdims=True)
    xc = out - mu
    var = (xc ** 2).mean(0, keepdims=True)
    return xc * jax.lax.rsqrt(var + BN_EPS) * bn_gamma + bn_beta


# --------------------------------- main ---------------------------------------
if __name__ == "__main__":
    key = jax.random.PRNGKey(0)
    ks = jax.random.split(key, 8)

    node_attr = jax.random.normal(ks[0], (N_NODES, IN), jnp.float32)
    edge_index = jax.random.randint(ks[1], (2, N_EDGES), 0, N_NODES, jnp.int32)
    edge_attr = jax.random.normal(ks[2], (N_EDGES, NEF), jnp.float32)
    edge_sh = jax.random.normal(ks[3], (N_EDGES, SH), jnp.float32)

    # deterministic parameter init (synthetic; no checkpoint load)
    w1 = jax.random.normal(ks[4], (NEF, HID), jnp.float32) / math.sqrt(NEF)
    b1 = jnp.zeros((1, HID), jnp.float32)
    w2 = jax.random.normal(ks[5], (HID, WNUM), jnp.float32) / math.sqrt(HID)
    b2 = jnp.zeros((1, WNUM), jnp.float32)
    bn_gamma = jnp.ones((1, OUT), jnp.float32)    # e3nn BatchNorm affine weight
    bn_beta = jnp.zeros((1, OUT), jnp.float32)    # e3nn BatchNorm affine bias

    out = tensor_product_conv_layer(node_attr, edge_index, edge_attr, edge_sh,
                                    w1, b1, w2, b2, bn_gamma, bn_beta)
    out = jax.block_until_ready(out)

    ref = _reference(node_attr, edge_index, edge_attr, edge_sh,
                     w1, b1, w2, b2, bn_gamma, bn_beta)
    np.testing.assert_allclose(np.asarray(out), np.asarray(ref),
                               rtol=1e-4, atol=1e-4)
    print("KERNEL_OK")
</pallas_src>

<mosaic_0001>
module attributes {stable_mosaic.version = 11 : i64} {
  func.func @_fused_tpconv_kernel(%arg0: i32, %arg1: memref<1x32xi32, #tpu.memory_space<vmem>>, %arg2: memref<32x1xi32, #tpu.memory_space<vmem>>, %arg3: memref<32x8xf32, #tpu.memory_space<vmem>>, %arg4: memref<16x8xf32, #tpu.memory_space<vmem>>, %arg5: memref<32x4xf32, #tpu.memory_space<vmem>>, %arg6: memref<8x8xf32, #tpu.memory_space<vmem>>, %arg7: memref<1x8xf32, #tpu.memory_space<vmem>>, %arg8: memref<256x16xf32, #tpu.memory_space<vmem>>, %arg9: memref<32x16xf32, #tpu.memory_space<vmem>>, %arg10: memref<16x16xf32, #tpu.memory_space<vmem>>, %arg11: memref<1x16xf32, #tpu.memory_space<vmem>>, %arg12: memref<1x16xf32, #tpu.memory_space<vmem>>, %arg13: memref<16x16xf32, #tpu.memory_space<vmem>>) attributes {dimension_semantics = [#tpu.dimension_semantics<arbitrary>], iteration_bounds = array<i64: 1>, scalar_prefetch = 0 : i64, scratch_operands = 0 : i64, tpu.core_type = #tpu.core_type<tc>, window_params = [{pipeline_mode = #tpu.pipeline_mode<synchronous>, transform_indices = @transform_0, window_bounds = array<i64: 1, 32>}, {pipeline_mode = #tpu.pipeline_mode<synchronous>, transform_indices = @transform_1, window_bounds = array<i64: 32, 1>}, {pipeline_mode = #tpu.pipeline_mode<synchronous>, transform_indices = @transform_2, window_bounds = array<i64: 32, 8>}, {pipeline_mode = #tpu.pipeline_mode<synchronous>, transform_indices = @transform_3, window_bounds = array<i64: 16, 8>}, {pipeline_mode = #tpu.pipeline_mode<synchronous>, transform_indices = @transform_4, window_bounds = array<i64: 32, 4>}, {pipeline_mode = #tpu.pipeline_mode<synchronous>, transform_indices = @transform_5, window_bounds = array<i64: 8, 8>}, {pipeline_mode = #tpu.pipeline_mode<synchronous>, transform_indices = @transform_6, window_bounds = array<i64: 1, 8>}, {pipeline_mode = #tpu.pipeline_mode<synchronous>, transform_indices = @transform_7, window_bounds = array<i64: 256, 16>}, {pipeline_mode = #tpu.pipeline_mode<synchronous>, transform_indices = @transform_8, window_bounds = array<i64: 32, 16>}, {pipeline_mode = #tpu.pipeline_mode<synchronous>, transform_indices = @transform_9, window_bounds = array<i64: 16, 16>}, {pipeline_mode = #tpu.pipeline_mode<synchronous>, transform_indices = @transform_10, window_bounds = array<i64: 1, 16>}, {pipeline_mode = #tpu.pipeline_mode<synchronous>, transform_indices = @transform_11, window_bounds = array<i64: 1, 16>}, {pipeline_mode = #tpu.pipeline_mode<synchronous>, transform_indices = @transform_12, window_bounds = array<i64: 16, 16>}]} {
    %c0 = arith.constant 0 : index
    %c0_0 = arith.constant 0 : index
    %0 = vector.load %arg3[%c0, %c0_0] : memref<32x8xf32, #tpu.memory_space<vmem>>, vector<32x8xf32>
    %c0_1 = arith.constant 0 : index
    %c0_2 = arith.constant 0 : index
    %1 = vector.load %arg6[%c0_1, %c0_2] : memref<8x8xf32, #tpu.memory_space<vmem>>, vector<8x8xf32>
    %cst = arith.constant dense<0.000000e+00> : vector<32x8xf32>
    %2 = tpu.matmul %0, %1, %cst {dimension_numbers = #tpu.dot_dimension_numbers<[1], [0], [0], [1], [0, 0, 1, 1], [], []>} : vector<32x8xf32>, vector<8x8xf32>, vector<32x8xf32> -> vector<32x8xf32>
    %c0_3 = arith.constant 0 : index
    %c0_4 = arith.constant 0 : index
    %3 = vector.load %arg7[%c0_3, %c0_4] : memref<1x8xf32, #tpu.memory_space<vmem>>, vector<1x8xf32>
    %4 = vector.broadcast %3 : vector<1x8xf32> to vector<32x8xf32>
    %5 = arith.addf %2, %4 : vector<32x8xf32>
    %cst_5 = arith.constant 0.000000e+00 : f32
    %6 = vector.broadcast %cst_5 : f32 to vector<32x8xf32>
    %7 = arith.maximumf %5, %6 : vector<32x8xf32>
    %8 = tpu.iota {dimensions = array<i32: 1>} : vector<32x16xi32>
    %c0_6 = arith.constant 0 : index
    %c0_7 = arith.constant 0 : index
    %9 = vector.load %arg2[%c0_6, %c0_7] : memref<32x1xi32, #tpu.memory_space<vmem>>, vector<32x1xi32>
    %10 = vector.broadcast %9 : vector<32x1xi32> to vector<32x16xi32>
    %11 = arith.cmpi eq, %10, %8 : vector<32x16xi32>
    %12 = arith.extui %11 : vector<32x16xi1> to vector<32x16xi32>
    %13 = arith.sitofp %12 : vector<32x16xi32> to vector<32x16xf32>
    %c0_8 = arith.constant 0 : index
    %c0_9 = arith.constant 0 : index
    %14 = vector.load %arg4[%c0_8, %c0_9] : memref<16x8xf32, #tpu.memory_space<vmem>>, vector<16x8xf32>
    %cst_10 = arith.constant dense<0.000000e+00> : vector<32x8xf32>
    %15 = tpu.matmul %13, %14, %cst_10 {dimension_numbers = #tpu.dot_dimension_numbers<[1], [0], [0], [1], [0, 0, 1, 1], [], []>} : vector<32x16xf32>, vector<16x8xf32>, vector<32x8xf32> -> vector<32x8xf32>
    %16 = vector.shape_cast %15 : vector<32x8xf32> to vector<32x8x1xf32>
    %c0_11 = arith.constant 0 : index
    %c0_12 = arith.constant 0 : index
    %17 = vector.load %arg5[%c0_11, %c0_12] : memref<32x4xf32, #tpu.memory_space<vmem>>, vector<32x4xf32>
    %18 = vector.shape_cast %17 : vector<32x4xf32> to vector<32x1x4xf32>
    %19 = vector.broadcast %16 : vector<32x8x1xf32> to vector<32x8x4xf32>
    %20 = vector.broadcast %18 : vector<32x1x4xf32> to vector<32x8x4xf32>
    %21 = arith.mulf %19, %20 : vector<32x8x4xf32>
    %22 = vector.shape_cast %21 : vector<32x8x4xf32> to vector<32x32xf32>
    %23 = vector.shape_cast %7 : vector<32x8xf32> to vector<32x8x1xf32>
    %24 = vector.shape_cast %22 : vector<32x32xf32> to vector<32x1x32xf32>
    %25 = vector.broadcast %23 : vector<32x8x1xf32> to vector<32x8x32xf32>
    %26 = vector.broadcast %24 : vector<32x1x32xf32> to vector<32x8x32xf32>
    %27 = arith.mulf %25, %26 : vector<32x8x32xf32>
    %28 = vector.shape_cast %27 : vector<32x8x32xf32> to vector<32x256xf32>
    %c0_13 = arith.constant 0 : index
    %c0_14 = arith.constant 0 : index
    %29 = vector.load %arg8[%c0_13, %c0_14] : memref<256x16xf32, #tpu.memory_space<vmem>>, vector<256x16xf32>
    %cst_15 = arith.constant dense<0.000000e+00> : vector<32x16xf32>
    %30 = tpu.matmul %28, %29, %cst_15 {dimension_numbers = #tpu.dot_dimension_numbers<[1], [0], [0], [1], [0, 0, 1, 1], [], []>} : vector<32x256xf32>, vector<256x16xf32>, vector<32x16xf32> -> vector<32x16xf32>
    %c0_16 = arith.constant 0 : index
    %c0_17 = arith.constant 0 : index
    %31 = vector.load %arg9[%c0_16, %c0_17] : memref<32x16xf32, #tpu.memory_space<vmem>>, vector<32x16xf32>
    %cst_18 = arith.constant dense<0.000000e+00> : vector<32x16xf32>
    %32 = tpu.matmul %22, %31, %cst_18 {dimension_numbers = #tpu.dot_dimension_numbers<[1], [0], [0], [1], [0, 0, 1, 1], [], []>} : vector<32x32xf32>, vector<32x16xf32>, vector<32x16xf32> -> vector<32x16xf32>
    %33 = arith.addf %30, %32 : vector<32x16xf32>
    %cst_19 = arith.constant 0.176776692 : f32
    %34 = vector.broadcast %cst_19 : f32 to vector<32x16xf32>
    %35 = arith.mulf %33, %34 : vector<32x16xf32>
    %36 = tpu.iota {dimensions = array<i32: 0>} : vector<16x32xi32>
    %c0_20 = arith.constant 0 : index
    %c0_21 = arith.constant 0 : index
    %37 = vector.load %arg1[%c0_20, %c0_21] : memref<1x32xi32, #tpu.memory_space<vmem>>, vector<1x32xi32>
    %38 = vector.broadcast %37 : vector<1x32xi32> to vector<16x32xi32>
    %39 = arith.cmpi eq, %38, %36 : vector<16x32xi32>
    %40 = arith.extui %39 : vector<16x32xi1> to vector<16x32xi32>
    %41 = arith.sitofp %40 : vector<16x32xi32> to vector<16x32xf32>
    %cst_22 = arith.constant dense<0.000000e+00> : vector<16x16xf32>
    %42 = tpu.matmul %41, %35, %cst_22 {dimension_numbers = #tpu.dot_dimension_numbers<[1], [0], [0], [1], [0, 0, 1, 1], [], []>} : vector<16x32xf32>, vector<32x16xf32>, vector<16x16xf32> -> vector<16x16xf32>
    %cst_23 = arith.constant dense<0.000000e+00> : vector<16xf32>
    %43 = vector.multi_reduction <add>, %41, %cst_23 [1] : vector<16x32xf32> to vector<16xf32>
    %44 = vector.shape_cast %43 : vector<16xf32> to vector<16x1xf32>
    %cst_24 = arith.constant 1.000000e+00 : f32
    %45 = vector.broadcast %cst_24 : f32 to vector<16x1xf32>
    %46 = arith.maximumf %44, %45 : vector<16x1xf32>
    %47 = vector.broadcast %46 : vector<16x1xf32> to vector<16x16xf32>
    %48 = arith.divf %42, %47 : vector<16x16xf32>
    %c0_25 = arith.constant 0 : index
    %c0_26 = arith.constant 0 : index
    %49 = vector.load %arg10[%c0_25, %c0_26] : memref<16x16xf32, #tpu.memory_space<vmem>>, vector<16x16xf32>
    %50 = arith.addf %48, %49 : vector<16x16xf32>
    %cst_27 = arith.constant dense<0.000000e+00> : vector<16xf32>
    %51 = vector.multi_reduction <add>, %50, %cst_27 [0] : vector<16x16xf32> to vector<16xf32>
    %52 = vector.shape_cast %51 : vector<16xf32> to vector<1x16xf32>
    %cst_28 = arith.constant 1.600000e+01 : f32
    %53 = vector.broadcast %cst_28 : f32 to vector<1x16xf32>
    %54 = arith.divf %52, %53 : vector<1x16xf32>
    %55 = vector.broadcast %54 : vector<1x16xf32> to vector<16x16xf32>
    %56 = arith.subf %50, %55 : vector<16x16xf32>
    %57 = arith.mulf %56, %56 : vector<16x16xf32>
    %cst_29 = arith.constant dense<0.000000e+00> : vector<16xf32>
    %58 = vector.multi_reduction <add>, %57, %cst_29 [0] : vector<16x16xf32> to vector<16xf32>
    %59 = vector.shape_cast %58 : vector<16xf32> to vector<1x16xf32>
    %cst_30 = arith.constant 1.600000e+01 : f32
    %60 = vector.broadcast %cst_30 : f32 to vector<1x16xf32>
    %61 = arith.divf %59, %60 : vector<1x16xf32>
    %cst_31 = arith.constant 9.99999974E-6 : f32
    %62 = vector.broadcast %cst_31 : f32 to vector<1x16xf32>
    %63 = arith.addf %61, %62 : vector<1x16xf32>
    %64 = math.rsqrt %63 : vector<1x16xf32>
    %65 = vector.broadcast %64 : vector<1x16xf32> to vector<16x16xf32>
    %66 = arith.mulf %56, %65 : vector<16x16xf32>
    %c0_32 = arith.constant 0 : index
    %c0_33 = arith.constant 0 : index
    %67 = vector.load %arg11[%c0_32, %c0_33] : memref<1x16xf32, #tpu.memory_space<vmem>>, vector<1x16xf32>
    %68 = vector.broadcast %67 : vector<1x16xf32> to vector<16x16xf32>
    %69 = arith.mulf %66, %68 : vector<16x16xf32>
    %c0_34 = arith.constant 0 : index
    %c0_35 = arith.constant 0 : index
    %70 = vector.load %arg12[%c0_34, %c0_35] : memref<1x16xf32, #tpu.memory_space<vmem>>, vector<1x16xf32>
    %71 = vector.broadcast %70 : vector<1x16xf32> to vector<16x16xf32>
    %72 = arith.addf %69, %71 : vector<16x16xf32>
    %c0_36 = arith.constant 0 : index
    %c0_37 = arith.constant 0 : index
    %73 = vector.load %arg13[%c0_36, %c0_37] : memref<16x16xf32, #tpu.memory_space<vmem>>, vector<16x16xf32>
    tpu.vector_store %arg13[%c0_36, %c0_37], %72 {strides = array<i32>} : memref<16x16xf32, #tpu.memory_space<vmem>>, vector<16x16xf32>,
    return
  }
  func.func @transform_0(%arg0: i32) -> (i32, i32) {
    %c0_i32 = arith.constant 0 : i32
    %c0_i32_0 = arith.constant 0 : i32
    %c0_i32_1 = arith.constant 0 : i32
    return %c0_i32, %c0_i32_0 : i32, i32
  }
  func.func @transform_1(%arg0: i32) -> (i32, i32) {
    %c0_i32 = arith.constant 0 : i32
    %c0_i32_0 = arith.constant 0 : i32
    %c0_i32_1 = arith.constant 0 : i32
    return %c0_i32, %c0_i32_0 : i32, i32
  }
  func.func @transform_2(%arg0: i32) -> (i32, i32) {
    %c0_i32 = arith.constant 0 : i32
    %c0_i32_0 = arith.constant 0 : i32
    %c0_i32_1 = arith.constant 0 : i32
    return %c0_i32, %c0_i32_0 : i32, i32
  }
  func.func @transform_3(%arg0: i32) -> (i32, i32) {
    %c0_i32 = arith.constant 0 : i32
    %c0_i32_0 = arith.constant 0 : i32
    %c0_i32_1 = arith.constant 0 : i32
    return %c0_i32, %c0_i32_0 : i32, i32
  }
  func.func @transform_4(%arg0: i32) -> (i32, i32) {
    %c0_i32 = arith.constant 0 : i32
    %c0_i32_0 = arith.constant 0 : i32
    %c0_i32_1 = arith.constant 0 : i32
    return %c0_i32, %c0_i32_0 : i32, i32
  }
  func.func @transform_5(%arg0: i32) -> (i32, i32) {
    %c0_i32 = arith.constant 0 : i32
    %c0_i32_0 = arith.constant 0 : i32
    %c0_i32_1 = arith.constant 0 : i32
    return %c0_i32, %c0_i32_0 : i32, i32
  }
  func.func @transform_6(%arg0: i32) -> (i32, i32) {
    %c0_i32 = arith.constant 0 : i32
    %c0_i32_0 = arith.constant 0 : i32
    %c0_i32_1 = arith.constant 0 : i32
    return %c0_i32, %c0_i32_0 : i32, i32
  }
  func.func @transform_7(%arg0: i32) -> (i32, i32) {
    %c0_i32 = arith.constant 0 : i32
    %c0_i32_0 = arith.constant 0 : i32
    %c0_i32_1 = arith.constant 0 : i32
    return %c0_i32, %c0_i32_0 : i32, i32
  }
  func.func @transform_8(%arg0: i32) -> (i32, i32) {
    %c0_i32 = arith.constant 0 : i32
    %c0_i32_0 = arith.constant 0 : i32
    %c0_i32_1 = arith.constant 0 : i32
    return %c0_i32, %c0_i32_0 : i32, i32
  }
  func.func @transform_9(%arg0: i32) -> (i32, i32) {
    %c0_i32 = arith.constant 0 : i32
    %c0_i32_0 = arith.constant 0 : i32
    %c0_i32_1 = arith.constant 0 : i32
    return %c0_i32, %c0_i32_0 : i32, i32
  }
  func.func @transform_10(%arg0: i32) -> (i32, i32) {
    %c0_i32 = arith.constant 0 : i32
    %c0_i32_0 = arith.constant 0 : i32
    %c0_i32_1 = arith.constant 0 : i32
    return %c0_i32, %c0_i32_0 : i32, i32
  }
  func.func @transform_11(%arg0: i32) -> (i32, i32) {
    %c0_i32 = arith.constant 0 : i32
    %c0_i32_0 = arith.constant 0 : i32
    %c0_i32_1 = arith.constant 0 : i32
    return %c0_i32, %c0_i32_0 : i32, i32
  }
  func.func @transform_12(%arg0: i32) -> (i32, i32) {
    %c0_i32 = arith.constant 0 : i32
    %c0_i32_0 = arith.constant 0 : i32
    %c0_i32_1 = arith.constant 0 : i32
    return %c0_i32, %c0_i32_0 : i32, i32
  }
}

</mosaic_0001>

<bundles_post_ra>
// kernel: tensor_product_conv_layer.1
= control target key start
LH: loop header
LB: loop body
LE: loop exit
PB: predicated region body
PF: predicated region fallthrough
CT: control target
= control target key end

     0   :  { %vm54_vm0 = vcmask 64512   ;;  %v6033_v2 = vmov 0   ;;  %s9667_s0 = inlined_call_operand.vmem [shape: s32[1,32], index: 0, kind: input, shape index: {}]   ;;  %s9668_s1 = inlined_call_operand.vmem [shape: s32[32,1], index: 1, kind: input, shape index: {}]   ;;  %s9669_s2 = inlined_call_operand.vmem [shape: f32[32,8], index: 2, kind: input, shape index: {}]   ;;  %s9670_s3 = inlined_call_operand.vmem [shape: f32[16,8], index: 3, kind: input, shape index: {}]   ;;  %s9671_s4 = inlined_call_operand.vmem [shape: f32[32,4], index: 4, kind: input, shape index: {}]   ;;  %s9672_s5 = inlined_call_operand.vmem [shape: f32[8,8], index: 5, kind: input, shape index: {}]   ;;  %s9673_s6 = inlined_call_operand.vmem [shape: f32[1,8], index: 6, kind: input, shape index: {}]   ;;  %s9674_s7 = inlined_call_operand.vmem [shape: f32[256,16], index: 7, kind: input, shape index: {}]   ;;  %s9675_s8 = inlined_call_operand.vmem [shape: f32[32,16], index: 8, kind: input, shape index: {}]   ;;  %s9676_s9 = inlined_call_operand.vmem [shape: f32[16,16], index: 9, kind: input, shape index: {}]   ;;  %s9677_s10 = inlined_call_operand.vmem [shape: f32[1,16], index: 10, kind: input, shape index: {}]   ;;  %s9678_s11 = inlined_call_operand.vmem [shape: f32[1,16], index: 11, kind: input, shape index: {}]   ;;  %s9679_s12 = inlined_call_operand.hbm [shape: f32[16,16], index: 12, kind: output, shape index: {}]  }
   0x1   :  { %v158_v0 = vld [vmem:[%s9668_s1] sm:$0xff]  ;;  %v160_v1 = vld [vmem:[%s9668_s1 + $0x10] sm:$0xff]  ;;  %5937 = vset.pattern.permute.xlu0 %v6033_v2  ;;  %5938 = vset.pattern.permute.xlu1 %v6033_v2  ;;  %v43_v5 = vld [vmem:[%s9669_s2 + $0x8] sm:$0xff] }
   0x2   :  { %v46_v3 = vld [vmem:[%s9672_s5] sm:$0xff]  ;;  %163 = vperm.xlu0 %5937, %v158_v0   ;;  %169 = vperm.xlu1 %5938, %v160_v1   ;;  %v187_v7 = vld [vmem:[%s9670_s3 + $0x8] sm:$0xff]  ;;  %v161_v9 = vld [vmem:[%s9668_s1 + $0x18] sm:$0xff] }
   0x3   :  { %v42_v4 = vld [vmem:[%s9669_s2] sm:$0xff]  ;;  %v159_v8 = vld [vmem:[%s9668_s1 + $0x8] sm:$0xff]  ;;  %5825 = vmatprep.subr.mxu0 %v46_v3  ;;  %v44_v11 = vld [vmem:[%s9669_s2 + $0x10] sm:$0xff] }
   0x4   :  { %v186_v6 = vld [vmem:[%s9670_s3] sm:$0xff]  ;;  %5827 = vmatprep.mubr.msk.f32.mxu0 %vm54_vm0, %v42_v4  ;;  %5826 = vmatpush3.msra.mxu0 %v46_v3 }
   0x5   :  { %v5868_v10 = vpack.c.bf16 %v187_v7, %v186_v6 }
   0x6   :  { %17 = vsyncpa [#allocation3], 0  ;;  %5828 = vmatmul.mubr.msk.f32.vlgmr.msra.gmra.mrb[0].mxu0 %vm54_vm0, %v43_v5  ;;  %166 = vperm.xlu0 %5937, %v159_v8   ;;  %v45_v12 = vld [vmem:[%s9669_s2 + $0x18] sm:$0xff]  ;;  %v156_v13 = vlaneseq  ;;  %vm188_vm1 = vcmask 130048   ;;  %v9680_v17 = vmov 0.0   ;;  %s6038_s26 = smov 4  }
   0x7   :  { %5869 = vmatprep.subr.bf16.mxu0 %v5868_v10  ;;  %172 = vperm.xlu1 %5938, %v161_v9   ;;  %v5732_v25 = vld [vmem:[%s9673_s6] ss:$0 sm:$0xff]  ;;  %s6039_s29 = smov 8   ;;  %s6041_s14 = smov 12   ;;  %vm1562_vm6 = vcmask 31744   ;;  %vm1571_vm7 = vcmask 97280  }
   0x8   :  { %5871 = vmatpush3.bf16.msra.mxu0 %v5868_v10  ;;  %5830 = vmatprep.mubr.msk.f32.mxu0 %vm54_vm0, %v44_v11  ;;  %v157_v14 = vand.u32 127, %v156_v13  ;;  %v6160_v24 = vshrl.u32 %v156_v13, 7  ;;  %s6042_s15 = smov 20   ;;  %s6043_s16 = smov 24   ;;  %vm1580_vm8 = vcmask 162816   ;;  %vm1585_vm9 = vcmask 195584  }
   0x9   :  { %s6044_s17 = smov 28   ;;  %vm1590_vm10 = vcmask 228352   ;;  %s6045_s28 = smov 64   ;;  %vm5307_vm11 = vcmask 261120   ;;  %vm5312_vm12 = vcmask 523264   ;;  %vm5317_vm13 = vcmask 785408  }
   0xa   :  { %5831 = vmatmul.mubr.msk.f32.gmra.mrb[2].mxu0 %vm54_vm0, %v45_v12  ;;  %9878 = vst [vmem:[#allocation5_spill] sm:$0xff] %v6160_v24  ;;  %v6166_v27 = vsub.s32 0, %v6160_v24  ;;  %v6169_v29 = vsub.s32 1, %v6160_v24  ;;  %v6172_v32 = vsub.s32 3, %v6160_v24  ;;  %v6175_v33 = vsub.s32 2, %v6160_v24  ;;  %s6046_s19 = smov 32  }
   0xb   :  { %v6182_v40 = vsub.s32 5, %v6160_v24  ;;  %v6185_v41 = vsub.s32 4, %v6160_v24  ;;  %v6192_v44 = vsub.s32 7, %v6160_v24  ;;  %v6197_v48 = vsub.s32 6, %v6160_v24  ;;  %s6047_s1 = smov 96  }
   0xc   :  { %9879 = vst [vmem:[#allocation6_spill] sm:$0xff] %v6166_v27  ;;  %9880 = vst [vmem:[#allocation7_spill] sm:$0xff] %v6169_v29 }
   0xd   :  { %9881 = vst [vmem:[#allocation8_spill] sm:$0xff] %v6172_v32  ;;  %9882 = vst [vmem:[#allocation9_spill] sm:$0xff] %v6175_v33 }
   0xe   :  { %9883 = vst [vmem:[#allocation10_spill] sm:$0xff] %v6182_v40  ;;  %9884 = vst [vmem:[#allocation11_spill] sm:$0xff] %v6185_v41 }
   0xf   :  { %9887 = vst [vmem:[#allocation14_spill] sm:$0xff] %v6192_v44  ;;  %9888 = vst [vmem:[#allocation15_spill] sm:$0xff] %v6197_v48 }
  0x81   :  { %v164_v15 = vpop.permute.xlu0 %163  ;;  %v170_v16 = vpop.permute.xlu1 %169 }
  0x82   :  { %vm174_vm2 = vcmp.eq.s32.totalorder %v164_v15, %v157_v14  ;;  %vm176_vm3 = vcmp.eq.s32.totalorder %v170_v16, %v157_v14 }
  0x83   :  { %v5737_v18 = vsel %vm174_vm2, 1.0, %v9680_v17  ;;  %v5739_v21 = vsel %vm176_vm3, 1.0, %v9680_v17 }
  0x84   :  { %5837 = vmatprep.mubr.msk.f32.mxu0 %vm188_vm1, %v5737_v18 }
  0x85   :  { %v167_v19 = vpop.permute.xlu0 %166 }
  0x86   :  { %v173_v20 = vpop.permute.xlu1 %172  ;;  %vm175_vm4 = vcmp.eq.s32.totalorder %v167_v19, %v157_v14 }
  0x87   :  { %vm177_vm5 = vcmp.eq.s32.totalorder %v173_v20, %v157_v14  ;;  %v5738_v22 = vsel %vm175_vm4, 1.0, %v9680_v17 }
  0x88   :  { %5838 = vmatmul.mubr.msk.f32.vlgmr.msra.gmra.mrb[4].mxu0 %vm188_vm1, %v5738_v22  ;;  %v5740_v23 = vsel %vm177_vm5, 1.0, %v9680_v17 }
  0x89   :  { %5840 = vmatprep.mubr.msk.f32.mxu0 %vm188_vm1, %v5739_v21 }
  0x8c   :  { %5841 = vmatmul.mubr.msk.f32.gmra.mrb[6].mxu0 %vm188_vm1, %v5740_v23 }
  0xd9   :  { %v5829_v26 = vpop.f32.mrb[0].mxu0 }
  0xda   :  { %v139_v28 = vadd.f32 %v5829_v26, %v5732_v25  ;;  %v133_v30 = vpop.f32.mrb[1].mxu0 }
  0xdb   :  { %v134_v47 = vadd.f32 %v5732_v25, %v133_v30 }
  0xdc   :  { %v153_v31 = vmax.f32 %v139_v28, 0.0 }
  0xdd   :  { %v5832_v34 = vpop.f32.mrb[2].mxu0  ;;  %v152_v49 = vmax.f32 %v134_v47, 0.0 }
  0xde   :  { %v1661_v35 = vrot.slane %v153_v31, %v6169_v29  ;;  %v1654_v36 = vrot.slane %v153_v31, %v6166_v27  ;;  %v143_v37 = vpop.f32.mrb[3].mxu0  ;;  %v1675_v38 = vrot.slane %v153_v31, %v6172_v32  ;;  %v1668_v39 = vrot.slane %v153_v31, %v6175_v33 }
  0xdf   :  { %v6187_v42 = vadd.f32 %v5832_v34, %v5732_v25  ;;  %v6189_v43 = vadd.f32 %v5732_v25, %v143_v37  ;;  %v1689_v45 = vrot.slane %v153_v31, %v6182_v40  ;;  %v1682_v46 = vrot.slane %v153_v31, %v6185_v41 }
  0xe0   :  { %1663 = vbcast.lane.b32.xlu1 %v1661_v35, 256  ;;  %1656 = vbcast.lane.b32.xlu0 %v1654_v36, 256  ;;  %v1703_v50 = vrot.slane %v153_v31, %v6192_v44  ;;  %v1696_v51 = vrot.slane %v153_v31, %v6197_v48  ;;  %v1605_v52 = vrot.slane %v152_v49, %v6169_v29 }
  0xe1   :  { %9885 = vst [vmem:[#allocation12_spill] sm:$0xff] %v6187_v42  ;;  %9886 = vst [vmem:[#allocation13_spill] sm:$0xff] %v6189_v43  ;;  %v1598_v53 = vrot.slane %v152_v49, %v6166_v27  ;;  %v1619_v54 = vrot.slane %v152_v49, %v6172_v32  ;;  %v1612_v55 = vrot.slane %v152_v49, %v6175_v33 }
  0xe2   :  { %v1633_v56 = vrot.slane %v152_v49, %v6182_v40  ;;  %v1626_v57 = vrot.slane %v152_v49, %v6185_v41  ;;  %v1647_v58 = vrot.slane %v152_v49, %v6192_v44  ;;  %v1640_v59 = vrot.slane %v152_v49, %v6197_v48 }
  0xe4   :  { %1677 = vbcast.lane.b32.xlu1 %v1675_v38, 256  ;;  %1670 = vbcast.lane.b32.xlu0 %v1668_v39, 256 }
  0xe8   :  { %1691 = vbcast.lane.b32.xlu1 %v1689_v45, 256  ;;  %1684 = vbcast.lane.b32.xlu0 %v1682_v46, 256 }
  0xec   :  { %1705 = vbcast.lane.b32.xlu1 %v1703_v50, 256  ;;  %1698 = vbcast.lane.b32.xlu0 %v1696_v51, 256 }
  0xf0   :  { %1607 = vbcast.lane.b32.xlu1 %v1605_v52, 256  ;;  %1600 = vbcast.lane.b32.xlu0 %v1598_v53, 256  ;;  %v6035_v52 = vmov 1966171168  }
  0xf1   :  { %v520_v53 = vunpack.c.l.s4 %v6035_v52 }
  0xf4   :  { %1621 = vbcast.lane.b32.xlu1 %v1619_v54, 256  ;;  %1614 = vbcast.lane.b32.xlu0 %v1612_v55, 256  ;;  %v521_v54 = vunpack.c.0.s8 %v520_v53 }
  0xf8   :  { %1635 = vbcast.lane.b32.xlu1 %v1633_v56, 256  ;;  %1628 = vbcast.lane.b32.xlu0 %v1626_v57, 256  ;;  %v6262_v57 = vsub.s32 %v521_v54, %v6160_v24 }
  0xfc   :  { %1649 = vbcast.lane.b32.xlu1 %v1647_v58, 256  ;;  %1642 = vbcast.lane.b32.xlu0 %v1640_v59, 256  ;;  %v511_v58 = vld [vmem:[%s9671_s4 + $0x8] sm:$0xff] }
 0x152   :  { %v6241_v38 = vpop.permute.xlu1 %1663  ;;  %v6243_v39 = vpop.permute.xlu0 %1656 }
 0x153   :  { %9889 = vst [vmem:[#allocation16_spill] sm:$0xff] %v6241_v38  ;;  %9890 = vst [vmem:[#allocation17_spill] sm:$0xff] %v6243_v39 }
 0x156   :  { %v6245_v45 = vpop.permute.xlu1 %1677  ;;  %v6247_v46 = vpop.permute.xlu0 %1670 }
 0x157   :  { %9891 = vst [vmem:[#allocation18_spill] sm:$0xff] %v6245_v45  ;;  %9892 = vst [vmem:[#allocation19_spill] sm:$0xff] %v6247_v46 }
 0x15a   :  { %v6249_v47 = vpop.permute.xlu1 %1691  ;;  %v6251_v49 = vpop.permute.xlu0 %1684 }
 0x15b   :  { %v5839_v60 = vpop.f32.mrb[4].mxu0  ;;  %9893 = vst [vmem:[#allocation20_spill] sm:$0xff] %v6249_v47  ;;  %9894 = vst [vmem:[#allocation21_spill] sm:$0xff] %v6251_v49 }
 0x15c   :  { %v267_v61 = vpop.f32.mrb[5].mxu0  ;;  %v352_v62 = vrot.slane %v5839_v60, %v6169_v29  ;;  %v345_v63 = vrot.slane %v5839_v60, %v6166_v27  ;;  %v366_v1 = vrot.slane %v5839_v60, %v6172_v32  ;;  %v359_v2 = vrot.slane %v5839_v60, %v6175_v33 }
 0x15d   :  { %v380_v4 = vrot.slane %v5839_v60, %v6182_v40  ;;  %v373_v5 = vrot.slane %v5839_v60, %v6185_v41  ;;  %v394_v6 = vrot.slane %v5839_v60, %v6192_v44  ;;  %v387_v7 = vrot.slane %v5839_v60, %v6197_v48 }
 0x15e   :  { %354 = vbcast.lane.b32.xlu1 %v352_v62, 256  ;;  %347 = vbcast.lane.b32.xlu0 %v345_v63, 256  ;;  %v296_v8 = vrot.slane %v267_v61, %v6169_v29  ;;  %v289_v9 = vrot.slane %v267_v61, %v6166_v27  ;;  %v310_v10 = vrot.slane %v267_v61, %v6172_v32  ;;  %v6253_v50 = vpop.permute.xlu1 %1705  ;;  %v6255_v51 = vpop.permute.xlu0 %1698 }
 0x15f   :  { %v5842_v0 = vpop.f32.mrb[6].mxu0  ;;  %v303_v11 = vrot.slane %v267_v61, %v6175_v33  ;;  %v324_v12 = vrot.slane %v267_v61, %v6182_v40  ;;  %v317_v13 = vrot.slane %v267_v61, %v6185_v41  ;;  %v338_v14 = vrot.slane %v267_v61, %v6192_v44  ;;  %9895 = vst [vmem:[#allocation22_spill] sm:$0xff] %v6253_v50 }
 0x160   :  { %v277_v3 = vpop.f32.mrb[7].mxu0  ;;  %v331_v15 = vrot.slane %v267_v61, %v6197_v48  ;;  %v464_v16 = vrot.slane %v5842_v0, %v6169_v29  ;;  %v457_v18 = vrot.slane %v5842_v0, %v6166_v27  ;;  %v478_v19 = vrot.slane %v5842_v0, %v6172_v32  ;;  %9896 = vst [vmem:[#allocation23_spill] sm:$0xff] %v6255_v51 }
 0x161   :  { %v471_v20 = vrot.slane %v5842_v0, %v6175_v33  ;;  %v492_v21 = vrot.slane %v5842_v0, %v6182_v40  ;;  %v485_v22 = vrot.slane %v5842_v0, %v6185_v41  ;;  %v506_v23 = vrot.slane %v5842_v0, %v6192_v44 }
 0x162   :  { %368 = vbcast.lane.b32.xlu1 %v366_v1, 256  ;;  %361 = vbcast.lane.b32.xlu0 %v359_v2, 256  ;;  %v499_v25 = vrot.slane %v5842_v0, %v6197_v48  ;;  %v408_v26 = vrot.slane %v277_v3, %v6169_v29  ;;  %v401_v28 = vrot.slane %v277_v3, %v6166_v27  ;;  %v6257_v55 = vpop.permute.xlu1 %1607  ;;  %v6259_v56 = vpop.permute.xlu0 %1600  ;;  %v6036_v2 = vmov 1983009808  }
 0x163   :  { %v422_v30 = vrot.slane %v277_v3, %v6172_v32  ;;  %v415_v31 = vrot.slane %v277_v3, %v6175_v33  ;;  %v436_v34 = vrot.slane %v277_v3, %v6182_v40  ;;  %v429_v35 = vrot.slane %v277_v3, %v6185_v41  ;;  %9897 = vst [vmem:[#allocation24_spill] sm:$0xff] %v6257_v55 }
 0x164   :  { %v450_v36 = vrot.slane %v277_v3, %v6192_v44  ;;  %v443_v37 = vrot.slane %v277_v3, %v6197_v48  ;;  %9898 = vst [vmem:[#allocation25_spill] sm:$0xff] %v6259_v56  ;;  %v574_v61 = vrot.slane %v511_v58, %v6262_v57  ;;  %v567_v1 = vcombine.high %v511_v58, %v511_v58 }
 0x165   :  { %v909_v3 = vunpack.c.l.s4 %v6036_v2 }
 0x166   :  { %382 = vbcast.lane.b32.xlu1 %v380_v4, 256  ;;  %375 = vbcast.lane.b32.xlu0 %v373_v5, 256  ;;  %v6267_v59 = vpop.permute.xlu1 %1621  ;;  %v6269_v60 = vpop.permute.xlu0 %1614  ;;  %v582_v62 = vcombine.high %v574_v61, %v574_v61  ;;  %v6037_v4 = vmov 1934713408  }
 0x167   :  { %9899 = vst [vmem:[#allocation26_spill] sm:$0xff] %v6267_v59  ;;  %9900 = vst [vmem:[#allocation27_spill] sm:$0xff] %v6269_v60  ;;  %v973_v5 = vunpack.c.l.s4 %v6037_v4 }
 0x16a   :  { %396 = vbcast.lane.b32.xlu1 %v394_v6, 256  ;;  %389 = vbcast.lane.b32.xlu0 %v387_v7, 256  ;;  %v6272_v63 = vpop.permute.xlu1 %1635  ;;  %v6274_v0 = vpop.permute.xlu0 %1628  ;;  %v604_v6 = vrot.slane %v582_v62, %v6262_v57  ;;  %v590_v7 = vrot.slane %v574_v61, %v6262_v57 }
 0x16b   :  { %9901 = vst [vmem:[#allocation28_spill] sm:$0xff] %v6272_v63  ;;  %9902 = vst [vmem:[#allocation29_spill] sm:$0xff] %v6274_v0 }
 0x16e   :  { %298 = vbcast.lane.b32.xlu1 %v296_v8, 256  ;;  %291 = vbcast.lane.b32.xlu0 %v289_v9, 256  ;;  %v581_v8 = vrot.slane %v567_v1, %v6262_v57  ;;  %v910_v9 = vunpack.c.0.s8 %v909_v3 }
 0x172   :  { %312 = vbcast.lane.b32.xlu1 %v310_v10, 256  ;;  %305 = vbcast.lane.b32.xlu0 %v303_v11, 256  ;;  %v974_v10 = vunpack.c.0.s8 %v973_v5  ;;  %v6279_v11 = vpop.permute.xlu1 %1649 }
 0x173   :  { %9903 = vst [vmem:[#allocation30_spill] sm:$0xff] %v6279_v11 }
 0x176   :  { %326 = vbcast.lane.b32.xlu1 %v324_v12, 256  ;;  %319 = vbcast.lane.b32.xlu0 %v317_v13, 256  ;;  %v6281_v12 = vpop.permute.xlu0 %1642  ;;  %v753_v13 = vrot.slane %v604_v6, %v6166_v27 }
 0x177   :  { %9904 = vst [vmem:[#allocation31_spill] sm:$0xff] %v6281_v12 }
 0x17a   :  { %340 = vbcast.lane.b32.xlu1 %v338_v14, 256  ;;  %333 = vbcast.lane.b32.xlu0 %v331_v15, 256  ;;  %v749_v14 = vrot.slane %v590_v7, %v6166_v27  ;;  %v614_v15 = vcombine.high %v604_v6, %v604_v6 }
 0x17e   :  { %466 = vbcast.lane.b32.xlu1 %v464_v16, 256  ;;  %459 = vbcast.lane.b32.xlu0 %v457_v18, 256  ;;  %v612_v16 = vcombine.high %v590_v7, %v590_v7  ;;  %v583_v18 = vcombine.high %v581_v8, %v581_v8 }
 0x182   :  { %480 = vbcast.lane.b32.xlu1 %v478_v19, 256  ;;  %473 = vbcast.lane.b32.xlu0 %v471_v20, 256  ;;  %v6286_v19 = vsub.s32 %v910_v9, %v6160_v24  ;;  %v510_v20 = vld [vmem:[%s9671_s4] sm:$0xff] }
 0x184   :  { %9905 = vst [vmem:[#allocation32_spill] sm:$0xff] %v6286_v19 }
 0x186   :  { %494 = vbcast.lane.b32.xlu1 %v492_v21, 256  ;;  %487 = vbcast.lane.b32.xlu0 %v485_v22, 256  ;;  %v6292_v21 = vsub.s32 %v974_v10, %v6160_v24  ;;  %v9913_v24 = vmov 0.0  }
 0x188   :  { %9906 = vst [vmem:[#allocation33_spill] sm:$0xff] %v6292_v21 }
 0x18a   :  { %508 = vbcast.lane.b32.xlu1 %v506_v23, 256  ;;  %501 = vbcast.lane.b32.xlu0 %v499_v25, 256 }
 0x18e   :  { %410 = vbcast.lane.b32.xlu1 %v408_v26, 256  ;;  %403 = vbcast.lane.b32.xlu0 %v401_v28, 256  ;;  %v761_v28 = vrot.slane %v614_v15, %v6166_v27 }
 0x192   :  { %424 = vbcast.lane.b32.xlu1 %v422_v30, 256  ;;  %417 = vbcast.lane.b32.xlu0 %v415_v31, 256  ;;  %v757_v30 = vrot.slane %v612_v16, %v6166_v27  ;;  %v611_v31 = vrot.slane %v583_v18, %v6262_v57 }
 0x194   :  { %v615_v58 = vcombine.high %v611_v31, %v611_v31  ;;  %v769_v4 = vrot.slane %v611_v31, %v6166_v27 }
 0x196   :  { %438 = vbcast.lane.b32.xlu1 %v436_v34, 256  ;;  %431 = vbcast.lane.b32.xlu0 %v429_v35, 256  ;;  %v597_v34 = vrot.slane %v581_v8, %v6262_v57  ;;  %v525_v35 = vrot.slane %v510_v20, %v6262_v57 }
 0x198   :  { %v613_v61 = vcombine.high %v597_v34, %v597_v34  ;;  %v765_v5 = vrot.slane %v597_v34, %v6166_v27  ;;  %v533_v6 = vcombine.high %v525_v35, %v525_v35 }
 0x19a   :  { %452 = vbcast.lane.b32.xlu1 %v450_v36, 256  ;;  %445 = vbcast.lane.b32.xlu0 %v443_v37, 256  ;;  %v518_v36 = vcombine.high %v510_v20, %v510_v20 }
 0x19c   :  { %v532_v7 = vrot.slane %v518_v36, %v6262_v57 }
 0x1d0   :  { %v355_v22 = vpop.permute.xlu1 %354  ;;  %v348_v23 = vpop.permute.xlu0 %347 }
 0x1d1   :  { %v6294_v25 = vmul.f32 %v753_v13, %v355_v22  ;;  %v6296_v26 = vmul.f32 %v749_v14, %v348_v23  ;;  %v777_v23 = vrot.slane %v615_v58, %v6166_v27 }
 0x1d3   :  { %v6305_v37 = vrot.slane %v6294_v25, %v6286_v19  ;;  %v6309_v52 = vrot.slane %v6296_v26, %v6286_v19 }
 0x1d4   :  { %v369_v53 = vpop.permute.xlu1 %368  ;;  %v362_v54 = vpop.permute.xlu0 %361 }
 0x1d5   :  { %v6311_v62 = vmul.f32 %v761_v28, %v369_v53  ;;  %v6313_v1 = vmul.f32 %v757_v30, %v362_v54  ;;  %v6317_v2 = vrot.slane %v6305_v37, %v6292_v21  ;;  %v6321_v3 = vrot.slane %v6309_v52, %v6292_v21 }
 0x1d6   :  { %v773_v28 = vrot.slane %v613_v61, %v6166_v27  ;;  %v541_v30 = vrot.slane %v525_v35, %v6262_v57  ;;  %v555_v54 = vrot.slane %v533_v6, %v6262_v57  ;;  %v2275_v32 = vcombine.high %v6305_v37, %v9913_v24 }
 0x1d7   :  { %9907 = vst [vmem:[#allocation34_spill] sm:$0xff] %v6317_v2  ;;  %9908 = vst [vmem:[#allocation35_spill] sm:$0xff] %v6321_v3  ;;  %v2305_v16 = vcombine.high %v6317_v2, %v9680_v17  ;;  %v2256_v18 = vcombine.high %v6321_v3, %v9680_v17  ;;  %v6340_v20 = vrot.slane %v6311_v62, %v6286_v19 }
 0x1d8   :  { %v383_v14 = vpop.permute.xlu1 %382  ;;  %v376_v15 = vpop.permute.xlu0 %375  ;;  %v6344_v22 = vrot.slane %v6313_v1, %v6286_v19  ;;  %v563_v35 = vcombine.high %v541_v30, %v541_v30  ;;  %v565_v13 = vcombine.high %v555_v54, %v555_v54  ;;  %v717_v10 = vrot.slane %v541_v30, %v6166_v27 }
 0x1d9   :  { %v6349_v31 = vmul.f32 %v769_v4, %v383_v14  ;;  %v6351_v34 = vmul.f32 %v765_v5, %v376_v15  ;;  %3437 = vrot.lane.b32.xlu1 %v2305_v16, %s6038_s26  ;;  %3435 = vrot.lane.b32.xlu0 %v2256_v18, %s6038_s26  ;;  %v6357_v36 = vrot.slane %v6340_v20, %v6292_v21 }
 0x1da   :  { %v6361_v53 = vrot.slane %v6344_v22, %v6292_v21  ;;  %v534_v15 = vcombine.high %v532_v7, %v532_v7  ;;  %v2358_v60 = vcombine.high %v6311_v62, %v9913_v24 }
 0x1db   :  { %9909 = vst [vmem:[#allocation36_spill] sm:$0xff] %v6357_v36  ;;  %v2403_v4 = vcombine.high %v6357_v36, %v9680_v17  ;;  %v6368_v5 = vrot.slane %v6349_v31, %v6286_v19  ;;  %v6372_v14 = vrot.slane %v6351_v34, %v6286_v19 }
 0x1dc   :  { %9910 = vst [vmem:[#allocation37_spill] sm:$0xff] %v6361_v53  ;;  %v397_v58 = vpop.permute.xlu1 %396  ;;  %v390_v61 = vpop.permute.xlu0 %389  ;;  %v2354_v6 = vcombine.high %v6361_v53, %v9680_v17  ;;  %v562_v48 = vrot.slane %v534_v15, %v6262_v57 }
 0x1dd   :  { %v6374_v16 = vmul.f32 %v777_v23, %v397_v58  ;;  %v6376_v18 = vmul.f32 %v773_v28, %v390_v61  ;;  %3441 = vrot.lane.b32.xlu1 %v2403_v4, %s6038_s26  ;;  %v6384_v9 = vrot.slane %v6368_v5, %v6292_v21  ;;  %v6388_v8 = vrot.slane %v6372_v14, %v6292_v21 }
 0x1de   :  { %v6391_v23 = vrot.slane %v532_v7, %v6262_v57  ;;  %3439 = vrot.lane.b32.xlu0 %v2354_v6, %s6038_s26  ;;  %v721_v61 = vrot.slane %v555_v54, %v6166_v27  ;;  %v729_v6 = vrot.slane %v565_v13, %v6166_v27  ;;  %v725_v58 = vrot.slane %v563_v35, %v6166_v27  ;;  %v513_v54 = vld [vmem:[%s9671_s4 + $0x18] sm:$0xff] }
 0x1df   :  { %9911 = vst [vmem:[#allocation38_spill] sm:$0xff] %v6384_v9  ;;  %9912 = vst [vmem:[#allocation39_spill] sm:$0xff] %v6388_v8  ;;  %v2501_v7 = vcombine.high %v6384_v9, %v9913_v24  ;;  %v2452_v42 = vcombine.high %v6388_v8, %v9913_v24  ;;  %v6408_v28 = vrot.slane %v6374_v16, %v6286_v19 }
 0x1e0   :  { %v299_v4 = vpop.permute.xlu1 %298  ;;  %v292_v17 = vpop.permute.xlu0 %291  ;;  %v6412_v30 = vrot.slane %v6376_v18, %v6286_v19  ;;  %v566_v40 = vcombine.high %v562_v48, %v562_v48  ;;  %v564_v13 = vcombine.high %v6391_v23, %v6391_v23  ;;  %v672_v12 = vrot.slane %v513_v54, %v6262_v57 }
 0x1e1   :  { %3445 = vrot.lane.b32.xlu1 %v2501_v7, %s6038_s26  ;;  %v6421_v44 = vrot.slane %v6408_v28, %v6292_v21  ;;  %v6441_v29 = vmul.f32 %v721_v61, %v299_v4  ;;  %v6443_v43 = vmul.f32 %v717_v10, %v292_v17  ;;  %v665_v0 = vcombine.high %v513_v54, %v513_v54 }
 0x1e2   :  { %v6425_v41 = vrot.slane %v6412_v30, %v6292_v21  ;;  %3443 = vrot.lane.b32.xlu0 %v2452_v42, %s6038_s26  ;;  %v2226_v42 = vcombine.high %v6309_v52, %v9913_v24  ;;  %v6463_v4 = vrot.slane %v2275_v32, %v6292_v21  ;;  %v2324_v54 = vcombine.high %v6344_v22, %v9913_v24 }
 0x1e3   :  { %9914 = vst [vmem:[#allocation40_spill] sm:$0xff] %v6421_v44  ;;  %v2599_v7 = vcombine.high %v6421_v44, %v9913_v24  ;;  %v680_v32 = vcombine.high %v672_v12, %v672_v12 }
 0x1e4   :  { %9915 = vst [vmem:[#allocation41_spill] sm:$0xff] %v6425_v41  ;;  %v313_v35 = vpop.permute.xlu1 %312  ;;  %v306_v15 = vpop.permute.xlu0 %305  ;;  %v2550_v33 = vcombine.high %v6425_v41, %v9913_v24 }
 0x1e5   :  { %v6445_v56 = vmul.f32 %v729_v6, %v313_v35  ;;  %v6447_v55 = vmul.f32 %v725_v58, %v306_v15  ;;  %3449 = vrot.lane.b32.xlu1 %v2599_v7, %s6038_s26  ;;  %v733_v58 = vrot.slane %v6391_v23, %v6166_v27  ;;  %v2373_v6 = vcombine.high %v6340_v20, %v9913_v24 }
 0x1e6   :  { %3447 = vrot.lane.b32.xlu0 %v2550_v33, %s6038_s26  ;;  %v737_v35 = vrot.slane %v562_v48, %v6166_v27  ;;  %v6471_v15 = vrot.slane %v2226_v42, %v6292_v21  ;;  %v745_v33 = vrot.slane %v566_v40, %v6166_v27  ;;  %v741_v7 = vrot.slane %v564_v13, %v6166_v27 }
 0x1e7   :  { %v679_v23 = vrot.slane %v665_v0, %v6262_v57  ;;  %v6481_v48 = vrot.slane %v2373_v6, %v6292_v21  ;;  %v6484_v42 = vrot.slane %v2324_v54, %v6292_v21  ;;  %v2471_v40 = vcombine.high %v6368_v5, %v9913_v24 }
 0x1e8   :  { %v327_v10 = vpop.permute.xlu1 %326  ;;  %v320_v61 = vpop.permute.xlu0 %319  ;;  %v2422_v13 = vcombine.high %v6372_v14, %v9913_v24  ;;  %v702_v6 = vrot.slane %v680_v32, %v6262_v57  ;;  %v688_v54 = vrot.slane %v672_v12, %v6262_v57  ;;  %v2569_v12 = vcombine.high %v6408_v28, %v9913_v24 }
 0x1e9   :  { %3565 = vrot.lane.b32.xlu1 %v6463_v4, %s6039_s29  ;;  %v6490_v17 = vmul.f32 %v737_v35, %v327_v10  ;;  %v6492_v0 = vmul.f32 %v733_v58, %v320_v61  ;;  %v681_v63 = vcombine.high %v679_v23, %v679_v23  ;;  %v6513_v61 = vrot.slane %v2471_v40, %v6292_v21  ;;  %v512_v40 = vld [vmem:[%s9671_s4 + $0x10] sm:$0xff]  ;;  %s6040_s4 = smov 16  }
 0x1ea   :  { %3563 = vrot.lane.b32.xlu0 %v6471_v15, %s6039_s29  ;;  %v2260_v35 = vcombine.high %v6294_v25, %v9913_v24  ;;  %v6520_v32 = vrot.slane %v2422_v13, %v6292_v21  ;;  %v712_v28 = vcombine.high %v702_v6, %v702_v6  ;;  %v710_v58 = vcombine.high %v688_v54, %v688_v54 }
 0x1eb   :  { %v709_v10 = vrot.slane %v681_v63, %v6262_v57  ;;  %v623_v13 = vrot.slane %v512_v40, %v6262_v57  ;;  %v6539_v14 = vrot.slane %v2569_v12, %v6292_v21  ;;  %v817_v59 = vrot.slane %v702_v6, %v6166_v27 }
 0x1ec   :  { %v341_v20 = vpop.permute.xlu1 %340  ;;  %v334_v22 = vpop.permute.xlu0 %333  ;;  %v6542_v5 = vrot.slane %v2260_v35, %v6286_v19  ;;  %v813_v12 = vrot.slane %v688_v54, %v6166_v27  ;;  %v825_v35 = vrot.slane %v712_v28, %v6166_v27  ;;  %v821_v6 = vrot.slane %v710_v58, %v6166_v27 }
 0x1ed   :  { %v6494_v52 = vmul.f32 %v745_v33, %v341_v20  ;;  %v6496_v37 = vmul.f32 %v741_v7, %v334_v22  ;;  %3569 = vrot.lane.b32.xlu1 %v6481_v48, %s6039_s29  ;;  %v2520_v20 = vcombine.high %v6412_v30, %v9913_v24  ;;  %v2211_v22 = vcombine.high %v6296_v26, %v9913_v24 }
 0x1ee   :  { %3567 = vrot.lane.b32.xlu0 %v6484_v42, %s6039_s29  ;;  %v6536_v30 = vrot.slane %v679_v23, %v6262_v57  ;;  %v2309_v23 = vcombine.high %v6313_v1, %v9913_v24  ;;  %v713_v51 = vcombine.high %v709_v10, %v709_v10  ;;  %v631_v49 = vcombine.high %v623_v13, %v623_v13 }
 0x1ef   :  { %v6548_v39 = vrot.slane %v2520_v20, %v6292_v21  ;;  %v6551_v38 = vrot.slane %v2211_v22, %v6286_v19  ;;  %v833_v20 = vrot.slane %v709_v10, %v6166_v27  ;;  %v616_v47 = vcombine.high %v512_v40, %v512_v40 }
 0x1f0   :  { %v467_v33 = vpop.permute.xlu1 %466  ;;  %v460_v7 = vpop.permute.xlu0 %459  ;;  %v829_v22 = vrot.slane %v6536_v30, %v6166_v27  ;;  %v711_v54 = vcombine.high %v6536_v30, %v6536_v30  ;;  %v6569_v46 = vrot.slane %v6542_v5, %v6292_v21  ;;  %v6572_v58 = vrot.slane %v2358_v60, %v6286_v19 }
 0x1f1   :  { %3573 = vrot.lane.b32.xlu1 %v6513_v61, %s6039_s29  ;;  %v2456_v28 = vcombine.high %v6349_v31, %v9913_v24  ;;  %v6576_v45 = vmul.f32 %v817_v59, %v467_v33  ;;  %v6580_v41 = vrot.slane %v6551_v38, %v6292_v21  ;;  %v6583_v40 = vrot.slane %v2309_v23, %v6286_v19 }
 0x1f2   :  { %3571 = vrot.lane.b32.xlu0 %v6520_v32, %s6039_s29  ;;  %v2407_v30 = vcombine.high %v6351_v34, %v9913_v24  ;;  %v6587_v44 = vmul.f32 %v813_v12, %v460_v7  ;;  %v841_v33 = vrot.slane %v713_v51, %v6166_v27  ;;  %v653_v8 = vrot.slane %v631_v49, %v6262_v57 }
 0x1f3   :  { %9916 = vst [vmem:[#allocation42_spill] sm:$0xff] %v6576_v45  ;;  %v2554_v23 = vcombine.high %v6374_v16, %v9913_v24  ;;  %v2505_v7 = vcombine.high %v6376_v18, %v9913_v24  ;;  %v639_v12 = vrot.slane %v623_v13, %v6262_v57  ;;  %v6610_v51 = vrot.slane %v2456_v28, %v6286_v19 }
 0x1f4   :  { %v481_v63 = vpop.permute.xlu1 %480  ;;  %v474_v11 = vpop.permute.xlu0 %473  ;;  %9917 = vst [vmem:[#allocation43_spill] sm:$0xff] %v6587_v44  ;;  %v6618_v13 = vrot.slane %v6583_v40, %v6292_v21  ;;  %v663_v49 = vcombine.high %v653_v8, %v653_v8 }
 0x1f5   :  { %3577 = vrot.lane.b32.xlu1 %v6539_v14, %s6039_s29  ;;  %v6591_v59 = vmul.f32 %v825_v35, %v481_v63  ;;  %v6593_v60 = vmul.f32 %v821_v6, %v474_v11  ;;  %v630_v63 = vrot.slane %v616_v47, %v6262_v57  ;;  %v6607_v11 = vrot.slane %v6572_v58, %v6292_v21 }
 0x1f6   :  { %3575 = vrot.lane.b32.xlu0 %v6548_v39, %s6039_s29  ;;  %9920 = vst [vmem:[#allocation46_spill] sm:$0xff] %v6610_v51  ;;  %v6621_v47 = vrot.slane %v2407_v30, %v6286_v19  ;;  %v837_v35 = vrot.slane %v711_v54, %v6166_v27  ;;  %v781_v30 = vrot.slane %v639_v12, %v6166_v27 }
 0x1f7   :  { %9918 = vst [vmem:[#allocation44_spill] sm:$0xff] %v6591_v59  ;;  %9919 = vst [vmem:[#allocation45_spill] sm:$0xff] %v6593_v60  ;;  %v661_v3 = vcombine.high %v639_v12, %v639_v12  ;;  %v632_v2 = vcombine.high %v630_v63, %v630_v63  ;;  %v6637_v53 = vrot.slane %v6610_v51, %v6292_v21 }
 0x1f8   :  { %v495_v10 = vpop.permute.xlu1 %494  ;;  %v488_v50 = vpop.permute.xlu0 %487  ;;  %9921 = vst [vmem:[#allocation47_spill] sm:$0xff] %v6621_v47  ;;  %v6640_v28 = vrot.slane %v2554_v23, %v6286_v19  ;;  %v6644_v54 = vrot.slane %v6441_v29, %v6286_v19  ;;  %v6653_v12 = vrot.slane %v2505_v7, %v6286_v19  ;;  %v6657_v59 = vrot.slane %v6443_v43, %v6286_v19 }
 0x1f9   :  { %3821 = vrot.lane.b32.xlu1 %v6569_v46, %s6040_s4  ;;  %v6632_v36 = vmul.f32 %v833_v20, %v495_v10  ;;  %9923 = vst [vmem:[#allocation49_spill] sm:$0xff] %v6637_v53  ;;  %v6646_v60 = vmul.f32 %v829_v22, %v488_v50  ;;  %v6650_v10 = vrot.slane %v6621_v47, %v6292_v21 }
 0x1fa   :  { %3819 = vrot.lane.b32.xlu0 %v6580_v41, %s6040_s4  ;;  %9924 = vst [vmem:[#allocation50_spill] sm:$0xff] %v6640_v28  ;;  %9927 = vst [vmem:[#allocation53_spill] sm:$0xff] %v6653_v12  ;;  %v785_v22 = vrot.slane %v653_v8, %v6166_v27  ;;  %v793_v45 = vrot.slane %v663_v49, %v6166_v27  ;;  %v646_v47 = vrot.slane %v630_v63, %v6262_v57 }
 0x1fb   :  { %9922 = vst [vmem:[#allocation48_spill] sm:$0xff] %v6632_v36  ;;  %9925 = vst [vmem:[#allocation51_spill] sm:$0xff] %v6646_v60  ;;  %v6672_v7 = vrot.slane %v6445_v56, %v6286_v19  ;;  %v6681_v8 = vrot.slane %v6640_v28, %v6292_v21  ;;  %v6685_v63 = vrot.slane %v6644_v54, %v6292_v21 }
 0x1fc   :  { %v509_v6 = vpop.permute.xlu1 %508  ;;  %v502_v9 = vpop.permute.xlu0 %501  ;;  %9926 = vst [vmem:[#allocation52_spill] sm:$0xff] %v6650_v10  ;;  %v662_v49 = vcombine.high %v646_v47, %v646_v47 }
 0x1fd   :  { %3825 = vrot.lane.b32.xlu1 %v6607_v11, %s6040_s4  ;;  %v6659_v23 = vmul.f32 %v841_v33, %v509_v6  ;;  %v6663_v50 = vmul.f32 %v837_v35, %v502_v9  ;;  %v660_v35 = vrot.slane %v632_v2, %v6262_v57  ;;  %9930 = vst [vmem:[#allocation56_spill] sm:$0xff] %v6681_v8  ;;  %9931 = vst [vmem:[#allocation57_spill] sm:$0xff] %v6685_v63 }
 0x1fe   :  { %3823 = vrot.lane.b32.xlu0 %v6618_v13, %s6040_s4  ;;  %v6693_v9 = vrot.slane %v6653_v12, %v6292_v21  ;;  %v6697_v57 = vrot.slane %v6657_v59, %v6292_v21  ;;  %v1924_v2 = vrot.slane %v6447_v55, %v6286_v19  ;;  %v6708_v6 = vrot.slane %v6672_v7, %v6292_v21 }
 0x1ff   :  { %9928 = vst [vmem:[#allocation54_spill] sm:$0xff] %v6659_v23  ;;  %9929 = vst [vmem:[#allocation55_spill] sm:$0xff] %v6663_v50  ;;  %v789_v23 = vrot.slane %v661_v3, %v6166_v27  ;;  %v664_v60 = vcombine.high %v660_v35, %v660_v35  ;;  %v1913_v36 = vcombine.high %v6685_v63, %v9913_v24 }
 0x200   :  { %v411_v44 = vpop.permute.xlu1 %410  ;;  %v404_v20 = vpop.permute.xlu0 %403  ;;  %9932 = vst [vmem:[#allocation58_spill] sm:$0xff] %v6693_v9  ;;  %9933 = vst [vmem:[#allocation59_spill] sm:$0xff] %v6697_v57  ;;  %v2071_v3 = vrot.slane %v6490_v17, %v6286_v19  ;;  %v6723_v51 = vrot.slane %v1924_v2, %v6292_v21 }
 0x201   :  { %3829 = vrot.lane.b32.xlu1 %v6637_v53, %s6040_s4  ;;  %9934 = vst [vmem:[#allocation60_spill] sm:$0xff] %v6708_v6  ;;  %v6710_v50 = vmul.f32 %v785_v22, %v411_v44  ;;  %v6716_v12 = vmul.f32 %v781_v30, %v404_v20  ;;  %v2022_v44 = vrot.slane %v6492_v0, %v6286_v19 }
 0x202   :  { %3827 = vrot.lane.b32.xlu0 %v6650_v10, %s6040_s4  ;;  %9938 = vst [vmem:[#allocation64_spill] sm:$0xff] %v6723_v51  ;;  %v801_v30 = vrot.slane %v660_v35, %v6166_v27  ;;  %v805_v20 = vrot.slane %v662_v49, %v6166_v27  ;;  %v1962_v49 = vcombine.high %v6723_v51, %v9913_v24 }
 0x203   :  { %9935 = vst [vmem:[#allocation61_spill] sm:$0xff] %v6710_v50  ;;  %9936 = vst [vmem:[#allocation62_spill] sm:$0xff] %v6716_v12 }
 0x204   :  { %v425_v33 = vpop.permute.xlu1 %424  ;;  %v418_v10 = vpop.permute.xlu0 %417 }
 0x205   :  { %3833 = vrot.lane.b32.xlu1 %v6681_v8, %s6040_s4  ;;  %v6718_v8 = vmul.f32 %v793_v45, %v425_v33  ;;  %v6727_v22 = vmul.f32 %v789_v23, %v418_v10  ;;  %v797_v45 = vrot.slane %v646_v47, %v6166_v27  ;;  %v2011_v33 = vcombine.high %v6708_v6, %v9913_v24 }
 0x206   :  { %3831 = vrot.lane.b32.xlu0 %v6693_v9, %s6040_s4  ;;  %v1864_v9 = vcombine.high %v6697_v57, %v9913_v24  ;;  %v809_v23 = vrot.slane %v664_v60, %v6166_v27  ;;  %v2169_v47 = vrot.slane %v6494_v52, %v6286_v19  ;;  %v6753_v57 = vrot.slane %v2022_v44, %v6292_v21 }
 0x207   :  { %9937 = vst [vmem:[#allocation63_spill] sm:$0xff] %v6718_v8  ;;  %9939 = vst [vmem:[#allocation65_spill] sm:$0xff] %v6727_v22  ;;  %v2120_v60 = vrot.slane %v6496_v37, %v6286_v19 }
 0x208   :  { %v439_v28 = vpop.permute.xlu1 %438  ;;  %v432_v53 = vpop.permute.xlu0 %431  ;;  %9941 = vst [vmem:[#allocation67_spill] sm:$0xff] %v6753_v57  ;;  %v6766_v51 = vrot.slane %v2169_v47, %v6292_v21  ;;  %v2060_v12 = vcombine.high %v6753_v57, %v9913_v24 }
 0x209   :  { %3421 = vrot.lane.b32.xlu1 %v1913_v36, %s6038_s26  ;;  %v6742_v36 = vrot.slane %v2071_v3, %v6292_v21  ;;  %v6759_v63 = vmul.f32 %v801_v30, %v439_v28  ;;  %v2015_v28 = vcombine.high %v6492_v0, %v9913_v24 }
 0x20a   :  { %3419 = vrot.lane.b32.xlu0 %v1864_v9, %s6038_s26  ;;  %v6761_v9 = vmul.f32 %v797_v45, %v432_v53  ;;  %9943 = vst [vmem:[#allocation69_spill] sm:$0xff] %v6766_v51  ;;  %v2207_v30 = vcombine.high %v6766_v51, %v9913_v24  ;;  %v1883_v45 = vcombine.high %v6644_v54, %v9913_v24 }
 0x20b   :  { %9940 = vst [vmem:[#allocation66_spill] sm:$0xff] %v6742_v36  ;;  %9942 = vst [vmem:[#allocation68_spill] sm:$0xff] %v6759_v63  ;;  %v2109_v35 = vcombine.high %v6742_v36, %v9913_v24  ;;  %v6896_v57 = vrot.slane %v2015_v28, %v6286_v19 }
 0x20c   :  { %v453_v10 = vpop.permute.xlu1 %452  ;;  %v446_v6 = vpop.permute.xlu0 %445 }
 0x20d   :  { %3425 = vrot.lane.b32.xlu1 %v2011_v33, %s6038_s26  ;;  %v6768_v27 = vmul.f32 %v809_v23, %v453_v10  ;;  %v6770_v22 = vmul.f32 %v805_v20, %v446_v6  ;;  %v6775_v33 = vrot.slane %v2120_v60, %v6292_v21  ;;  %v6798_v23 = vrot.slane %v1883_v45, %v6292_v21 }
 0x20e   :  { %3423 = vrot.lane.b32.xlu0 %v1962_v49, %s6038_s26  ;;  %v1932_v49 = vcombine.high %v1924_v2, %v9913_v24  ;;  %v1917_v20 = vcombine.high %v6447_v55, %v9913_v24  ;;  %9954 = vst [vmem:[#allocation80_spill] sm:$0xff] %v6896_v57 }
 0x20f   :  { %9944 = vst [vmem:[#allocation70_spill] sm:$0xff] %v6768_v27  ;;  %9945 = vst [vmem:[#allocation71_spill] sm:$0xff] %v6775_v33  ;;  %v2158_v10 = vcombine.high %v6775_v33, %v9913_v24 }
 0x210   :  { %v6815_v45 = vrot.slane %v1932_v49, %v6292_v21  ;;  %v6872_v6 = vrot.slane %v1917_v20, %v6286_v19  ;;  %v2113_v20 = vcombine.high %v6496_v37, %v9913_v24 }
 0x211   :  { %3429 = vrot.lane.b32.xlu1 %v2109_v35, %s6038_s26  ;;  %v1981_v35 = vcombine.high %v6672_v7, %v9913_v24  ;;  %v2030_v7 = vcombine.high %v2022_v44, %v9913_v24  ;;  %v1819_v44 = vcombine.high %v6443_v43, %v9913_v24 }
 0x212   :  { %3427 = vrot.lane.b32.xlu0 %v2060_v12, %s6038_s26  ;;  %v1834_v12 = vcombine.high %v6657_v59, %v9913_v24  ;;  %9950 = vst [vmem:[#allocation76_spill] sm:$0xff] %v6872_v6  ;;  %v6893_v51 = vrot.slane %v6872_v6, %v6292_v21  ;;  %v6911_v6 = vrot.slane %v6896_v57, %v6292_v21 }
 0x213   :  { %v6811_v59 = vrot.slane %v1981_v35, %v6292_v21  ;;  %v2128_v35 = vcombine.high %v2120_v60, %v9913_v24  ;;  %v6914_v28 = vrot.slane %v2113_v20, %v6286_v19  ;;  %v2306_v20 = vcombine.high %v6463_v4, %v9913_v24 }
 0x214   :  { %v6803_v54 = vrot.slane %v1834_v12, %v6292_v21  ;;  %v1868_v12 = vcombine.high %v6441_v29, %v9913_v24  ;;  %9953 = vst [vmem:[#allocation79_spill] sm:$0xff] %v6893_v51  ;;  %9957 = vst [vmem:[#allocation83_spill] sm:$0xff] %v6911_v6  ;;  %v2257_v57 = vcombine.high %v6471_v15, %v9913_v24 }
 0x215   :  { %3433 = vrot.lane.b32.xlu1 %v2207_v30, %s6038_s26  ;;  %v2079_v30 = vcombine.high %v2071_v3, %v9913_v24  ;;  %v6829_v3 = vrot.slane %v2030_v7, %v6292_v21  ;;  %v6847_v60 = vrot.slane %v2128_v35, %v6292_v21  ;;  %v6850_v7 = vrot.slane %v1819_v44, %v6286_v19 }
 0x216   :  { %3431 = vrot.lane.b32.xlu0 %v2158_v10, %s6038_s26  ;;  %v2177_v10 = vcombine.high %v2169_v47, %v9913_v24  ;;  %v6842_v47 = vrot.slane %v1868_v12, %v6286_v19  ;;  %v2064_v35 = vcombine.high %v6490_v17, %v9913_v24  ;;  %9958 = vst [vmem:[#allocation84_spill] sm:$0xff] %v6914_v28 }
 0x217   :  { %v6823_v2 = vrot.slane %v2079_v30, %v6292_v21  ;;  %v1966_v30 = vcombine.high %v6445_v56, %v9913_v24  ;;  %9947 = vst [vmem:[#allocation73_spill] sm:$0xff] %v6850_v7  ;;  %v6869_v44 = vrot.slane %v6850_v7, %v6292_v21  ;;  %v2502_v4 = vcombine.high %v6513_v61, %v9913_v24 }
 0x218   :  { %v6839_v49 = vrot.slane %v2177_v10, %v6292_v21  ;;  %9946 = vst [vmem:[#allocation72_spill] sm:$0xff] %v6842_v47  ;;  %v6860_v10 = vrot.slane %v6842_v47, %v6292_v21  ;;  %v6887_v33 = vrot.slane %v2064_v35, %v6286_v19  ;;  %v2453_v15 = vcombine.high %v6520_v32, %v9913_v24  ;;  %v9997_v47 = vld [vmem:[#allocation48_spill] sm:$0xff] }
 0x219   :  { %3549 = vrot.lane.b32.xlu1 %v6798_v23, %s6039_s29  ;;  %v6863_v12 = vrot.slane %v1966_v30, %v6286_v19  ;;  %9949 = vst [vmem:[#allocation75_spill] sm:$0xff] %v6869_v44  ;;  %v2162_v30 = vcombine.high %v6494_v52, %v9913_v24  ;;  %v2307_v61 = vcombine.high %v6569_v46, %v9913_v24 }
 0x21a   :  { %3547 = vrot.lane.b32.xlu0 %v6803_v54, %s6039_s29  ;;  %9952 = vst [vmem:[#allocation78_spill] sm:$0xff] %v6887_v33  ;;  %v6904_v35 = vrot.slane %v6887_v33, %v6292_v21  ;;  %v2258_v32 = vcombine.high %v6580_v41, %v9913_v24  ;;  %v9964_v41 = vcombine.high %v6296_v26, %v6313_v1 }
 0x21b   :  { %9948 = vst [vmem:[#allocation74_spill] sm:$0xff] %v6863_v12  ;;  %v6884_v53 = vrot.slane %v6863_v12, %v6292_v21  ;;  %v6907_v36 = vrot.slane %v2162_v30, %v6286_v19  ;;  %v6926_v30 = vrot.slane %v6914_v28, %v6292_v21  ;;  %v2404_v28 = vcombine.high %v6481_v48, %v9913_v24 }
 0x21c   :  { %9955 = vst [vmem:[#allocation81_spill] sm:$0xff] %v6904_v35  ;;  %v2600_v48 = vcombine.high %v6539_v14, %v9913_v24 }
 0x21d   :  { %3553 = vrot.lane.b32.xlu1 %v6811_v59, %s6039_s29  ;;  %9951 = vst [vmem:[#allocation77_spill] sm:$0xff] %v6884_v53  ;;  %9956 = vst [vmem:[#allocation82_spill] sm:$0xff] %v6907_v36  ;;  %v6922_v33 = vrot.slane %v6907_v36, %v6292_v21  ;;  %v2355_v36 = vcombine.high %v6484_v42, %v9913_v24  ;;  %v2551_v42 = vcombine.high %v6548_v39, %v9913_v24 }
 0x21e   :  { %3551 = vrot.lane.b32.xlu0 %v6815_v45, %s6039_s29  ;;  %9960 = vst [vmem:[#allocation86_spill] sm:$0xff] %v6926_v30  ;;  %v9962_v39 = vcombine.high %v6294_v25, %v6311_v62 }
 0x21f   :  { %9959 = vst [vmem:[#allocation85_spill] sm:$0xff] %v6922_v33 }
 0x220   :  { %v6970_v14 = vrot.slane %v9962_v39, %v6286_v19  ;;  %v2290_v39 = vcombine.high %v6542_v5, %v9913_v24  ;;  %v2241_v5 = vcombine.high %v6551_v38, %v9913_v24  ;;  %v2388_v38 = vcombine.high %v6572_v58, %v9913_v24  ;;  %v9981_v58 = vld [vmem:[#allocation49_spill] sm:$0xff] }
 0x221   :  { %3557 = vrot.lane.b32.xlu1 %v6823_v2, %s6039_s29 }
 0x222   :  { %3555 = vrot.lane.b32.xlu0 %v6829_v3, %s6039_s29 }
 0x225   :  { %3561 = vrot.lane.b32.xlu1 %v6839_v49, %s6039_s29 }
 0x226   :  { %3559 = vrot.lane.b32.xlu0 %v6847_v60, %s6039_s29 }
 0x229   :  { %3805 = vrot.lane.b32.xlu1 %v6860_v10, %s6040_s4 }
 0x22a   :  { %3803 = vrot.lane.b32.xlu0 %v6869_v44, %s6040_s4 }
 0x22d   :  { %3809 = vrot.lane.b32.xlu1 %v6884_v53, %s6040_s4 }
 0x22e   :  { %3807 = vrot.lane.b32.xlu0 %v6893_v51, %s6040_s4  ;;  %v7151_v51 = vcombine.high %v6798_v23, %v9913_v24  ;;  %v10007_v23 = vld [vmem:[#allocation62_spill] sm:$0xff] }
 0x231   :  { %3813 = vrot.lane.b32.xlu1 %v6904_v35, %s6040_s4  ;;  %v10002_v35 = vld [vmem:[#allocation55_spill] sm:$0xff] }
 0x232   :  { %3811 = vrot.lane.b32.xlu0 %v6911_v6, %s6040_s4  ;;  %v9998_v6 = vld [vmem:[#allocation54_spill] sm:$0xff] }
 0x235   :  { %3817 = vrot.lane.b32.xlu1 %v6922_v33, %s6040_s4 }
 0x236   :  { %3815 = vrot.lane.b32.xlu0 %v6926_v30, %s6040_s4  ;;  %v9994_v30 = vld [vmem:[#allocation45_spill] sm:$0xff] }
 0x239   :  { %3693 = vrot.lane.b32.xlu1 %v2306_v20, %s6041_s14  ;;  %v6982_v20 = vrot.slane %v9964_v41, %v6286_v19 }
 0x23a   :  { %3691 = vrot.lane.b32.xlu0 %v2257_v57, %s6041_s14  ;;  %v9961_v57 = vcombine.low %v6294_v25, %v6311_v62  ;;  %v9965_v25 = vcombine.low %v6349_v31, %v6374_v16 }
 0x23c   :  { %v6989_v62 = vrot.slane %v9965_v25, %v6286_v19  ;;  %v9975_v25 = vcombine.low %v6490_v17, %v6494_v52 }
 0x23d   :  { %3697 = vrot.lane.b32.xlu1 %v2404_v28, %s6041_s14  ;;  %v9963_v28 = vcombine.low %v6296_v26, %v6313_v1  ;;  %v9967_v26 = vcombine.low %v6351_v34, %v6376_v18 }
 0x23e   :  { %3695 = vrot.lane.b32.xlu0 %v2355_v36, %s6041_s14  ;;  %v6964_v36 = vrot.slane %v9961_v57, %v6286_v19 }
 0x23f   :  { %v6976_v46 = vrot.slane %v9963_v28, %v6286_v19  ;;  %v7001_v1 = vrot.slane %v9967_v26, %v6286_v19  ;;  %v9973_v28 = vcombine.low %v6443_v43, %v6447_v55  ;;  %v9976_v26 = vcombine.high %v6490_v17, %v6494_v52  ;;  %v9979_v17 = vld [vmem:[#allocation46_spill] sm:$0xff] }
 0x240   :  { %v7069_v52 = vcombine.high %v6583_v40, %v9913_v24 }
 0x241   :  { %3701 = vrot.lane.b32.xlu1 %v2502_v4, %s6041_s14  ;;  %v9966_v4 = vcombine.high %v6349_v31, %v6374_v16  ;;  %v9969_v31 = vcombine.low %v6441_v29, %v6445_v56  ;;  %v914_v41 = vrot.slane %v9973_v28, %v6286_v19  ;;  %v9980_v28 = vld [vmem:[#allocation47_spill] sm:$0xff] }
 0x242   :  { %3699 = vrot.lane.b32.xlu0 %v2453_v15, %s6041_s14 }
 0x243   :  { %v6995_v15 = vrot.slane %v9966_v4, %v6286_v19  ;;  %v7014_v16 = vrot.slane %v9969_v31, %v6286_v19  ;;  %v962_v4 = vrot.slane %v9975_v25, %v6286_v19  ;;  %v9983_v25 = vld [vmem:[#allocation50_spill] sm:$0xff] }
 0x244   :  { %v7086_v40 = vcombine.high %v9983_v25, %v9913_v24 }
 0x245   :  { %3705 = vrot.lane.b32.xlu1 %v2600_v48, %s6041_s14  ;;  %v9968_v48 = vcombine.high %v6351_v34, %v6376_v18  ;;  %v2405_v34 = vcombine.high %v6607_v11, %v9913_v24  ;;  %v2356_v11 = vcombine.high %v6618_v13, %v9913_v24  ;;  %v9978_v13 = vcombine.high %v6492_v0, %v6496_v37 }
 0x246   :  { %3703 = vrot.lane.b32.xlu0 %v2551_v42, %s6041_s14 }
 0x247   :  { %v7007_v42 = vrot.slane %v9968_v48, %v6286_v19  ;;  %v7052_v48 = vrot.slane %v9976_v26, %v6286_v19  ;;  %v7065_v31 = vrot.slane %v9978_v13, %v6286_v19  ;;  %v9984_v26 = vld [vmem:[#allocation56_spill] sm:$0xff] }
 0x249   :  { %3949 = vrot.lane.b32.xlu1 %v2307_v61, %s6042_s15  ;;  %v9970_v61 = vcombine.high %v6441_v29, %v6445_v56  ;;  %v9974_v29 = vcombine.high %v6443_v43, %v6447_v55  ;;  %v9977_v43 = vcombine.low %v6492_v0, %v6496_v37  ;;  %v9982_v37 = vld [vmem:[#allocation52_spill] sm:$0xff] }
 0x24a   :  { %3947 = vrot.lane.b32.xlu0 %v2258_v32, %s6042_s15  ;;  %v2454_v0 = vcombine.high %v9982_v37, %v9913_v24 }
 0x24b   :  { %v7020_v57 = vrot.slane %v9970_v61, %v6286_v19  ;;  %v7026_v18 = vpop.permute.xlu1 %3437  ;;  %v7028_v32 = vpop.permute.xlu0 %3435  ;;  %v7038_v56 = vrot.slane %v9974_v29, %v6286_v19  ;;  %v946_v55 = vrot.slane %v9977_v43, %v6286_v19  ;;  %v7073_v61 = vcombine.high %v9979_v17, %v9913_v24  ;;  %v9986_v17 = vld [vmem:[#allocation53_spill] sm:$0xff] }
 0x24c   :  { %9971 = vst [vmem:[#allocation87_spill] sm:$0xff] %v7026_v18  ;;  %9972 = vst [vmem:[#allocation88_spill] sm:$0xff] %v7028_v32  ;;  %v7077_v29 = vcombine.high %v9980_v28, %v9913_v24  ;;  %v2601_v43 = vcombine.high %v9984_v26, %v9913_v24  ;;  %v7094_v28 = vcombine.high %v9986_v17, %v9913_v24  ;;  %v9989_v18 = vld [vmem:[#allocation44_spill] sm:$0xff]  ;;  %v9993_v17 = vld [vmem:[#allocation43_spill] sm:$0xff] }
 0x24d   :  { %3953 = vrot.lane.b32.xlu1 %v2405_v34, %s6042_s15  ;;  %v2503_v34 = vcombine.high %v9981_v58, %v9913_v24  ;;  %v9988_v58 = vld [vmem:[#allocation42_spill] sm:$0xff]  ;;  %v9995_v7 = vcombine.low %v9993_v17, %v9994_v30  ;;  %v1002_v53 = vcombine.low %v946_v55, %v962_v4 }
 0x24e   :  { %3951 = vrot.lane.b32.xlu0 %v2356_v11, %s6042_s15  ;;  %v9987_v11 = vld [vmem:[#allocation58_spill] sm:$0xff]  ;;  %v9990_v37 = vcombine.low %v9988_v58, %v9989_v18  ;;  %v9991_v25 = vcombine.high %v9988_v58, %v9989_v18  ;;  %v9999_v18 = vcombine.low %v9997_v47, %v9998_v6 }
 0x24f   :  { %v7090_v13 = vpop.permute.xlu1 %3441  ;;  %v2552_v32 = vcombine.high %v9987_v11, %v9913_v24  ;;  %v7116_v33 = vrot.slane %v9995_v7, %v6286_v19  ;;  %v9996_v11 = vcombine.high %v9993_v17, %v9994_v30  ;;  %v10001_v7 = vld [vmem:[#allocation51_spill] sm:$0xff]  ;;  %v7223_v44 = vrot.slane %v1002_v53, %v6292_v21 }
 0x250   :  { %9985 = vst [vmem:[#allocation46_spill] sm:$0xff] %v7090_v13  ;;  %v7102_v12 = vrot.slane %v9990_v37, %v6286_v19  ;;  %v7108_v26 = vrot.slane %v9991_v25, %v6286_v19  ;;  %v7110_v13 = vpop.permute.xlu0 %3439  ;;  %v7128_v25 = vrot.slane %v9999_v18, %v6286_v19  ;;  %v10003_v30 = vcombine.low %v10001_v7, %v10002_v35 }
 0x251   :  { %9992 = vst [vmem:[#allocation47_spill] sm:$0xff] %v7110_v13  ;;  %v7122_v37 = vrot.slane %v9996_v11, %v6286_v19  ;;  %v10000_v13 = vcombine.high %v9997_v47, %v9998_v6  ;;  %3957 = vrot.lane.b32.xlu1 %v2503_v34, %s6042_s15  ;;  %v10004_v17 = vcombine.high %v10001_v7, %v10002_v35  ;;  %v10008_v6 = vld [vmem:[#allocation65_spill] sm:$0xff]  ;;  %10017 = vst [vmem:[#allocation56_spill] sm:$0xff] %v7223_v44 }
 0x252   :  { %v7141_v11 = vrot.slane %v10003_v30, %v6286_v19  ;;  %3955 = vrot.lane.b32.xlu0 %v2454_v0, %s6042_s15  ;;  %v10005_v30 = vcombine.low %v6710_v50, %v6718_v8  ;;  %v10009_v7 = vcombine.low %v10007_v23, %v10008_v6  ;;  %v10010_v0 = vcombine.high %v10007_v23, %v10008_v6  ;;  %v10092_v44 = vld [vmem:[#allocation45_spill] sm:$0xff] }
 0x253   :  { %v7134_v58 = vrot.slane %v10000_v13, %v6286_v19  ;;  %v7147_v18 = vrot.slane %v10004_v17, %v6286_v19  ;;  %v7155_v13 = vcombine.high %v6803_v54, %v9913_v24  ;;  %v10006_v17 = vcombine.high %v6710_v50, %v6718_v8 }
 0x254   :  { %v7162_v34 = vrot.slane %v10005_v30, %v6286_v19  ;;  %v7174_v54 = vrot.slane %v10009_v7, %v6286_v19  ;;  %v7180_v47 = vrot.slane %v10010_v0, %v6286_v19  ;;  %v7182_v30 = vpop.permute.xlu1 %3445  ;;  %v10012_v8 = vcombine.low %v6759_v63, %v6768_v27  ;;  %v7202_v23 = vpop.permute.xlu0 %3443 }
 0x255   :  { %v7168_v35 = vrot.slane %v10006_v17, %v6286_v19  ;;  %10011 = vst [vmem:[#allocation49_spill] sm:$0xff] %v7182_v30  ;;  %v10013_v50 = vcombine.high %v6759_v63, %v6768_v27  ;;  %v10014_v6 = vcombine.low %v6761_v9, %v6770_v22  ;;  %10015 = vst [vmem:[#allocation52_spill] sm:$0xff] %v7202_v23  ;;  %3961 = vrot.lane.b32.xlu1 %v2601_v43, %s6042_s15 }
 0x256   :  { %v7188_v17 = vrot.slane %v10012_v8, %v6286_v19  ;;  %v970_v30 = vcombine.low %v914_v41, %v7014_v16  ;;  %v7207_v8 = vrot.slane %v2290_v39, %v6292_v21  ;;  %v971_v27 = vcombine.high %v914_v41, %v7014_v16  ;;  %3959 = vrot.lane.b32.xlu0 %v2552_v32, %s6042_s15 }
 0x257   :  { %v7194_v7 = vrot.slane %v10013_v50, %v6286_v19  ;;  %v7200_v0 = vrot.slane %v10014_v6, %v6286_v19  ;;  %v1003_v50 = vcombine.high %v946_v55, %v962_v4  ;;  %v1106_v6 = vcombine.low %v6976_v46, %v6964_v36 }
 0x258   :  { %v7212_v63 = vrot.slane %v970_v30, %v6292_v21  ;;  %v1138_v23 = vcombine.low %v7001_v1, %v6989_v62  ;;  %v1107_v43 = vcombine.high %v6976_v46, %v6964_v36  ;;  %v7220_v39 = vpop.permute.xlu1 %3449  ;;  %v7226_v16 = vrot.slane %v971_v27, %v6292_v21  ;;  %v7233_v4 = vpop.permute.xlu0 %3447 }
 0x259   :  { %v7229_v32 = vrot.slane %v1003_v50, %v6292_v21  ;;  %v1139_v41 = vcombine.high %v7001_v1, %v6989_v62  ;;  %10020 = vst [vmem:[#allocation89_spill] sm:$0xff] %v7233_v4  ;;  %v7236_v55 = vrot.slane %v2241_v5, %v6292_v21  ;;  %v7239_v36 = vrot.slane %v2388_v38, %v6292_v21 }
 0x25a   :  { %10016 = vst [vmem:[#allocation50_spill] sm:$0xff] %v7212_v63  ;;  %10018 = vst [vmem:[#allocation53_spill] sm:$0xff] %v7226_v16  ;;  %v7242_v53 = vrot.slane %v1106_v6, %v6292_v21  ;;  %v7245_v27 = vrot.slane %v1138_v23, %v6292_v21  ;;  %4077 = vrot.lane.b32.xlu1 %v7207_v8, %s6043_s16  ;;  %v7256_v5 = vrot.slane %v1107_v43, %v6292_v21 }
 0x25b   :  { %10019 = vst [vmem:[#allocation58_spill] sm:$0xff] %v7229_v32  ;;  %4075 = vrot.lane.b32.xlu0 %v7236_v55, %s6043_s16  ;;  %v7263_v23 = vrot.slane %v1139_v41, %v6292_v21  ;;  %v986_v30 = vcombine.low %v7038_v56, %v7020_v57  ;;  %v1018_v50 = vcombine.low %v7065_v31, %v7052_v48 }
 0x25c   :  { %10021 = vst [vmem:[#allocation90_spill] sm:$0xff] %v7242_v53  ;;  %10022 = vst [vmem:[#allocation91_spill] sm:$0xff] %v7245_v27  ;;  %v7269_v6 = vpop.permute.xlu1 %3565  ;;  %v1122_v43 = vcombine.low %v6982_v20, %v6970_v14  ;;  %v1154_v1 = vcombine.low %v7007_v42, %v6995_v15  ;;  %v1242_v38 = vcombine.low %v7174_v54, %v7162_v34  ;;  %v7279_v62 = vpop.permute.xlu0 %3563 }
 0x25d   :  { %10023 = vst [vmem:[#allocation92_spill] sm:$0xff] %v7256_v5  ;;  %10024 = vst [vmem:[#allocation93_spill] sm:$0xff] %v7263_v23  ;;  %v1274_v41 = vcombine.low %v7200_v0, %v7188_v17  ;;  %v7283_v46 = vrot.slane %v7069_v52, %v6292_v21  ;;  %v7288_v16 = vrot.slane %v986_v30, %v6292_v21 }
 0x25e   :  { %10025 = vst [vmem:[#allocation94_spill] sm:$0xff] %v7269_v6  ;;  %10026 = vst [vmem:[#allocation95_spill] sm:$0xff] %v7279_v62  ;;  %v7291_v6 = vrot.slane %v1018_v50, %v6292_v21  ;;  %4081 = vrot.lane.b32.xlu1 %v7239_v36, %s6043_s16  ;;  %v7297_v4 = vrot.slane %v7073_v61, %v6292_v21  ;;  %v7302_v62 = vrot.slane %v1122_v43, %v6292_v21 }
 0x25f   :  { %10027 = vst [vmem:[#allocation96_spill] sm:$0xff] %v7288_v16  ;;  %v7305_v32 = vrot.slane %v1154_v1, %v6292_v21  ;;  %4079 = vrot.lane.b32.xlu0 %v7283_v46, %s6043_s16  ;;  %v7312_v50 = vrot.slane %v1242_v38, %v6292_v21  ;;  %v7315_v61 = vrot.slane %v1274_v41, %v6292_v21 }
 0x260   :  { %10028 = vst [vmem:[#allocation97_spill] sm:$0xff] %v7291_v6  ;;  %10029 = vst [vmem:[#allocation98_spill] sm:$0xff] %v7302_v62  ;;  %v7319_v43 = vpop.permute.xlu1 %3569  ;;  %v1243_v23 = vcombine.high %v7174_v54, %v7162_v34  ;;  %v1275_v30 = vcombine.high %v7200_v0, %v7188_v17  ;;  %v1378_v38 = vcombine.low %v7116_v33, %v7102_v12  ;;  %v7329_v5 = vpop.permute.xlu0 %3567  ;;  %v10087_v62 = vld [vmem:[#allocation43_spill] sm:$0xff] }
 0x261   :  { %10030 = vst [vmem:[#allocation99_spill] sm:$0xff] %v7305_v32  ;;  %10031 = vst [vmem:[#allocation100_spill] sm:$0xff] %v7312_v50  ;;  %v7333_v41 = vrot.slane %v7077_v29, %v6292_v21  ;;  %v1410_v1 = vcombine.low %v7141_v11, %v7128_v25  ;;  %v987_v34 = vcombine.high %v7038_v56, %v7020_v57 }
 0x262   :  { %10032 = vst [vmem:[#allocation101_spill] sm:$0xff] %v7315_v61  ;;  %4085 = vrot.lane.b32.xlu1 %v7297_v4, %s6043_s16  ;;  %v7345_v54 = vrot.slane %v7086_v40, %v6292_v21  ;;  %v7348_v17 = vrot.slane %v1243_v23, %v6292_v21  ;;  %v7351_v29 = vrot.slane %v1275_v30, %v6292_v21 }
 0x263   :  { %v7354_v0 = vrot.slane %v1378_v38, %v6292_v21  ;;  %4083 = vrot.lane.b32.xlu0 %v7333_v41, %s6043_s16  ;;  %v7360_v57 = vrot.slane %v7094_v28, %v6292_v21  ;;  %v7363_v56 = vrot.slane %v1410_v1, %v6292_v21  ;;  %v1019_v40 = vcombine.high %v7065_v31, %v7052_v48 }
 0x264   :  { %10033 = vst [vmem:[#allocation102_spill] sm:$0xff] %v7348_v17  ;;  %10034 = vst [vmem:[#allocation103_spill] sm:$0xff] %v7351_v29  ;;  %v7369_v30 = vpop.permute.xlu1 %3573  ;;  %v1379_v28 = vcombine.high %v7116_v33, %v7102_v12  ;;  %v1411_v1 = vcombine.high %v7141_v11, %v7128_v25  ;;  %v7379_v6 = vpop.permute.xlu0 %3571  ;;  %v7384_v31 = vrot.slane %v987_v34, %v6292_v21 }
 0x265   :  { %10035 = vst [vmem:[#allocation104_spill] sm:$0xff] %v7354_v0  ;;  %10036 = vst [vmem:[#allocation105_spill] sm:$0xff] %v7363_v56  ;;  %v7387_v23 = vrot.slane %v1019_v40, %v6292_v21  ;;  %v1123_v52 = vcombine.high %v6982_v20, %v6970_v14  ;;  %v10039_v33 = vcombine.high %v6761_v9, %v6770_v22 }
 0x266   :  { %10037 = vst [vmem:[#allocation106_spill] sm:$0xff] %v7384_v31  ;;  %4089 = vrot.lane.b32.xlu1 %v7345_v54, %s6043_s16  ;;  %v7398_v25 = vrot.slane %v1379_v28, %v6292_v21  ;;  %v7401_v11 = vrot.slane %v1411_v1, %v6292_v21  ;;  %v1155_v34 = vcombine.high %v7007_v42, %v6995_v15 }
 0x267   :  { %10038 = vst [vmem:[#allocation107_spill] sm:$0xff] %v7387_v23  ;;  %v1225_v12 = vrot.slane %v10039_v33, %v6286_v19  ;;  %4087 = vrot.lane.b32.xlu0 %v7360_v57, %s6043_s16  ;;  %v7412_v40 = vrot.slane %v1123_v52, %v6292_v21  ;;  %v1394_v28 = vcombine.low %v7122_v37, %v7108_v26 }
 0x268   :  { %10040 = vst [vmem:[#allocation108_spill] sm:$0xff] %v7398_v25  ;;  %10041 = vst [vmem:[#allocation109_spill] sm:$0xff] %v7401_v11  ;;  %v7416_v1 = vpop.permute.xlu1 %3577  ;;  %v7421_v42 = vrot.slane %v1155_v34, %v6292_v21  ;;  %v1426_v20 = vcombine.low %v7147_v18, %v7134_v58  ;;  %v2012_v52 = vcombine.high %v6811_v59, %v9913_v24  ;;  %v7429_v14 = vpop.permute.xlu0 %3575 }
 0x269   :  { %10042 = vst [vmem:[#allocation110_spill] sm:$0xff] %v7412_v40  ;;  %v7432_v48 = vrot.slane %v1394_v28, %v6292_v21  ;;  %v1963_v33 = vcombine.high %v6815_v45, %v9913_v24  ;;  %v1259_v34 = vcombine.high %v7180_v47, %v7168_v35  ;;  %v1291_v45 = vcombine.high %v1225_v12, %v7194_v7 }
 0x26a   :  { %10043 = vst [vmem:[#allocation111_spill] sm:$0xff] %v7421_v42  ;;  %3677 = vrot.lane.b32.xlu1 %v7151_v51, %s6041_s14  ;;  %v7447_v28 = vrot.slane %v1426_v20, %v6292_v21  ;;  %v1258_v51 = vcombine.low %v7180_v47, %v7168_v35  ;;  %v1290_v15 = vcombine.low %v1225_v12, %v7194_v7 }
 0x26b   :  { %10044 = vst [vmem:[#allocation112_spill] sm:$0xff] %v7432_v48  ;;  %3675 = vrot.lane.b32.xlu0 %v7155_v13, %s6041_s14  ;;  %v1395_v13 = vcombine.high %v7122_v37, %v7108_v26  ;;  %v1427_v42 = vcombine.high %v7147_v18, %v7134_v58  ;;  %v7470_v47 = vrot.slane %v1259_v34, %v6292_v21 }
 0x26c   :  { %10045 = vst [vmem:[#allocation113_spill] sm:$0xff] %v7447_v28  ;;  %v7457_v59 = vpop.permute.xlu1 %3821  ;;  %v7467_v40 = vpop.permute.xlu0 %3819  ;;  %v7473_v35 = vrot.slane %v1291_v45, %v6292_v21  ;;  %v7476_v7 = vrot.slane %v1258_v51, %v6292_v21  ;;  %v7479_v12 = vrot.slane %v1290_v15, %v6292_v21  ;;  %v2110_v45 = vcombine.high %v6823_v2, %v9913_v24 }
 0x26d   :  { %10046 = vst [vmem:[#allocation114_spill] sm:$0xff] %v7470_v47  ;;  %v7483_v26 = vrot.slane %v1395_v13, %v6292_v21  ;;  %v7486_v58 = vrot.slane %v1427_v42, %v6292_v21  ;;  %v2061_v18 = vcombine.high %v6829_v3, %v9913_v24  ;;  %v2208_v2 = vcombine.high %v6839_v49, %v9913_v24 }
 0x26e   :  { %10047 = vst [vmem:[#allocation115_spill] sm:$0xff] %v7473_v35  ;;  %10048 = vst [vmem:[#allocation116_spill] sm:$0xff] %v7476_v7  ;;  %3681 = vrot.lane.b32.xlu1 %v2012_v52, %s6041_s14  ;;  %v1915_v3 = vcombine.high %v6860_v10, %v9913_v24  ;;  %v2406_v61 = vcombine.high %v7239_v36, %v9913_v24  ;;  %v3002_v36 = vrot.slane %v10087_v62, %v6286_v19 }
 0x26f   :  { %10049 = vst [vmem:[#allocation117_spill] sm:$0xff] %v7479_v12  ;;  %10050 = vst [vmem:[#allocation118_spill] sm:$0xff] %v7483_v26  ;;  %3679 = vrot.lane.b32.xlu0 %v1963_v33, %s6041_s14  ;;  %v2159_v33 = vcombine.high %v6847_v60, %v9913_v24  ;;  %v10053_v60 = vld [vmem:[#allocation77_spill] sm:$0xff]  ;;  %v3100_v63 = vrot.slane %v10092_v44, %v6286_v19 }
 0x270   :  { %10051 = vst [vmem:[#allocation119_spill] sm:$0xff] %v7486_v58  ;;  %v7503_v51 = vpop.permute.xlu1 %3825  ;;  %v7511_v37 = vpop.permute.xlu0 %3823  ;;  %v2013_v34 = vcombine.high %v10053_v60, %v9913_v24 }
 0x272   :  { %3685 = vrot.lane.b32.xlu1 %v2110_v45, %s6041_s14 }
 0x273   :  { %3683 = vrot.lane.b32.xlu0 %v2061_v18, %s6041_s14  ;;  %v10052_v18 = vld [vmem:[#allocation75_spill] sm:$0xff] }
 0x274   :  { %v7517_v20 = vpop.permute.xlu1 %3829  ;;  %v7521_v42 = vpop.permute.xlu0 %3827  ;;  %v1866_v13 = vcombine.high %v10052_v18, %v9913_v24  ;;  %v10057_v18 = vld [vmem:[#allocation81_spill] sm:$0xff] }
 0x275   :  { %v2111_v15 = vcombine.high %v10057_v18, %v9913_v24  ;;  %v10064_v18 = vld [vmem:[#allocation73_spill] sm:$0xff] }
 0x276   :  { %3689 = vrot.lane.b32.xlu1 %v2208_v2, %s6041_s14  ;;  %v1849_v12 = vcombine.high %v10064_v18, %v9913_v24 }
 0x277   :  { %3687 = vrot.lane.b32.xlu0 %v2159_v33, %s6041_s14  ;;  %v10055_v33 = vld [vmem:[#allocation79_spill] sm:$0xff] }
 0x278   :  { %v7527_v45 = vpop.permute.xlu1 %3833  ;;  %v7531_v49 = vpop.permute.xlu0 %3831  ;;  %v1964_v52 = vcombine.high %v10055_v33, %v9913_v24  ;;  %v10061_v33 = vld [vmem:[#allocation72_spill] sm:$0xff]  ;;  %v7581_v48 = vrot.slane %v1849_v12, %v6292_v21 }
 0x279   :  { %v1898_v58 = vcombine.high %v10061_v33, %v9913_v24 }
 0x27a   :  { %3933 = vrot.lane.b32.xlu1 %v1915_v3, %s6042_s15 }
 0x27b   :  { %3931 = vrot.lane.b32.xlu0 %v1866_v13, %s6042_s15  ;;  %v10059_v13 = vld [vmem:[#allocation83_spill] sm:$0xff]  ;;  %v7574_v47 = vrot.slane %v1898_v58, %v6292_v21 }
 0x27c   :  { %v7537_v2 = vpop.permute.xlu1 %3421  ;;  %v7541_v10 = vpop.permute.xlu0 %3419  ;;  %v2062_v38 = vcombine.high %v10059_v13, %v9913_v24  ;;  %v10066_v13 = vld [vmem:[#allocation86_spill] sm:$0xff] }
 0x27d   :  { %10054 = vst [vmem:[#allocation75_spill] sm:$0xff] %v7537_v2  ;;  %10056 = vst [vmem:[#allocation77_spill] sm:$0xff] %v7541_v10  ;;  %v2160_v35 = vcombine.high %v10066_v13, %v9913_v24  ;;  %v10120_v10 = vld [vmem:[#allocation65_spill] sm:$0xff] }
 0x27e   :  { %3937 = vrot.lane.b32.xlu1 %v2013_v34, %s6042_s15  ;;  %v2708_v2 = vrot.slane %v10120_v10, %v6286_v19 }
 0x27f   :  { %3935 = vrot.lane.b32.xlu0 %v1964_v52, %s6042_s15  ;;  %v10063_v52 = vld [vmem:[#allocation85_spill] sm:$0xff] }
 0x280   :  { %v7547_v3 = vpop.permute.xlu1 %3425  ;;  %v7551_v60 = vpop.permute.xlu0 %3423  ;;  %v2209_v26 = vcombine.high %v10063_v52, %v9913_v24  ;;  %v10069_v52 = vld [vmem:[#allocation76_spill] sm:$0xff] }
 0x281   :  { %10058 = vst [vmem:[#allocation79_spill] sm:$0xff] %v7547_v3  ;;  %10060 = vst [vmem:[#allocation81_spill] sm:$0xff] %v7551_v60  ;;  %v1947_v18 = vcombine.high %v10069_v52, %v9913_v24 }
 0x282   :  { %3941 = vrot.lane.b32.xlu1 %v2111_v15, %s6042_s15 }
 0x283   :  { %3939 = vrot.lane.b32.xlu0 %v2062_v38, %s6042_s15  ;;  %v10067_v38 = vld [vmem:[#allocation74_spill] sm:$0xff]  ;;  %v7599_v12 = vrot.slane %v1947_v18, %v6292_v21  ;;  %v10078_v18 = vld [vmem:[#allocation84_spill] sm:$0xff] }
 0x284   :  { %v7557_v34 = vpop.permute.xlu1 %3429  ;;  %v7563_v7 = vpop.permute.xlu0 %3427  ;;  %v1996_v15 = vcombine.high %v10067_v38, %v9913_v24  ;;  %v10073_v38 = vld [vmem:[#allocation80_spill] sm:$0xff]  ;;  %v2143_v56 = vcombine.high %v10078_v18, %v9913_v24  ;;  %v2308_v18 = vcombine.high %v7207_v8, %v9913_v24  ;;  %v2357_v8 = vcombine.high %v7283_v46, %v9913_v24 }
 0x285   :  { %10062 = vst [vmem:[#allocation83_spill] sm:$0xff] %v7557_v34  ;;  %10065 = vst [vmem:[#allocation72_spill] sm:$0xff] %v7563_v7  ;;  %v2045_v52 = vcombine.high %v10073_v38, %v9913_v24  ;;  %v2455_v46 = vcombine.high %v7333_v41, %v9913_v24  ;;  %v2553_v41 = vcombine.high %v7360_v57, %v9913_v24  ;;  %v10098_v57 = vld [vmem:[#allocation51_spill] sm:$0xff]  ;;  %v10115_v7 = vld [vmem:[#allocation62_spill] sm:$0xff] }
 0x286   :  { %3945 = vrot.lane.b32.xlu1 %v2209_v26, %s6042_s15  ;;  %v7592_v58 = vrot.slane %v1996_v15, %v6292_v21  ;;  %v10076_v15 = vld [vmem:[#allocation82_spill] sm:$0xff]  ;;  %v7631_v29 = vrot.slane %v2143_v56, %v6292_v21 }
 0x287   :  { %3943 = vrot.lane.b32.xlu0 %v2160_v35, %s6042_s15  ;;  %v10071_v35 = vld [vmem:[#allocation78_spill] sm:$0xff]  ;;  %v2192_v23 = vcombine.high %v10076_v15, %v9913_v24  ;;  %v7615_v31 = vrot.slane %v2045_v52, %v6292_v21 }
 0x288   :  { %v7571_v33 = vpop.permute.xlu1 %3433  ;;  %v7578_v28 = vpop.permute.xlu0 %3431  ;;  %v2094_v26 = vcombine.high %v10071_v35, %v9913_v24 }
 0x289   :  { %10068 = vst [vmem:[#allocation85_spill] sm:$0xff] %v7571_v33  ;;  %10070 = vst [vmem:[#allocation73_spill] sm:$0xff] %v7578_v28  ;;  %v1965_v33 = vcombine.high %v7599_v12, %v9913_v24 }
 0x28a   :  { %4061 = vrot.lane.b32.xlu1 %v7574_v47, %s6043_s16  ;;  %v7608_v25 = vrot.slane %v2094_v26, %v6292_v21  ;;  %v7626_v26 = vrot.slane %v2192_v23, %v6292_v21  ;;  %v2259_v23 = vcombine.high %v7236_v55, %v9913_v24  ;;  %v10085_v55 = vld [vmem:[#allocation42_spill] sm:$0xff] }
 0x28b   :  { %4059 = vrot.lane.b32.xlu0 %v7581_v48, %s6043_s16  ;;  %v3051_v32 = vrot.slane %v10085_v55, %v6286_v19 }
 0x28c   :  { %v7589_v13 = vpop.permute.xlu1 %3549  ;;  %v7596_v11 = vpop.permute.xlu0 %3547 }
 0x28d   :  { %10072 = vst [vmem:[#allocation86_spill] sm:$0xff] %v7589_v13  ;;  %10074 = vst [vmem:[#allocation74_spill] sm:$0xff] %v7596_v11  ;;  %v7678_v53 = vrot.slane %v3051_v32, %v6292_v21  ;;  %v2014_v13 = vcombine.high %v7592_v58, %v9913_v24 }
 0x28e   :  { %4065 = vrot.lane.b32.xlu1 %v7592_v58, %s6043_s16  ;;  %v2610_v58 = vrot.slane %v10115_v7, %v6286_v19 }
 0x28f   :  { %4063 = vrot.lane.b32.xlu0 %v7599_v12, %s6043_s16  ;;  %10091 = vst [vmem:[#allocation126_spill] sm:$0xff] %v7678_v53  ;;  %v3089_v44 = vcombine.high %v7678_v53, %v9913_v24  ;;  %v10101_v53 = vld [vmem:[#allocation54_spill] sm:$0xff]  ;;  %v2063_v12 = vcombine.high %v7615_v31, %v9913_v24 }
 0x290   :  { %v7605_v35 = vpop.permute.xlu1 %3553  ;;  %v7612_v38 = vpop.permute.xlu0 %3551 }
 0x291   :  { %10075 = vst [vmem:[#allocation76_spill] sm:$0xff] %v7605_v35  ;;  %10077 = vst [vmem:[#allocation78_spill] sm:$0xff] %v7612_v38 }
 0x292   :  { %4069 = vrot.lane.b32.xlu1 %v7608_v25, %s6043_s16 }
 0x293   :  { %4067 = vrot.lane.b32.xlu0 %v7615_v31, %s6043_s16  ;;  %v2161_v31 = vcombine.high %v7631_v29, %v9913_v24 }
 0x294   :  { %v7623_v0 = vpop.permute.xlu1 %3557  ;;  %v7628_v15 = vpop.permute.xlu0 %3555 }
 0x295   :  { %10079 = vst [vmem:[#allocation80_spill] sm:$0xff] %v7623_v0  ;;  %10080 = vst [vmem:[#allocation82_spill] sm:$0xff] %v7628_v15 }
 0x296   :  { %4073 = vrot.lane.b32.xlu1 %v7626_v26, %s6043_s16 }
 0x297   :  { %4071 = vrot.lane.b32.xlu0 %v7631_v29, %s6043_s16  ;;  %v2806_v29 = vrot.slane %v6761_v9, %v6286_v19 }
 0x298   :  { %v7637_v52 = vpop.permute.xlu1 %3561  ;;  %v7641_v17 = vpop.permute.xlu0 %3559 }
 0x299   :  { %10081 = vst [vmem:[#allocation84_spill] sm:$0xff] %v7637_v52  ;;  %10082 = vst [vmem:[#allocation120_spill] sm:$0xff] %v7641_v17 }
 0x29a   :  { %4205 = vrot.lane.b32.xlu1 %v2308_v18, %s6044_s17 }
 0x29b   :  { %4203 = vrot.lane.b32.xlu0 %v2259_v23, %s6044_s17  ;;  %v2504_v23 = vcombine.high %v7297_v4, %v9913_v24  ;;  %v2602_v4 = vcombine.high %v7345_v54, %v9913_v24  ;;  %v10095_v54 = vld [vmem:[#allocation48_spill] sm:$0xff] }
 0x29c   :  { %v7647_v56 = vpop.permute.xlu1 %3805  ;;  %v7651_v50 = vpop.permute.xlu0 %3803 }
 0x29d   :  { %10083 = vst [vmem:[#allocation121_spill] sm:$0xff] %v7647_v56  ;;  %10084 = vst [vmem:[#allocation122_spill] sm:$0xff] %v7651_v50 }
 0x29e   :  { %4209 = vrot.lane.b32.xlu1 %v2406_v61, %s6044_s17  ;;  %v10089_v61 = vld [vmem:[#allocation44_spill] sm:$0xff] }
 0x29f   :  { %4207 = vrot.lane.b32.xlu0 %v2357_v8, %s6044_s17  ;;  %v3149_v8 = vrot.slane %v10089_v61, %v6286_v19 }
 0x2a0   :  { %v7659_v18 = vpop.permute.xlu1 %3809  ;;  %v7665_v16 = vpop.permute.xlu0 %3807 }
 0x2a1   :  { %10086 = vst [vmem:[#allocation123_spill] sm:$0xff] %v7659_v18  ;;  %10088 = vst [vmem:[#allocation124_spill] sm:$0xff] %v7665_v16  ;;  %v7698_v55 = vrot.slane %v3149_v8, %v6292_v21 }
 0x2a2   :  { %4213 = vrot.lane.b32.xlu1 %v2504_v23, %s6044_s17  ;;  %v7687_v23 = vrot.slane %v3002_v36, %v6292_v21 }
 0x2a3   :  { %4211 = vrot.lane.b32.xlu0 %v2455_v46, %s6044_s17  ;;  %v3247_v46 = vrot.slane %v10095_v54, %v6286_v19  ;;  %10097 = vst [vmem:[#allocation130_spill] sm:$0xff] %v7698_v55  ;;  %v3345_v54 = vrot.slane %v10101_v53, %v6286_v19 }
 0x2a4   :  { %v7673_v27 = vpop.permute.xlu1 %3813  ;;  %v7682_v62 = vpop.permute.xlu0 %3811  ;;  %10094 = vst [vmem:[#allocation128_spill] sm:$0xff] %v7687_v23 }
 0x2a5   :  { %10090 = vst [vmem:[#allocation125_spill] sm:$0xff] %v7673_v27  ;;  %10093 = vst [vmem:[#allocation127_spill] sm:$0xff] %v7682_v62  ;;  %v3198_v62 = vrot.slane %v10098_v57, %v6286_v19  ;;  %v3187_v57 = vcombine.high %v7698_v55, %v9913_v24  ;;  %v7736_v50 = vrot.slane %v3345_v54, %v6292_v21 }
 0x2a6   :  { %4217 = vrot.lane.b32.xlu1 %v2602_v4, %s6044_s17  ;;  %v3040_v4 = vcombine.high %v7687_v23, %v9913_v24  ;;  %v10103_v23 = vld [vmem:[#allocation55_spill] sm:$0xff] }
 0x2a7   :  { %4215 = vrot.lane.b32.xlu0 %v2553_v41, %s6044_s17  ;;  %v7707_v41 = vrot.slane %v3100_v63, %v6292_v21  ;;  %v3296_v16 = vrot.slane %v10103_v23, %v6286_v19  ;;  %10105 = vst [vmem:[#allocation135_spill] sm:$0xff] %v7736_v50 }
 0x2a8   :  { %v7693_v61 = vpop.permute.xlu1 %3817  ;;  %v7702_v27 = vpop.permute.xlu0 %3815 }
 0x2a9   :  { %10096 = vst [vmem:[#allocation129_spill] sm:$0xff] %v7693_v61  ;;  %10099 = vst [vmem:[#allocation131_spill] sm:$0xff] %v7702_v27  ;;  %v7718_v27 = vrot.slane %v3247_v46, %v6292_v21  ;;  %v7743_v56 = vrot.slane %v3296_v16, %v6292_v21 }
 0x2aa   :  { %10100 = vst [vmem:[#allocation132_spill] sm:$0xff] %v7707_v41  ;;  %3469 = vrot.lane.b32.xlu1 %v3089_v44, %s6038_s26  ;;  %v3138_v44 = vcombine.high %v7707_v41, %v9913_v24 }
 0x2ab   :  { %3467 = vrot.lane.b32.xlu0 %v3040_v4, %s6038_s26  ;;  %10102 = vst [vmem:[#allocation133_spill] sm:$0xff] %v7718_v27  ;;  %v7727_v4 = vrot.slane %v3198_v62, %v6292_v21  ;;  %v3285_v55 = vcombine.high %v7718_v27, %v9913_v24  ;;  %10106 = vst [vmem:[#allocation136_spill] sm:$0xff] %v7743_v56  ;;  %v3059_v27 = vcombine.high %v3051_v32, %v9913_v24 }
 0x2ac   :  { %v7713_v61 = vpop.permute.xlu1 %3693  ;;  %v7722_v18 = vpop.permute.xlu0 %3691  ;;  %v3334_v52 = vcombine.high %v7743_v56, %v9913_v24  ;;  %v3108_v56 = vcombine.high %v3100_v63, %v9913_v24  ;;  %v3206_v63 = vcombine.high %v3198_v62, %v9913_v24  ;;  %v3304_v62 = vcombine.high %v3296_v16, %v9913_v24 }
 0x2ad   :  { %10104 = vst [vmem:[#allocation134_spill] sm:$0xff] %v7727_v4  ;;  %v3236_v41 = vcombine.high %v7727_v4, %v9913_v24  ;;  %v3010_v4 = vcombine.high %v3002_v36, %v9913_v24  ;;  %v3255_v36 = vcombine.high %v3247_v46, %v9913_v24  ;;  %v3353_v46 = vcombine.high %v3345_v54, %v9913_v24 }
 0x2ae   :  { %3473 = vrot.lane.b32.xlu1 %v3187_v57, %s6038_s26  ;;  %v7815_v54 = vrot.slane %v3304_v62, %v6292_v21 }
 0x2af   :  { %3471 = vrot.lane.b32.xlu0 %v3138_v44, %s6038_s26  ;;  %v3383_v44 = vcombine.high %v7736_v50, %v9913_v24  ;;  %v3157_v50 = vcombine.high %v3149_v8, %v9913_v24  ;;  %v7768_v32 = vrot.slane %v3010_v4, %v6292_v21  ;;  %v7784_v4 = vrot.slane %v3108_v56, %v6292_v21 }
 0x2b0   :  { %v7731_v53 = vpop.permute.xlu1 %3697  ;;  %v7738_v23 = vpop.permute.xlu0 %3695  ;;  %v7800_v56 = vrot.slane %v3206_v63, %v6292_v21  ;;  %v1916_v63 = vcombine.high %v7574_v47, %v9913_v24 }
 0x2b2   :  { %3477 = vrot.lane.b32.xlu1 %v3285_v55, %s6038_s26 }
 0x2b3   :  { %3475 = vrot.lane.b32.xlu0 %v3236_v41, %s6038_s26  ;;  %v7762_v41 = vrot.slane %v3059_v27, %v6292_v21  ;;  %v7778_v27 = vrot.slane %v3157_v50, %v6292_v21  ;;  %v7794_v50 = vrot.slane %v3255_v36, %v6292_v21  ;;  %v7810_v36 = vrot.slane %v3353_v46, %v6292_v21 }
 0x2b4   :  { %v7747_v57 = vpop.permute.xlu1 %3701  ;;  %v7752_v17 = vpop.permute.xlu0 %3699  ;;  %v1867_v46 = vcombine.high %v7581_v48, %v9913_v24  ;;  %v10113_v48 = vld [vmem:[#allocation61_spill] sm:$0xff] }
 0x2b5   :  { %v2659_v47 = vrot.slane %v10113_v48, %v6286_v19 }
 0x2b6   :  { %3481 = vrot.lane.b32.xlu1 %v3383_v44, %s6038_s26 }
 0x2b7   :  { %3479 = vrot.lane.b32.xlu0 %v3334_v52, %s6038_s26  ;;  %v7862_v3 = vrot.slane %v2659_v47, %v6292_v21 }
 0x2b8   :  { %v7759_v55 = vpop.permute.xlu1 %3705  ;;  %v7765_v15 = vpop.permute.xlu0 %3703 }
 0x2b9   :  { %10119 = vst [vmem:[#allocation143_spill] sm:$0xff] %v7862_v3 }
 0x2ba   :  { %3597 = vrot.lane.b32.xlu1 %v7762_v41, %s6039_s29 }
 0x2bb   :  { %3595 = vrot.lane.b32.xlu0 %v7768_v32, %s6039_s29 }
 0x2bc   :  { %v7775_v52 = vpop.permute.xlu1 %3949  ;;  %v7781_v8 = vpop.permute.xlu0 %3947 }
 0x2be   :  { %3601 = vrot.lane.b32.xlu1 %v7778_v27, %s6039_s29 }
 0x2bf   :  { %3599 = vrot.lane.b32.xlu0 %v7784_v4, %s6039_s29 }
 0x2c0   :  { %v7791_v44 = vpop.permute.xlu1 %3953  ;;  %v7797_v0 = vpop.permute.xlu0 %3951 }
 0x2c2   :  { %3605 = vrot.lane.b32.xlu1 %v7794_v50, %s6039_s29 }
 0x2c3   :  { %3603 = vrot.lane.b32.xlu0 %v7800_v56, %s6039_s29 }
 0x2c4   :  { %v7807_v38 = vpop.permute.xlu1 %3957  ;;  %v7812_v35 = vpop.permute.xlu0 %3955 }
 0x2c5   :  { %10107 = vst [vmem:[#allocation137_spill] sm:$0xff] %v7807_v38  ;;  %10108 = vst [vmem:[#allocation138_spill] sm:$0xff] %v7812_v35 }
 0x2c6   :  { %3609 = vrot.lane.b32.xlu1 %v7810_v36, %s6039_s29 }
 0x2c7   :  { %3607 = vrot.lane.b32.xlu0 %v7815_v54, %s6039_s29 }
 0x2c8   :  { %v7821_v16 = vpop.permute.xlu1 %3961  ;;  %v7825_v11 = vpop.permute.xlu0 %3959 }
 0x2c9   :  { %10109 = vst [vmem:[#allocation139_spill] sm:$0xff] %v7821_v16  ;;  %10110 = vst [vmem:[#allocation140_spill] sm:$0xff] %v7825_v11  ;;  %v2697_v11 = vcombine.high %v7862_v3, %v9913_v24  ;;  %v10128_v3 = vld [vmem:[#allocation70_spill] sm:$0xff] }
 0x2ca   :  { %4189 = vrot.lane.b32.xlu1 %v1916_v63, %s6044_s17 }
 0x2cb   :  { %4187 = vrot.lane.b32.xlu0 %v1867_v46, %s6044_s17  ;;  %v2112_v46 = vcombine.high %v7608_v25, %v9913_v24  ;;  %v2210_v25 = vcombine.high %v7626_v26, %v9913_v24  ;;  %v10123_v26 = vld [vmem:[#allocation68_spill] sm:$0xff] }
 0x2cc   :  { %v7831_v62 = vpop.permute.xlu1 %4077 }
 0x2cd   :  { %10111 = vst [vmem:[#allocation141_spill] sm:$0xff] %v7831_v62  ;;  %v7835_v28 = vpop.permute.xlu0 %4075 }
 0x2ce   :  { %10112 = vst [vmem:[#allocation142_spill] sm:$0xff] %v7835_v28  ;;  %4193 = vrot.lane.b32.xlu1 %v2014_v13, %s6044_s17 }
 0x2cf   :  { %4191 = vrot.lane.b32.xlu0 %v1965_v33, %s6044_s17  ;;  %v10117_v33 = vld [vmem:[#allocation63_spill] sm:$0xff] }
 0x2d0   :  { %v7843_v63 = vpop.permute.xlu1 %4081  ;;  %v2757_v13 = vrot.slane %v10117_v33, %v6286_v19 }
 0x2d1   :  { %10114 = vst [vmem:[#allocation61_spill] sm:$0xff] %v7843_v63  ;;  %v7849_v34 = vpop.permute.xlu0 %4079 }
 0x2d2   :  { %10116 = vst [vmem:[#allocation62_spill] sm:$0xff] %v7849_v34  ;;  %4197 = vrot.lane.b32.xlu1 %v2112_v46, %s6044_s17  ;;  %v7871_v46 = vrot.slane %v2610_v58, %v6292_v21 }
 0x2d3   :  { %4195 = vrot.lane.b32.xlu0 %v2063_v12, %s6044_s17  ;;  %v2855_v12 = vrot.slane %v10123_v26, %v6286_v19 }
 0x2d4   :  { %v7857_v60 = vpop.permute.xlu1 %4085  ;;  %10122 = vst [vmem:[#allocation144_spill] sm:$0xff] %v7871_v46 }
 0x2d5   :  { %10118 = vst [vmem:[#allocation63_spill] sm:$0xff] %v7857_v60  ;;  %v7866_v28 = vpop.permute.xlu0 %4083 }
 0x2d6   :  { %10121 = vst [vmem:[#allocation65_spill] sm:$0xff] %v7866_v28  ;;  %4201 = vrot.lane.b32.xlu1 %v2210_v25, %s6044_s17  ;;  %v7882_v28 = vrot.slane %v2757_v13, %v6292_v21  ;;  %v2648_v25 = vcombine.high %v7871_v46, %v9913_v24  ;;  %v2904_v46 = vrot.slane %v6770_v22, %v6286_v19 }
 0x2d7   :  { %4199 = vrot.lane.b32.xlu0 %v2161_v31, %s6044_s17  ;;  %v7891_v31 = vrot.slane %v2708_v2, %v6292_v21 }
 0x2d8   :  { %v7877_v62 = vpop.permute.xlu1 %4089  ;;  %10125 = vst [vmem:[#allocation145_spill] sm:$0xff] %v7882_v28  ;;  %v2795_v63 = vcombine.high %v7882_v28, %v9913_v24 }
 0x2d9   :  { %10124 = vst [vmem:[#allocation68_spill] sm:$0xff] %v7877_v62  ;;  %v7886_v60 = vpop.permute.xlu0 %4087  ;;  %10127 = vst [vmem:[#allocation147_spill] sm:$0xff] %v7891_v31  ;;  %v2953_v62 = vrot.slane %v10128_v3, %v6286_v19 }
 0x2da   :  { %10126 = vst [vmem:[#allocation146_spill] sm:$0xff] %v7886_v60  ;;  %3453 = vrot.lane.b32.xlu1 %v2697_v11, %s6038_s26  ;;  %v7902_v60 = vrot.slane %v2855_v12, %v6292_v21  ;;  %v2746_v11 = vcombine.high %v7891_v31, %v9913_v24 }
 0x2db   :  { %3451 = vrot.lane.b32.xlu0 %v2648_v25, %s6038_s26  ;;  %v7911_v25 = vrot.slane %v2806_v29, %v6292_v21  ;;  %v7920_v35 = vrot.slane %v2953_v62, %v6292_v21 }
 0x2dc   :  { %v7897_v34 = vpop.permute.xlu1 %3677  ;;  %10130 = vst [vmem:[#allocation148_spill] sm:$0xff] %v7902_v60  ;;  %v2893_v28 = vcombine.high %v7902_v60, %v9913_v24  ;;  %v2667_v60 = vcombine.high %v2659_v47, %v9913_v24 }
 0x2dd   :  { %10129 = vst [vmem:[#allocation70_spill] sm:$0xff] %v7897_v34  ;;  %v7906_v16 = vpop.permute.xlu0 %3675  ;;  %10132 = vst [vmem:[#allocation150_spill] sm:$0xff] %v7911_v25  ;;  %v2844_v31 = vcombine.high %v7911_v25, %v9913_v24  ;;  %v2618_v25 = vcombine.high %v2610_v58, %v9913_v24  ;;  %v2863_v58 = vcombine.high %v2855_v12, %v9913_v24 }
 0x2de   :  { %10131 = vst [vmem:[#allocation149_spill] sm:$0xff] %v7906_v16  ;;  %3457 = vrot.lane.b32.xlu1 %v2795_v63, %s6038_s26  ;;  %10134 = vst [vmem:[#allocation152_spill] sm:$0xff] %v7920_v35  ;;  %v7927_v16 = vrot.slane %v2904_v46, %v6292_v21 }
 0x2df   :  { %3455 = vrot.lane.b32.xlu0 %v2746_v11, %s6038_s26  ;;  %v2991_v11 = vcombine.high %v7920_v35, %v9913_v24  ;;  %v2765_v35 = vcombine.high %v2757_v13, %v9913_v24  ;;  %v7952_v47 = vrot.slane %v2618_v25, %v6292_v21  ;;  %v7980_v12 = vrot.slane %v2863_v58, %v6292_v21 }
 0x2e0   :  { %v7915_v34 = vpop.permute.xlu1 %3681  ;;  %10136 = vst [vmem:[#allocation154_spill] sm:$0xff] %v7927_v16 }
 0x2e1   :  { %10133 = vst [vmem:[#allocation151_spill] sm:$0xff] %v7915_v34  ;;  %v7922_v38 = vpop.permute.xlu0 %3679 }
 0x2e2   :  { %10135 = vst [vmem:[#allocation153_spill] sm:$0xff] %v7922_v38  ;;  %3461 = vrot.lane.b32.xlu1 %v2893_v28, %s6038_s26  ;;  %v2942_v38 = vcombine.high %v7927_v16, %v9913_v24  ;;  %v2716_v16 = vcombine.high %v2708_v2, %v9913_v24  ;;  %v2814_v2 = vcombine.high %v2806_v29, %v9913_v24 }
 0x2e3   :  { %3459 = vrot.lane.b32.xlu0 %v2844_v31, %s6038_s26  ;;  %v7946_v31 = vrot.slane %v2667_v60, %v6292_v21  ;;  %v7962_v60 = vrot.slane %v2765_v35, %v6292_v21 }
 0x2e4   :  { %v7931_v63 = vpop.permute.xlu1 %3685  ;;  %v7968_v25 = vrot.slane %v2716_v16, %v6292_v21  ;;  %v2603_v16 = vcombine.high %v10115_v7, %v9913_v24 }
 0x2e5   :  { %10137 = vst [vmem:[#allocation155_spill] sm:$0xff] %v7931_v63  ;;  %v7936_v34 = vpop.permute.xlu0 %3683 }
 0x2e6   :  { %10138 = vst [vmem:[#allocation156_spill] sm:$0xff] %v7936_v34  ;;  %3465 = vrot.lane.b32.xlu1 %v2991_v11, %s6038_s26  ;;  %v2652_v11 = vcombine.high %v10113_v48, %v9913_v24  ;;  %v2750_v48 = vcombine.high %v10117_v33, %v9913_v24  ;;  %v2848_v33 = vcombine.high %v10123_v26, %v9913_v24 }
 0x2e7   :  { %3463 = vrot.lane.b32.xlu0 %v2942_v38, %s6038_s26 }
 0x2e8   :  { %v7943_v28 = vpop.permute.xlu1 %3689  ;;  %v8003_v58 = vrot.slane %v2652_v11, %v6286_v19  ;;  %v2799_v11 = vcombine.high %v6761_v9, %v9913_v24 }
 0x2e9   :  { %10139 = vst [vmem:[#allocation157_spill] sm:$0xff] %v7943_v28  ;;  %v7949_v63 = vpop.permute.xlu0 %3687 }
 0x2ea   :  { %10140 = vst [vmem:[#allocation158_spill] sm:$0xff] %v7949_v63  ;;  %3581 = vrot.lane.b32.xlu1 %v7946_v31, %s6039_s29  ;;  %v2912_v63 = vcombine.high %v2904_v46, %v9913_v24  ;;  %10146 = vst [vmem:[#allocation164_spill] sm:$0xff] %v8003_v58  ;;  %v2701_v46 = vcombine.high %v10120_v10, %v9913_v24  ;;  %v8025_v10 = vrot.slane %v8003_v58, %v6292_v21  ;;  %v10176_v58 = vld [vmem:[#allocation36_spill] sm:$0xff] }
 0x2eb   :  { %3579 = vrot.lane.b32.xlu0 %v7952_v47, %s6039_s29 }
 0x2ec   :  { %v7959_v38 = vpop.permute.xlu1 %3933  ;;  %v8039_v26 = vrot.slane %v2701_v46, %v6286_v19  ;;  %v2897_v46 = vcombine.high %v6770_v22, %v9913_v24 }
 0x2ed   :  { %10141 = vst [vmem:[#allocation159_spill] sm:$0xff] %v7959_v38  ;;  %v7965_v13 = vpop.permute.xlu0 %3931  ;;  %v7988_v38 = vrot.slane %v2814_v2, %v6292_v21 }
 0x2ee   :  { %10142 = vst [vmem:[#allocation160_spill] sm:$0xff] %v7965_v13  ;;  %3585 = vrot.lane.b32.xlu1 %v7962_v60, %s6039_s29  ;;  %v2961_v13 = vcombine.high %v2953_v62, %v9913_v24  ;;  %10152 = vst [vmem:[#allocation170_spill] sm:$0xff] %v8039_v26  ;;  %v8062_v28 = vrot.slane %v8039_v26, %v6292_v21  ;;  %v8087_v34 = vrot.slane %v2897_v46, %v6286_v19 }
 0x2ef   :  { %3583 = vrot.lane.b32.xlu0 %v7968_v25, %s6039_s29  ;;  %v3286_v26 = vcombine.high %v7794_v50, %v9913_v24  ;;  %v10175_v50 = vld [vmem:[#allocation46_spill] sm:$0xff] }
 0x2f0   :  { %v7977_v35 = vpop.permute.xlu1 %3937  ;;  %v8000_v7 = vrot.slane %v2961_v13, %v6292_v21  ;;  %10157 = vst [vmem:[#allocation175_spill] sm:$0xff] %v8062_v28  ;;  %10164 = vst [vmem:[#allocation182_spill] sm:$0xff] %v8087_v34 }
 0x2f1   :  { %10143 = vst [vmem:[#allocation161_spill] sm:$0xff] %v7977_v35  ;;  %v7985_v29 = vpop.permute.xlu0 %3935  ;;  %v8013_v35 = vrot.slane %v2603_v16, %v6286_v19 }
 0x2f2   :  { %10144 = vst [vmem:[#allocation162_spill] sm:$0xff] %v7985_v29  ;;  %3589 = vrot.lane.b32.xlu1 %v7980_v12, %s6039_s29  ;;  %v8010_v29 = vrot.slane %v2912_v63, %v6292_v21  ;;  %v8028_v63 = vrot.slane %v2750_v48, %v6286_v19  ;;  %v2946_v48 = vcombine.high %v10128_v3, %v9913_v24 }
 0x2f3   :  { %3587 = vrot.lane.b32.xlu0 %v7988_v38, %s6039_s29  ;;  %10148 = vst [vmem:[#allocation166_spill] sm:$0xff] %v8013_v35  ;;  %v8065_v3 = vrot.slane %v2799_v11, %v6286_v19 }
 0x2f4   :  { %v7997_v62 = vpop.permute.xlu1 %3941  ;;  %10150 = vst [vmem:[#allocation168_spill] sm:$0xff] %v8028_v63  ;;  %v8051_v9 = vrot.slane %v8028_v63, %v6292_v21  ;;  %v10171_v63 = vld [vmem:[#allocation87_spill] sm:$0xff] }
 0x2f5   :  { %10145 = vst [vmem:[#allocation163_spill] sm:$0xff] %v7997_v62  ;;  %v8007_v2 = vpop.permute.xlu0 %3939  ;;  %10158 = vst [vmem:[#allocation176_spill] sm:$0xff] %v8065_v3  ;;  %v8084_v11 = vrot.slane %v8065_v3, %v6292_v21  ;;  %v8103_v3 = vrot.slane %v8087_v34, %v6292_v21  ;;  %v3188_v34 = vcombine.high %v7778_v27, %v9913_v24 }
 0x2f6   :  { %10147 = vst [vmem:[#allocation165_spill] sm:$0xff] %v8007_v2  ;;  %3593 = vrot.lane.b32.xlu1 %v8000_v7, %s6039_s29  ;;  %v8036_v2 = vrot.slane %v8013_v35, %v6292_v21  ;;  %10154 = vst [vmem:[#allocation172_spill] sm:$0xff] %v8051_v9  ;;  %v10172_v35 = vld [vmem:[#allocation34_spill] sm:$0xff]  ;;  %v3384_v27 = vcombine.high %v7810_v36, %v9913_v24 }
 0x2f7   :  { %3591 = vrot.lane.b32.xlu0 %v8010_v29, %s6039_s29  ;;  %10163 = vst [vmem:[#allocation181_spill] sm:$0xff] %v8084_v11  ;;  %10168 = vst [vmem:[#allocation186_spill] sm:$0xff] %v8103_v3 }
 0x2f8   :  { %v8021_v13 = vpop.permute.xlu1 %3945 }
 0x2f9   :  { %10149 = vst [vmem:[#allocation167_spill] sm:$0xff] %v8021_v13  ;;  %v8032_v16 = vpop.permute.xlu0 %3943 }
 0x2fa   :  { %10151 = vst [vmem:[#allocation169_spill] sm:$0xff] %v8032_v16  ;;  %3837 = vrot.lane.b32.xlu1 %v8025_v10, %s6040_s4  ;;  %v8054_v16 = vrot.slane %v2848_v33, %v6286_v19 }
 0x2fb   :  { %3835 = vrot.lane.b32.xlu0 %v8036_v2, %s6040_s4 }
 0x2fc   :  { %v8047_v13 = vpop.permute.xlu1 %4061  ;;  %10155 = vst [vmem:[#allocation173_spill] sm:$0xff] %v8054_v16  ;;  %v8075_v22 = vrot.slane %v8054_v16, %v6292_v21  ;;  %v3139_v16 = vcombine.high %v7784_v4, %v9913_v24  ;;  %v8136_v4 = vcombine.high %v7815_v54, %v9913_v24  ;;  %v10183_v54 = vld [vmem:[#allocation40_spill] sm:$0xff] }
 0x2fd   :  { %10153 = vst [vmem:[#allocation171_spill] sm:$0xff] %v8047_v13  ;;  %v8058_v62 = vpop.permute.xlu0 %4059 }
 0x2fe   :  { %10156 = vst [vmem:[#allocation174_spill] sm:$0xff] %v8058_v62  ;;  %3841 = vrot.lane.b32.xlu1 %v8051_v9, %s6040_s4  ;;  %10160 = vst [vmem:[#allocation178_spill] sm:$0xff] %v8075_v22  ;;  %v8078_v62 = vrot.slane %v2946_v48, %v6286_v19  ;;  %v10184_v9 = vld [vmem:[#allocation89_spill] sm:$0xff] }
 0x2ff   :  { %3839 = vrot.lane.b32.xlu0 %v8062_v28, %s6040_s4  ;;  %v4298_v28 = vsel %vm1562_vm6, %v10183_v54, %v7220_v39  ;;  %v10194_v54 = vld [vmem:[#allocation65_spill] sm:$0xff] }
 0x300   :  { %v8071_v33 = vpop.permute.xlu1 %4065  ;;  %10161 = vst [vmem:[#allocation179_spill] sm:$0xff] %v8078_v62  ;;  %v8097_v48 = vrot.slane %v8078_v62, %v6292_v21  ;;  %v10186_v21 = vld [vmem:[#allocation94_spill] sm:$0xff] }
 0x301   :  { %10159 = vst [vmem:[#allocation177_spill] sm:$0xff] %v8071_v33  ;;  %v8080_v13 = vpop.permute.xlu0 %4063 }
 0x302   :  { %10162 = vst [vmem:[#allocation180_spill] sm:$0xff] %v8080_v13  ;;  %3845 = vrot.lane.b32.xlu1 %v8075_v22, %s6040_s4  ;;  %10166 = vst [vmem:[#allocation184_spill] sm:$0xff] %v8097_v48  ;;  %v10180_v22 = vld [vmem:[#allocation38_spill] sm:$0xff] }
 0x303   :  { %3843 = vrot.lane.b32.xlu0 %v8084_v11, %s6040_s4  ;;  %v10178_v11 = vld [vmem:[#allocation37_spill] sm:$0xff] }
 0x304   :  { %v8093_v33 = vpop.permute.xlu1 %4069 }
 0x305   :  { %10165 = vst [vmem:[#allocation183_spill] sm:$0xff] %v8093_v33  ;;  %v8099_v13 = vpop.permute.xlu0 %4067  ;;  %v3090_v33 = vcombine.high %v7762_v41, %v9913_v24  ;;  %v4292_v41 = vsel %vm1562_vm6, %v10172_v35, %v10171_v63  ;;  %v10179_v63 = vld [vmem:[#allocation49_spill] sm:$0xff] }
 0x306   :  { %10167 = vst [vmem:[#allocation185_spill] sm:$0xff] %v8099_v13  ;;  %3849 = vrot.lane.b32.xlu1 %v8097_v48, %s6040_s4  ;;  %v3041_v13 = vcombine.high %v7768_v32, %v9913_v24  ;;  %v10174_v32 = vld [vmem:[#allocation35_spill] sm:$0xff] }
 0x307   :  { %3847 = vrot.lane.b32.xlu0 %v8103_v3, %s6040_s4  ;;  %v10173_v3 = vld [vmem:[#allocation88_spill] sm:$0xff]  ;;  %v10177_v48 = vld [vmem:[#allocation47_spill] sm:$0xff] }
 0x308   :  { %v8109_v46 = vpop.permute.xlu1 %4073  ;;  %v4293_v35 = vsel %vm1562_vm6, %v10178_v11, %v10177_v48  ;;  %v4324_v11 = vsel %vm54_vm0, %v4292_v41, %v10186_v21  ;;  %v10187_v48 = vld [vmem:[#allocation95_spill] sm:$0xff]  ;;  %v4330_v21 = vsel %vm54_vm0, %v4298_v28, %v7416_v1 }
 0x309   :  { %10169 = vst [vmem:[#allocation187_spill] sm:$0xff] %v8109_v46  ;;  %v8115_v62 = vpop.permute.xlu0 %4071  ;;  %v3237_v46 = vcombine.high %v7800_v56, %v9913_v24  ;;  %v4294_v56 = vsel %vm1562_vm6, %v10176_v58, %v10175_v50  ;;  %v10185_v58 = vld [vmem:[#allocation41_spill] sm:$0xff]  ;;  %v4356_v41 = vsel %vm1571_vm7, %v4324_v11, %v7713_v61  ;;  %v4362_v1 = vsel %vm1571_vm7, %v4330_v21, %v7759_v55 }
 0x30a   :  { %10170 = vst [vmem:[#allocation188_spill] sm:$0xff] %v8115_v62  ;;  %v4291_v62 = vsel %vm1562_vm6, %v10174_v32, %v10173_v3  ;;  %3725 = vrot.lane.b32.xlu1 %v3090_v33, %s6041_s14  ;;  %v4296_v3 = vsel %vm1562_vm6, %v10180_v22, %v10179_v63  ;;  %v10181_v33 = vld [vmem:[#allocation52_spill] sm:$0xff]  ;;  %v10182_v32 = vld [vmem:[#allocation39_spill] sm:$0xff]  ;;  %v4297_v50 = vsel %vm1562_vm6, %v10185_v58, %v10184_v9 }
 0x30b   :  { %v4295_v36 = vsel %vm1562_vm6, %v10182_v32, %v10181_v33  ;;  %3723 = vrot.lane.b32.xlu0 %v3041_v13, %s6041_s14  ;;  %v4323_v22 = vsel %vm54_vm0, %v4291_v62, %v10187_v48  ;;  %v4326_v33 = vsel %vm54_vm0, %v4294_v56, %v7319_v43  ;;  %v4325_v13 = vsel %vm54_vm0, %v4293_v35, %v7329_v5  ;;  %v10190_v56 = vld [vmem:[#allocation139_spill] sm:$0xff]  ;;  %v10191_v35 = vld [vmem:[#allocation61_spill] sm:$0xff] }
 0x30c   :  { %v4206_v63 = vpop.permute.xlu1 %4205  ;;  %v4328_v39 = vsel %vm54_vm0, %v4296_v3, %v7369_v30  ;;  %v4327_v32 = vsel %vm54_vm0, %v4295_v36, %v7379_v6  ;;  %v4329_v62 = vsel %vm54_vm0, %v4297_v50, %v7429_v14  ;;  %v4355_v43 = vsel %vm1571_vm7, %v4323_v22, %v7722_v18  ;;  %v10195_v22 = vld [vmem:[#allocation140_spill] sm:$0xff] }
 0x30d   :  { %v4204_v9 = vpop.permute.xlu0 %4203  ;;  %v4358_v5 = vsel %vm1571_vm7, %v4326_v33, %v7731_v53  ;;  %v4357_v6 = vsel %vm1571_vm7, %v4325_v13, %v7738_v23  ;;  %v4360_v30 = vsel %vm1571_vm7, %v4328_v39, %v7747_v57  ;;  %v4359_v14 = vsel %vm1571_vm7, %v4327_v32, %v7752_v17  ;;  %v10196_v13 = vld [vmem:[#allocation141_spill] sm:$0xff]  ;;  %v10197_v32 = vld [vmem:[#allocation142_spill] sm:$0xff] }
 0x30e   :  { %3729 = vrot.lane.b32.xlu1 %v3188_v34, %s6041_s14  ;;  %v4361_v34 = vsel %vm1571_vm7, %v4329_v62, %v7765_v15  ;;  %v2698_v53 = vcombine.high %v7946_v31, %v9913_v24  ;;  %v2649_v61 = vcombine.high %v7952_v47, %v9913_v24  ;;  %v4388_v23 = vsel %vm188_vm1, %v4356_v41, %v7457_v59  ;;  %v10188_v47 = vld [vmem:[#allocation137_spill] sm:$0xff]  ;;  %v10198_v41 = vld [vmem:[#allocation68_spill] sm:$0xff] }
 0x30f   :  { %3727 = vrot.lane.b32.xlu0 %v3139_v16, %s6041_s14  ;;  %v4387_v17 = vsel %vm188_vm1, %v4355_v43, %v7467_v40  ;;  %v4390_v55 = vsel %vm188_vm1, %v4358_v5, %v7503_v51  ;;  %v4389_v15 = vsel %vm188_vm1, %v4357_v6, %v7511_v37  ;;  %v4392_v28 = vsel %vm188_vm1, %v4360_v30, %v7517_v20  ;;  %v10189_v16 = vld [vmem:[#allocation138_spill] sm:$0xff] }
 0x310   :  { %v4210_v18 = vpop.permute.xlu1 %4209  ;;  %v4391_v31 = vsel %vm188_vm1, %v4359_v14, %v7521_v42  ;;  %v4420_v40 = vsel %vm1580_vm8, %v4388_v23, %v7775_v52  ;;  %v4419_v59 = vsel %vm1580_vm8, %v4387_v17, %v7781_v8  ;;  %v4394_v51 = vsel %vm188_vm1, %v4362_v1, %v7527_v45  ;;  %v10199_v5 = vld [vmem:[#allocation146_spill] sm:$0xff] }
 0x311   :  { %v4208_v57 = vpop.permute.xlu0 %4207  ;;  %v4393_v37 = vsel %vm188_vm1, %v4361_v34, %v7531_v49  ;;  %v4422_v20 = vsel %vm1580_vm8, %v4390_v55, %v7791_v44  ;;  %v4421_v42 = vsel %vm1580_vm8, %v4389_v15, %v7797_v0  ;;  %v4424_v52 = vsel %vm1580_vm8, %v4392_v28, %v10188_v47  ;;  %v10193_v44 = vld [vmem:[#allocation63_spill] sm:$0xff]  ;;  %v10200_v1 = vld [vmem:[#allocation6_spill] sm:$0xff] }
 0x312   :  { %3733 = vrot.lane.b32.xlu1 %v3286_v26, %s6041_s14  ;;  %v4423_v8 = vsel %vm1580_vm8, %v4391_v31, %v10189_v16  ;;  %v4426_v45 = vsel %vm1580_vm8, %v4394_v51, %v10190_v56  ;;  %v4454_v49 = vsel %vm1585_vm9, %v4422_v20, %v10191_v35  ;;  %v4456_v36 = vsel %vm1585_vm9, %v4424_v52, %v10193_v44  ;;  %v10201_v28 = vld [vmem:[#allocation22_spill] sm:$0xff]  ;;  %v10206_v56 = vld [vmem:[#allocation23_spill] sm:$0xff]  ;;  %v10207_v35 = vld [vmem:[#allocation16_spill] sm:$0xff] }
 0x313   :  { %3731 = vrot.lane.b32.xlu0 %v3237_v46, %s6041_s14  ;;  %v10192_v46 = vld [vmem:[#allocation62_spill] sm:$0xff]  ;;  %v4455_v58 = vsel %vm1585_vm9, %v4423_v8, %v10194_v54  ;;  %v4486_v50 = vsel %vm1590_vm10, %v4454_v49, %v4210_v18  ;;  %v4425_v33 = vsel %vm1580_vm8, %v4393_v37, %v10195_v22  ;;  %v4452_v39 = vsel %vm1585_vm9, %v4420_v40, %v10196_v13  ;;  %v10205_v8 = vld [vmem:[#allocation21_spill] sm:$0xff] }
 0x314   :  { %v4214_v26 = vpop.permute.xlu1 %4213  ;;  %v4453_v3 = vsel %vm1585_vm9, %v4421_v42, %v10192_v46  ;;  %v4451_v21 = vsel %vm1585_vm9, %v4419_v59, %v10197_v32  ;;  %v4458_v43 = vsel %vm1585_vm9, %v4426_v45, %v10198_v41  ;;  %v4484_v6 = vsel %vm1590_vm10, %v4452_v39, %v4206_v63  ;;  %v10202_v37 = vld [vmem:[#allocation18_spill] sm:$0xff]  ;;  %v10203_v42 = vld [vmem:[#allocation19_spill] sm:$0xff] }
 0x315   :  { %v4212_v0 = vpop.permute.xlu0 %4211  ;;  %v4485_v11 = vsel %vm1590_vm10, %v4453_v3, %v4208_v57  ;;  %v4488_v48 = vsel %vm1590_vm10, %v4456_v36, %v4214_v26  ;;  %v4483_v30 = vsel %vm1590_vm10, %v4451_v21, %v4204_v9  ;;  %v4554_v34 = vrot.slane %v4486_v50, %v10200_v1 }
 0x316   :  { %3737 = vrot.lane.b32.xlu1 %v3384_v27, %s6041_s14  ;;  %v4487_v62 = vsel %vm1590_vm10, %v4455_v58, %v4212_v0  ;;  %v4457_v27 = vsel %vm1585_vm9, %v4425_v33, %v10199_v5  ;;  %v4550_v18 = vrot.slane %v4485_v11, %v10200_v1  ;;  %v4562_v23 = vrot.slane %v4488_v48, %v10200_v1 }
 0x317   :  { %3735 = vrot.lane.b32.xlu0 %v8136_v4, %s6041_s14  ;;  %v4558_v57 = vrot.slane %v4487_v62, %v10200_v1  ;;  %v4546_v63 = vrot.slane %v4484_v6, %v10200_v1  ;;  %v4542_v9 = vrot.slane %v4483_v30, %v10200_v1  ;;  %v2796_v51 = vcombine.high %v7962_v60, %v9913_v24  ;;  %v10208_v60 = vld [vmem:[#allocation17_spill] sm:$0xff] }
 0x318   :  { %v4218_v14 = vpop.permute.xlu1 %4217  ;;  %v4646_v20 = vmul.f32 %v4554_v34, %v10202_v37  ;;  %v4645_v47 = vmul.f32 %v4550_v18, %v10203_v42  ;;  %v2845_v58 = vcombine.high %v7988_v38, %v9913_v24  ;;  %v2992_v21 = vcombine.high %v8000_v7, %v9913_v24  ;;  %v10218_v42 = vld [vmem:[#allocation178_spill] sm:$0xff] }
 0x319   :  { %v4490_v17 = vsel %vm1590_vm10, %v4458_v43, %v4218_v14  ;;  %v4216_v4 = vpop.permute.xlu0 %4215  ;;  %v4647_v26 = vmul.f32 %v4558_v57, %v10205_v8  ;;  %v4644_v49 = vmul.f32 %v4546_v63, %v10207_v35  ;;  %v4643_v46 = vmul.f32 %v4542_v9, %v10208_v60  ;;  %v10224_v60 = vld [vmem:[#allocation186_spill] sm:$0xff] }
 0x31a   :  { %v4570_v55 = vrot.slane %v4490_v17, %v10200_v1  ;;  %v4489_v15 = vsel %vm1590_vm10, %v4457_v27, %v4216_v4  ;;  %3709 = vrot.lane.b32.xlu1 %v2698_v53, %s6041_s14  ;;  %v10204_v53 = vld [vmem:[#allocation20_spill] sm:$0xff]  ;;  %v2943_v62 = vcombine.high %v8010_v29, %v9913_v24  ;;  %v2699_v14 = vcombine.high %v8025_v10, %v9913_v24  ;;  %v10213_v4 = vld [vmem:[#allocation33_spill] sm:$0xff] }
 0x31b   :  { %3707 = vrot.lane.b32.xlu0 %v2649_v61, %s6041_s14  ;;  %v4566_v40 = vrot.slane %v4489_v15, %v10200_v1  ;;  %v4648_v52 = vmul.f32 %v4562_v23, %v10204_v53  ;;  %v2747_v61 = vcombine.high %v7968_v25, %v9913_v24  ;;  %v2894_v25 = vcombine.high %v7980_v12, %v9913_v24  ;;  %v10215_v15 = vld [vmem:[#allocation172_spill] sm:$0xff] }
 0x31c   :  { %v4650_v31 = vmul.f32 %v4570_v55, %v10201_v28  ;;  %v8267_v59 = vpop.permute.xlu1 %3469  ;;  %v4819_v50 = vcombine.low %v4644_v49, %v4646_v20  ;;  %v4820_v11 = vcombine.high %v4644_v49, %v4646_v20  ;;  %v4803_v48 = vcombine.low %v4643_v46, %v4645_v47  ;;  %v10216_v28 = vld [vmem:[#allocation175_spill] sm:$0xff] }
 0x31d   :  { %v8274_v16 = vpop.permute.xlu0 %3467  ;;  %v4649_v45 = vmul.f32 %v4566_v40, %v10206_v56  ;;  %v4804_v22 = vcombine.high %v4643_v46, %v4645_v47  ;;  %v2650_v17 = vcombine.high %v8036_v2, %v9913_v24  ;;  %v2797_v63 = vcombine.high %v10215_v15, %v9913_v24  ;;  %v10233_v15 = vld [vmem:[#allocation182_spill] sm:$0xff] }
 0x31e   :  { %3713 = vrot.lane.b32.xlu1 %v2796_v51, %s6041_s14  ;;  %v4851_v3 = vcombine.low %v4648_v52, %v4650_v31  ;;  %v4852_v44 = vcombine.high %v4648_v52, %v4650_v31  ;;  %v8313_v41 = vrot.slane %v4819_v50, %v6286_v19  ;;  %v8316_v43 = vrot.slane %v4820_v11, %v6286_v19  ;;  %v10219_v52 = vld [vmem:[#allocation181_spill] sm:$0xff] }
 0x31f   :  { %3711 = vrot.lane.b32.xlu0 %v2747_v61, %s6041_s14  ;;  %v4835_v36 = vcombine.low %v4647_v26, %v4649_v45  ;;  %v4836_v0 = vcombine.high %v4647_v26, %v4649_v45  ;;  %v8319_v5 = vrot.slane %v4803_v48, %v6286_v19  ;;  %v8322_v27 = vrot.slane %v4804_v22, %v6286_v19  ;;  %v10221_v26 = vld [vmem:[#allocation184_spill] sm:$0xff]  ;;  %v10228_v50 = vld [vmem:[#allocation173_spill] sm:$0xff] }
 0x320   :  { %v8284_v54 = vpop.permute.xlu1 %3473  ;;  %v8294_v13 = vrot.slane %v4851_v3, %v6286_v19  ;;  %v8297_v39 = vrot.slane %v4852_v44, %v6286_v19  ;;  %v2748_v2 = vcombine.high %v10216_v28, %v9913_v24  ;;  %v2895_v47 = vcombine.high %v10218_v42, %v9913_v24  ;;  %v10222_v45 = vld [vmem:[#allocation164_spill] sm:$0xff]  ;;  %v10225_v3 = vld [vmem:[#allocation166_spill] sm:$0xff]  ;;  %v10234_v28 = vld [vmem:[#allocation75_spill] sm:$0xff] }
 0x321   :  { %v8290_v33 = vpop.permute.xlu0 %3471  ;;  %v8300_v32 = vrot.slane %v4835_v36, %v6286_v19  ;;  %v8303_v12 = vrot.slane %v4836_v0, %v6286_v19  ;;  %v4867_v34 = vcombine.low %v8319_v5, %v8313_v41  ;;  %v4883_v18 = vcombine.low %v8322_v27, %v8316_v43  ;;  %v10226_v36 = vld [vmem:[#allocation168_spill] sm:$0xff] }
 0x322   :  { %3717 = vrot.lane.b32.xlu1 %v2894_v25, %s6041_s14  ;;  %v2846_v61 = vcombine.high %v10219_v52, %v9913_v24  ;;  %v2993_v56 = vcombine.high %v10221_v26, %v9913_v24  ;;  %v2682_v35 = vcombine.high %v10222_v45, %v9913_v24  ;;  %v2944_v46 = vcombine.high %v10224_v60, %v9913_v24  ;;  %v10227_v25 = vld [vmem:[#allocation170_spill] sm:$0xff]  ;;  %v10229_v48 = vld [vmem:[#allocation176_spill] sm:$0xff]  ;;  %v10237_v52 = vld [vmem:[#allocation59_spill] sm:$0xff] }
 0x323   :  { %3715 = vrot.lane.b32.xlu0 %v2845_v58, %s6041_s14  ;;  %v4899_v7 = vcombine.low %v8300_v32, %v8294_v13  ;;  %v4915_v29 = vcombine.low %v8303_v12, %v8297_v39  ;;  %v8361_v31 = vrot.slane %v4867_v34, %v10213_v4  ;;  %v8364_v40 = vrot.slane %v4883_v18, %v10213_v4  ;;  %v10238_v45 = vld [vmem:[#allocation79_spill] sm:$0xff] }
 0x324   :  { %v8306_v38 = vpop.permute.xlu1 %3477  ;;  %v2633_v44 = vcombine.high %v10225_v3, %v9913_v24  ;;  %v2780_v0 = vcombine.high %v10226_v36, %v9913_v24  ;;  %v2731_v58 = vcombine.high %v10227_v25, %v9913_v24  ;;  %v2878_v11 = vcombine.high %v10228_v50, %v9913_v24  ;;  %v10241_v3 = vld [vmem:[#allocation64_spill] sm:$0xff]  ;;  %v10242_v36 = vld [vmem:[#allocation83_spill] sm:$0xff] }
 0x325   :  { %10209 = vst [vmem:[#allocation87_spill] sm:$0xff] %v8306_v38  ;;  %v8324_v6 = vpop.permute.xlu0 %3475  ;;  %v8347_v57 = vrot.slane %v4899_v7, %v10213_v4  ;;  %v8350_v10 = vrot.slane %v4915_v29, %v10213_v4  ;;  %10217 = vst [vmem:[#allocation36_spill] sm:$0xff] %v8361_v31  ;;  %v2829_v22 = vcombine.high %v10229_v48, %v9913_v24  ;;  %v10231_v7 = vld [vmem:[#allocation179_spill] sm:$0xff]  ;;  %v10246_v48 = vld [vmem:[#allocation85_spill] sm:$0xff] }
 0x326   :  { %10210 = vst [vmem:[#allocation34_spill] sm:$0xff] %v8324_v6  ;;  %3721 = vrot.lane.b32.xlu1 %v2992_v21, %s6041_s14  ;;  %v2976_v29 = vcombine.high %v10231_v7, %v9913_v24  ;;  %v2647_v34 = vrot.slane %v2633_v44, %v10213_v4  ;;  %v8413_v18 = vrot.slane %v2780_v0, %v10213_v4  ;;  %v10243_v0 = vld [vmem:[#allocation66_spill] sm:$0xff]  ;;  %v10245_v50 = vld [vmem:[#allocation67_spill] sm:$0xff] }
 0x327   :  { %3719 = vrot.lane.b32.xlu0 %v2943_v62, %s6041_s14  ;;  %10214 = vst [vmem:[#allocation46_spill] sm:$0xff] %v8347_v57  ;;  %v2696_v62 = vrot.slane %v2682_v35, %v10213_v4  ;;  %v8428_v26 = vrot.slane %v2878_v11, %v10213_v4  ;;  %v10239_v35 = vld [vmem:[#allocation60_spill] sm:$0xff]  ;;  %v4288_v25 = vsel %vm1562_vm6, %v10243_v0, %v10242_v36  ;;  %v10253_v0 = vld [vmem:[#allocation78_spill] sm:$0xff] }
 0x328   :  { %v8332_v30 = vpop.permute.xlu1 %3481  ;;  %v4286_v60 = vsel %vm1562_vm6, %v10239_v35, %v10238_v45  ;;  %v10251_v45 = vld [vmem:[#allocation74_spill] sm:$0xff] }
 0x329   :  { %10211 = vst [vmem:[#allocation88_spill] sm:$0xff] %v8332_v30  ;;  %v8340_v23 = vpop.permute.xlu0 %3479 }
 0x32a   :  { %10212 = vst [vmem:[#allocation35_spill] sm:$0xff] %v8340_v23  ;;  %3965 = vrot.lane.b32.xlu1 %v2699_v14, %s6042_s15 }
 0x32b   :  { %3963 = vrot.lane.b32.xlu0 %v2650_v17, %s6042_s15  ;;  %v8416_v17 = vrot.slane %v2731_v58, %v10213_v4  ;;  %v10244_v58 = vld [vmem:[#allocation72_spill] sm:$0xff] }
 0x32c   :  { %v8352_v55 = vpop.permute.xlu1 %3597  ;;  %v4287_v11 = vsel %vm1562_vm6, %v10245_v50, %v10244_v58  ;;  %v10254_v50 = vld [vmem:[#allocation80_spill] sm:$0xff] }
 0x32d   :  { %v8356_v9 = vpop.permute.xlu0 %3595 }
 0x32e   :  { %3969 = vrot.lane.b32.xlu1 %v2797_v63, %s6042_s15  ;;  %v2927_v63 = vcombine.high %v10233_v15, %v9913_v24  ;;  %v10248_v15 = vld [vmem:[#allocation73_spill] sm:$0xff] }
 0x32f   :  { %3967 = vrot.lane.b32.xlu0 %v2748_v2, %s6042_s15  ;;  %v10235_v2 = vld [vmem:[#allocation57_spill] sm:$0xff] }
 0x330   :  { %v8372_v20 = vpop.permute.xlu1 %3601  ;;  %v4284_v42 = vsel %vm1562_vm6, %v10235_v2, %v10234_v28  ;;  %v10249_v28 = vld [vmem:[#allocation71_spill] sm:$0xff] }
 0x331   :  { %v8376_v53 = vpop.permute.xlu0 %3599  ;;  %v4289_v2 = vsel %vm1562_vm6, %v10249_v28, %v10248_v15  ;;  %v10256_v28 = vld [vmem:[#allocation84_spill] sm:$0xff] }
 0x332   :  { %3973 = vrot.lane.b32.xlu1 %v2895_v47, %s6042_s15  ;;  %v10236_v47 = vld [vmem:[#allocation77_spill] sm:$0xff] }
 0x333   :  { %3971 = vrot.lane.b32.xlu0 %v2846_v61, %s6042_s15  ;;  %v4283_v61 = vsel %vm1562_vm6, %v10237_v52, %v10236_v47  ;;  %v10250_v47 = vld [vmem:[#allocation86_spill] sm:$0xff] }
 0x334   :  { %v8382_v8 = vpop.permute.xlu1 %3605  ;;  %v4316_v52 = vsel %vm54_vm0, %v4284_v42, %v10250_v47  ;;  %v4315_v35 = vsel %vm54_vm0, %v4283_v61, %v10251_v45  ;;  %v10257_v47 = vld [vmem:[#allocation120_spill] sm:$0xff]  ;;  %v10258_v45 = vld [vmem:[#allocation70_spill] sm:$0xff] }
 0x335   :  { %10220 = vst [vmem:[#allocation47_spill] sm:$0xff] %v8382_v8  ;;  %v8388_v49 = vpop.permute.xlu0 %3603  ;;  %v4321_v61 = vsel %vm54_vm0, %v4289_v2, %v10257_v47  ;;  %v4348_v51 = vsel %vm1571_vm7, %v4316_v52, %v10258_v45  ;;  %v10264_v52 = vld [vmem:[#allocation157_spill] sm:$0xff] }
 0x336   :  { %10223 = vst [vmem:[#allocation37_spill] sm:$0xff] %v8388_v49  ;;  %3977 = vrot.lane.b32.xlu1 %v2993_v56, %s6042_s15  ;;  %v8431_v56 = vrot.slane %v2829_v22, %v10213_v4  ;;  %v10247_v22 = vld [vmem:[#allocation69_spill] sm:$0xff] }
 0x337   :  { %3975 = vrot.lane.b32.xlu0 %v2944_v46, %s6042_s15  ;;  %v10240_v46 = vld [vmem:[#allocation81_spill] sm:$0xff]  ;;  %v4290_v7 = vsel %vm1562_vm6, %v10247_v22, %v10246_v48  ;;  %v4320_v48 = vsel %vm54_vm0, %v4288_v25, %v10254_v50  ;;  %v10255_v22 = vld [vmem:[#allocation82_spill] sm:$0xff]  ;;  %v10262_v50 = vld [vmem:[#allocation155_spill] sm:$0xff] }
 0x338   :  { %v8404_v21 = vpop.permute.xlu1 %3609  ;;  %v4285_v44 = vsel %vm1562_vm6, %v10241_v3, %v10240_v46  ;;  %v10252_v3 = vld [vmem:[#allocation76_spill] sm:$0xff]  ;;  %v4319_v37 = vsel %vm54_vm0, %v4287_v11, %v10255_v22  ;;  %v4322_v42 = vsel %vm54_vm0, %v4290_v7, %v10256_v28  ;;  %v10261_v11 = vld [vmem:[#allocation153_spill] sm:$0xff]  ;;  %v4352_v7 = vsel %vm1571_vm7, %v4320_v48, %v10262_v50  ;;  %v10265_v28 = vld [vmem:[#allocation158_spill] sm:$0xff] }
 0x339   :  { %10230 = vst [vmem:[#allocation49_spill] sm:$0xff] %v8404_v21  ;;  %v8409_v14 = vpop.permute.xlu0 %3607  ;;  %v4318_v36 = vsel %vm54_vm0, %v4286_v60, %v10252_v3  ;;  %v4317_v58 = vsel %vm54_vm0, %v4285_v44, %v10253_v0  ;;  %v10259_v60 = vld [vmem:[#allocation149_spill] sm:$0xff]  ;;  %v10260_v44 = vld [vmem:[#allocation151_spill] sm:$0xff]  ;;  %v10263_v22 = vld [vmem:[#allocation156_spill] sm:$0xff]  ;;  %v4353_v47 = vsel %vm1571_vm7, %v4321_v61, %v10265_v28  ;;  %v2700_v50 = vcombine.high %v2696_v62, %v9913_v24 }
 0x33a   :  { %10232 = vst [vmem:[#allocation38_spill] sm:$0xff] %v8409_v14  ;;  %4093 = vrot.lane.b32.xlu1 %v2696_v62, %s6043_s16  ;;  %v4347_v3 = vsel %vm1571_vm7, %v4315_v35, %v10259_v60  ;;  %v4350_v25 = vsel %vm1571_vm7, %v4318_v36, %v10260_v44  ;;  %v4349_v0 = vsel %vm1571_vm7, %v4317_v58, %v10261_v11  ;;  %v10266_v48 = vld [vmem:[#allocation121_spill] sm:$0xff]  ;;  %v10271_v14 = vld [vmem:[#allocation127_spill] sm:$0xff]  ;;  %v10282_v21 = vld [vmem:[#allocation180_spill] sm:$0xff] }
 0x33b   :  { %4091 = vrot.lane.b32.xlu0 %v2647_v34, %s6043_s16  ;;  %v4351_v2 = vsel %vm1571_vm7, %v4319_v37, %v10263_v22  ;;  %v4354_v35 = vsel %vm1571_vm7, %v4322_v42, %v10264_v52  ;;  %v8489_v36 = vrot.slane %v2976_v29, %v10213_v4  ;;  %v8492_v58 = vrot.slane %v2927_v63, %v10213_v4  ;;  %v10267_v37 = vld [vmem:[#allocation122_spill] sm:$0xff]  ;;  %v10268_v22 = vld [vmem:[#allocation123_spill] sm:$0xff]  ;;  %v10269_v52 = vld [vmem:[#allocation124_spill] sm:$0xff] }
 0x33c   :  { %v4190_v46 = vpop.permute.xlu1 %4189  ;;  %v4380_v60 = vsel %vm188_vm1, %v4348_v51, %v10266_v48  ;;  %v4379_v44 = vsel %vm188_vm1, %v4347_v3, %v10267_v37  ;;  %v2651_v42 = vcombine.high %v2647_v34, %v9913_v24  ;;  %v4382_v61 = vsel %vm188_vm1, %v4350_v25, %v10268_v22  ;;  %v10270_v28 = vld [vmem:[#allocation125_spill] sm:$0xff]  ;;  %v10272_v3 = vld [vmem:[#allocation159_spill] sm:$0xff]  ;;  %v10273_v48 = vld [vmem:[#allocation160_spill] sm:$0xff] }
 0x33d   :  { %v4188_v15 = vpop.permute.xlu0 %4187  ;;  %v4381_v29 = vsel %vm188_vm1, %v4349_v0, %v10269_v52  ;;  %v4384_v63 = vsel %vm188_vm1, %v4352_v7, %v10270_v28  ;;  %v4383_v51 = vsel %vm188_vm1, %v4351_v2, %v10271_v14  ;;  %v4412_v62 = vsel %vm1580_vm8, %v4380_v60, %v10272_v3  ;;  %v10274_v37 = vld [vmem:[#allocation129_spill] sm:$0xff]  ;;  %v10275_v22 = vld [vmem:[#allocation131_spill] sm:$0xff]  ;;  %v10277_v2 = vld [vmem:[#allocation162_spill] sm:$0xff] }
 0x33e   :  { %4097 = vrot.lane.b32.xlu1 %v8413_v18, %s6043_s16  ;;  %v4411_v34 = vsel %vm1580_vm8, %v4379_v44, %v10273_v48  ;;  %v4386_v25 = vsel %vm188_vm1, %v4354_v35, %v10274_v37  ;;  %v4385_v0 = vsel %vm188_vm1, %v4353_v47, %v10275_v22  ;;  %v10276_v7 = vld [vmem:[#allocation161_spill] sm:$0xff]  ;;  %v4413_v52 = vsel %vm1580_vm8, %v4381_v29, %v10277_v2  ;;  %v10278_v28 = vld [vmem:[#allocation163_spill] sm:$0xff] }
 0x33f   :  { %4095 = vrot.lane.b32.xlu0 %v8416_v17, %s6043_s16  ;;  %v4414_v14 = vsel %vm1580_vm8, %v4382_v61, %v10276_v7  ;;  %v4416_v60 = vsel %vm1580_vm8, %v4384_v63, %v10278_v28  ;;  %v10279_v3 = vld [vmem:[#allocation165_spill] sm:$0xff]  ;;  %v10280_v35 = vld [vmem:[#allocation167_spill] sm:$0xff]  ;;  %v4445_v8 = vsel %vm1585_vm9, %v4413_v52, %v10282_v21 }
 0x340   :  { %v4194_v45 = vpop.permute.xlu1 %4193  ;;  %v4415_v44 = vsel %vm1580_vm8, %v4383_v51, %v10279_v3  ;;  %v4418_v37 = vsel %vm1580_vm8, %v4386_v25, %v10280_v35  ;;  %v10281_v47 = vld [vmem:[#allocation177_spill] sm:$0xff]  ;;  %v10283_v61 = vld [vmem:[#allocation183_spill] sm:$0xff] }
 0x341   :  { %v4192_v11 = vpop.permute.xlu0 %4191  ;;  %v4446_v22 = vsel %vm1585_vm9, %v4414_v14, %v10281_v47  ;;  %v4448_v7 = vsel %vm1585_vm9, %v4416_v60, %v10283_v61  ;;  %v10284_v2 = vld [vmem:[#allocation185_spill] sm:$0xff]  ;;  %v10286_v21 = vld [vmem:[#allocation171_spill] sm:$0xff]  ;;  %v10287_v60 = vld [vmem:[#allocation174_spill] sm:$0xff] }
 0x342   :  { %4101 = vrot.lane.b32.xlu1 %v8428_v26, %s6043_s16  ;;  %v4447_v63 = vsel %vm1585_vm9, %v4415_v44, %v10284_v2  ;;  %v4478_v28 = vsel %vm1590_vm10, %v4446_v22, %v4194_v45  ;;  %v4477_v51 = vsel %vm1590_vm10, %v4445_v8, %v4192_v11  ;;  %v10285_v25 = vld [vmem:[#allocation169_spill] sm:$0xff]  ;;  %v4444_v52 = vsel %vm1585_vm9, %v4412_v62, %v10286_v21  ;;  %v10288_v8 = vld [vmem:[#allocation187_spill] sm:$0xff]  ;;  %v10289_v11 = vld [vmem:[#allocation188_spill] sm:$0xff] }
 0x343   :  { %4099 = vrot.lane.b32.xlu0 %v8431_v56, %s6043_s16  ;;  %v4417_v14 = vsel %vm1580_vm8, %v4385_v0, %v10285_v25  ;;  %v4443_v35 = vsel %vm1585_vm9, %v4411_v34, %v10287_v60  ;;  %v4450_v45 = vsel %vm1585_vm9, %v4418_v37, %v10288_v8  ;;  %v4476_v47 = vsel %vm1590_vm10, %v4444_v52, %v4190_v46  ;;  %v10292_v21 = vld [vmem:[#allocation26_spill] sm:$0xff]  ;;  %v10293_v60 = vld [vmem:[#allocation27_spill] sm:$0xff] }
 0x344   :  { %v4198_v48 = vpop.permute.xlu1 %4197  ;;  %v4475_v0 = vsel %vm1590_vm10, %v4443_v35, %v4188_v15  ;;  %v4522_v62 = vrot.slane %v4478_v28, %v10200_v1  ;;  %v4518_v34 = vrot.slane %v4477_v51, %v10200_v1  ;;  %v4514_v46 = vrot.slane %v4476_v47, %v10200_v1  ;;  %v10290_v28 = vld [vmem:[#allocation30_spill] sm:$0xff] }
 0x345   :  { %v4196_v29 = vpop.permute.xlu0 %4195  ;;  %v4480_v3 = vsel %vm1590_vm10, %v4448_v7, %v4198_v48  ;;  %v4449_v48 = vsel %vm1585_vm9, %v4417_v14, %v10289_v11  ;;  %v4510_v15 = vrot.slane %v4475_v0, %v10200_v1  ;;  %v2798_v14 = vcombine.high %v8413_v18, %v9913_v24  ;;  %v10298_v0 = vld [vmem:[#allocation29_spill] sm:$0xff]  ;;  %v10299_v18 = vld [vmem:[#allocation31_spill] sm:$0xff] }
 0x346   :  { %4105 = vrot.lane.b32.xlu1 %v8489_v36, %s6043_s16  ;;  %v4479_v44 = vsel %vm1590_vm10, %v4447_v63, %v4196_v29  ;;  %v4530_v61 = vrot.slane %v4480_v3, %v10200_v1  ;;  %v4638_v52 = vmul.f32 %v4522_v62, %v10292_v21  ;;  %v4637_v35 = vmul.f32 %v4518_v34, %v10293_v60  ;;  %v10300_v62 = vld [vmem:[#allocation24_spill] sm:$0xff] }
 0x347   :  { %4103 = vrot.lane.b32.xlu0 %v8492_v58, %s6043_s16  ;;  %v4526_v2 = vrot.slane %v4479_v44, %v10200_v1  ;;  %v4636_v34 = vmul.f32 %v4514_v46, %v10300_v62  ;;  %v2896_v60 = vcombine.high %v8428_v26, %v9913_v24 }
 0x348   :  { %v4202_v22 = vpop.permute.xlu1 %4201 }
 0x349   :  { %v4482_v7 = vsel %vm1590_vm10, %v4450_v45, %v4202_v22  ;;  %v4200_v29 = vpop.permute.xlu0 %4199  ;;  %v10296_v45 = vld [vmem:[#allocation42_spill] sm:$0xff]  ;;  %v4639_v22 = vmul.f32 %v4526_v2, %v10298_v0  ;;  %v2847_v2 = vcombine.high %v8431_v56, %v9913_v24  ;;  %v2994_v0 = vcombine.high %v8489_v36, %v9913_v24 }
 0x34a   :  { %v4538_v37 = vrot.slane %v4482_v7, %v10200_v1  ;;  %v4481_v63 = vsel %vm1590_vm10, %v4449_v48, %v4200_v29  ;;  %4221 = vrot.lane.b32.xlu1 %v2700_v50, %s6044_s17  ;;  %v10294_v50 = vld [vmem:[#allocation28_spill] sm:$0xff]  ;;  %v3044_v11 = vcombine.high %v10296_v45, %v9913_v24  ;;  %v10297_v48 = vld [vmem:[#allocation43_spill] sm:$0xff] }
 0x34b   :  { %4219 = vrot.lane.b32.xlu0 %v2651_v42, %s6044_s17  ;;  %v4534_v3 = vrot.slane %v4481_v63, %v10200_v1  ;;  %v4640_v44 = vmul.f32 %v4530_v61, %v10294_v50  ;;  %v2749_v42 = vcombine.high %v8416_v17, %v9913_v24  ;;  %v2995_v47 = vcombine.high %v10297_v48, %v9913_v24  ;;  %v10301_v61 = vld [vmem:[#allocation25_spill] sm:$0xff] }
 0x34c   :  { %v4642_v51 = vmul.f32 %v4538_v37, %v10290_v28  ;;  %v8571_v25 = vpop.permute.xlu1 %3453  ;;  %v4635_v29 = vmul.f32 %v4510_v15, %v10301_v61  ;;  %v10304_v15 = vld [vmem:[#allocation44_spill] sm:$0xff] }
 0x34d   :  { %10291 = vst [vmem:[#allocation52_spill] sm:$0xff] %v8571_v25  ;;  %v8578_v8 = vpop.permute.xlu0 %3451  ;;  %v4641_v7 = vmul.f32 %v4534_v3, %v10299_v18  ;;  %v4683_v3 = vcombine.low %v4636_v34, %v4638_v52  ;;  %v8625_v18 = vrot.slane %v3044_v11, %v6286_v19 }
 0x34e   :  { %10295 = vst [vmem:[#allocation39_spill] sm:$0xff] %v8578_v8  ;;  %4225 = vrot.lane.b32.xlu1 %v2798_v14, %s6044_s17  ;;  %v4715_v37 = vcombine.low %v4640_v44, %v4642_v51  ;;  %v4716_v63 = vcombine.high %v4640_v44, %v4642_v51  ;;  %v4684_v14 = vcombine.high %v4636_v34, %v4638_v52  ;;  %v10305_v44 = vld [vmem:[#allocation45_spill] sm:$0xff] }
 0x34f   :  { %4223 = vrot.lane.b32.xlu0 %v2749_v42, %s6044_s17  ;;  %v4699_v17 = vcombine.low %v4639_v22, %v4641_v7  ;;  %v4700_v28 = vcombine.high %v4639_v22, %v4641_v7  ;;  %v4667_v50 = vcombine.low %v4635_v29, %v4637_v35  ;;  %v4668_v46 = vcombine.high %v4635_v29, %v4637_v35 }
 0x350   :  { %v8592_v21 = vpop.permute.xlu1 %3457  ;;  %v3142_v51 = vcombine.high %v10304_v15, %v9913_v24  ;;  %v3093_v42 = vcombine.high %v10305_v44, %v9913_v24  ;;  %v8606_v48 = vrot.slane %v4715_v37, %v6286_v19  ;;  %v8609_v26 = vrot.slane %v4716_v63, %v6286_v19  ;;  %v10309_v63 = vld [vmem:[#allocation51_spill] sm:$0xff] }
 0x351   :  { %10302 = vst [vmem:[#allocation40_spill] sm:$0xff] %v8592_v21  ;;  %v8598_v45 = vpop.permute.xlu0 %3455  ;;  %v8612_v56 = vrot.slane %v4699_v17, %v6286_v19  ;;  %v8615_v52 = vrot.slane %v4700_v28, %v6286_v19  ;;  %v2945_v22 = vcombine.high %v8492_v58, %v9913_v24  ;;  %v8628_v7 = vrot.slane %v2995_v47, %v6286_v19  ;;  %v10308_v47 = vld [vmem:[#allocation48_spill] sm:$0xff] }
 0x352   :  { %10303 = vst [vmem:[#allocation89_spill] sm:$0xff] %v8598_v45  ;;  %4229 = vrot.lane.b32.xlu1 %v2896_v60, %s6044_s17  ;;  %v8631_v62 = vrot.slane %v4683_v3, %v6286_v19  ;;  %v8634_v34 = vrot.slane %v4684_v14, %v6286_v19  ;;  %v8637_v61 = vrot.slane %v4667_v50, %v6286_v19 }
 0x353   :  { %4227 = vrot.lane.b32.xlu0 %v2847_v2, %s6044_s17  ;;  %v8640_v36 = vrot.slane %v4668_v46, %v6286_v19  ;;  %v4763_v58 = vcombine.low %v8612_v56, %v8606_v48  ;;  %v4779_v11 = vcombine.low %v8615_v52, %v8609_v26  ;;  %v3240_v37 = vcombine.high %v10308_v47, %v9913_v24  ;;  %v10313_v47 = vld [vmem:[#allocation55_spill] sm:$0xff] }
 0x354   :  { %v8618_v35 = vpop.permute.xlu1 %3461  ;;  %v3191_v17 = vcombine.high %v10309_v63, %v9913_v24  ;;  %v3081_v60 = vrot.slane %v8625_v18, %v10213_v4  ;;  %v8659_v2 = vrot.slane %v3142_v51, %v6286_v19  ;;  %v4731_v3 = vcombine.low %v8637_v61, %v8631_v62 }
 0x355   :  { %10306 = vst [vmem:[#allocation41_spill] sm:$0xff] %v8618_v35  ;;  %v8642_v29 = vpop.permute.xlu0 %3459  ;;  %v4747_v14 = vcombine.low %v8640_v36, %v8634_v34  ;;  %v3032_v46 = vrot.slane %v8628_v7, %v10213_v4  ;;  %v8670_v15 = vrot.slane %v3093_v42, %v6286_v19  ;;  %v8675_v51 = vrot.slane %v4763_v58, %v10213_v4 }
 0x356   :  { %10307 = vst [vmem:[#allocation94_spill] sm:$0xff] %v8642_v29  ;;  %4233 = vrot.lane.b32.xlu1 %v2994_v0, %s6044_s17  ;;  %v8678_v44 = vrot.slane %v4779_v11, %v10213_v4  ;;  %v10312_v0 = vld [vmem:[#allocation54_spill] sm:$0xff]  ;;  %v3289_v63 = vcombine.high %v10313_v47, %v9913_v24  ;;  %v3179_v42 = vrot.slane %v8659_v2, %v10213_v4 }
 0x357   :  { %4231 = vrot.lane.b32.xlu0 %v2945_v22, %s6044_s17  ;;  %v3338_v22 = vcombine.high %v10312_v0, %v9913_v24  ;;  %v8689_v30 = vrot.slane %v3240_v37, %v6286_v19  ;;  %v3130_v58 = vrot.slane %v8670_v15, %v10213_v4  ;;  %v8696_v11 = vrot.slane %v3191_v17, %v6286_v19 }
 0x358   :  { %v8654_v28 = vpop.permute.xlu1 %3465  ;;  %v8699_v0 = vrot.slane %v4731_v3, %v10213_v4  ;;  %v8702_v47 = vrot.slane %v4747_v14, %v10213_v4  ;;  %v8722_v35 = vrot.slane %v3289_v63, %v6286_v19  ;;  %v3074_v8 = vcombine.high %v8625_v18, %v9913_v24 }
 0x359   :  { %10310 = vst [vmem:[#allocation95_spill] sm:$0xff] %v8654_v28  ;;  %v8665_v50 = vpop.permute.xlu0 %3463  ;;  %v3277_v17 = vrot.slane %v8689_v30, %v10213_v4  ;;  %v8715_v3 = vrot.slane %v3338_v22, %v6286_v19  ;;  %v3228_v29 = vrot.slane %v8696_v11, %v10213_v4  ;;  %v3091_v19 = vcombine.high %v3081_v60, %v9913_v24 }
 0x35a   :  { %10311 = vst [vmem:[#allocation137_spill] sm:$0xff] %v8665_v50  ;;  %3853 = vrot.lane.b32.xlu1 %v3081_v60, %s6040_s4  ;;  %v3326_v22 = vrot.slane %v8722_v35, %v10213_v4  ;;  %v3140_v45 = vcombine.high %v3130_v58, %v9913_v24  ;;  %v3025_v49 = vcombine.high %v8628_v7, %v9913_v24 }
 0x35b   :  { %3851 = vrot.lane.b32.xlu0 %v3032_v46, %s6040_s4  ;;  %v3375_v37 = vrot.slane %v8715_v3, %v10213_v4 }
 0x35c   :  { %v8684_v23 = vpop.permute.xlu1 %3581  ;;  %v3039_v18 = vrot.slane %v3025_v49, %v10213_v4  ;;  %v3221_v49 = vcombine.high %v8696_v11, %v9913_v24 }
 0x35d   :  { %10314 = vst [vmem:[#allocation138_spill] sm:$0xff] %v8684_v23  ;;  %v8691_v38 = vpop.permute.xlu0 %3579 }
 0x35e   :  { %10315 = vst [vmem:[#allocation139_spill] sm:$0xff] %v8691_v38  ;;  %3857 = vrot.lane.b32.xlu1 %v3179_v42, %s6040_s4  ;;  %v3189_v38 = vcombine.high %v3179_v42, %v9913_v24 }
 0x35f   :  { %3855 = vrot.lane.b32.xlu0 %v3130_v58, %s6040_s4 }
 0x360   :  { %v8710_v28 = vpop.permute.xlu1 %3585 }
 0x361   :  { %10316 = vst [vmem:[#allocation61_spill] sm:$0xff] %v8710_v28  ;;  %v8717_v14 = vpop.permute.xlu0 %3583 }
 0x362   :  { %10317 = vst [vmem:[#allocation62_spill] sm:$0xff] %v8717_v14  ;;  %3861 = vrot.lane.b32.xlu1 %v3277_v17, %s6040_s4 }
 0x363   :  { %3859 = vrot.lane.b32.xlu0 %v3228_v29, %s6040_s4 }
 0x364   :  { %v8726_v50 = vpop.permute.xlu1 %3589 }
 0x365   :  { %10318 = vst [vmem:[#allocation63_spill] sm:$0xff] %v8726_v50  ;;  %v8730_v28 = vpop.permute.xlu0 %3587  ;;  %v3042_v50 = vcombine.high %v3032_v46, %v9913_v24  ;;  %v3287_v46 = vcombine.high %v3277_v17, %v9913_v24 }
 0x366   :  { %10319 = vst [vmem:[#allocation65_spill] sm:$0xff] %v8730_v28  ;;  %3865 = vrot.lane.b32.xlu1 %v3375_v37, %s6040_s4 }
 0x367   :  { %3863 = vrot.lane.b32.xlu0 %v3326_v22, %s6040_s4 }
 0x368   :  { %v8736_v63 = vpop.permute.xlu1 %3593 }
 0x369   :  { %10320 = vst [vmem:[#allocation140_spill] sm:$0xff] %v8736_v63  ;;  %v8739_v14 = vpop.permute.xlu0 %3591 }
 0x36a   :  { %10321 = vst [vmem:[#allocation141_spill] sm:$0xff] %v8739_v14  ;;  %3981 = vrot.lane.b32.xlu1 %v3091_v19, %s6042_s15  ;;  %v3238_v19 = vcombine.high %v3228_v29, %v9913_v24  ;;  %v10330_v29 = vld [vmem:[#allocation7_spill] sm:$0xff] }
 0x36b   :  { %3979 = vrot.lane.b32.xlu0 %v3042_v50, %s6042_s15  ;;  %v10326_v50 = vld [vmem:[#allocation13_spill] sm:$0xff] }
 0x36c   :  { %v8744_v28 = vpop.permute.xlu1 %3837  ;;  %v154_v42 = vmax.f32 %v10326_v50, 0.0 }
 0x36d   :  { %10322 = vst [vmem:[#allocation142_spill] sm:$0xff] %v8744_v28  ;;  %v8747_v23 = vpop.permute.xlu0 %3835 }
 0x36e   :  { %10323 = vst [vmem:[#allocation68_spill] sm:$0xff] %v8747_v23  ;;  %3985 = vrot.lane.b32.xlu1 %v3189_v38, %s6042_s15  ;;  %v3385_v38 = vcombine.high %v3375_v37, %v9913_v24  ;;  %v10332_v37 = vld [vmem:[#allocation8_spill] sm:$0xff] }
 0x36f   :  { %3983 = vrot.lane.b32.xlu0 %v3140_v45, %s6042_s15  ;;  %v3336_v45 = vcombine.high %v3326_v22, %v9913_v24  ;;  %v10333_v22 = vld [vmem:[#allocation9_spill] sm:$0xff] }
 0x370   :  { %v8752_v60 = vpop.permute.xlu1 %3841 }
 0x371   :  { %10324 = vst [vmem:[#allocation146_spill] sm:$0xff] %v8752_v60  ;;  %v8755_v14 = vpop.permute.xlu0 %3839 }
 0x372   :  { %10325 = vst [vmem:[#allocation6_spill] sm:$0xff] %v8755_v14  ;;  %3989 = vrot.lane.b32.xlu1 %v3287_v46, %s6042_s15  ;;  %v1717_v46 = vrot.slane %v154_v42, %v10330_v29 }
 0x373   :  { %3987 = vrot.lane.b32.xlu0 %v3238_v19, %s6042_s15  ;;  %v1710_v19 = vrot.slane %v154_v42, %v10200_v1 }
 0x374   :  { %v8761_v23 = vpop.permute.xlu1 %3845 }
 0x375   :  { %10327 = vst [vmem:[#allocation22_spill] sm:$0xff] %v8761_v23  ;;  %v8764_v58 = vpop.permute.xlu0 %3843 }
 0x376   :  { %10328 = vst [vmem:[#allocation18_spill] sm:$0xff] %v8764_v58  ;;  %3993 = vrot.lane.b32.xlu1 %v3385_v38, %s6042_s15  ;;  %v1731_v58 = vrot.slane %v154_v42, %v10332_v37  ;;  %v1724_v38 = vrot.slane %v154_v42, %v10333_v22 }
 0x377   :  { %3991 = vrot.lane.b32.xlu0 %v3336_v45, %s6042_s15 }
 0x378   :  { %v8769_v17 = vpop.permute.xlu1 %3849 }
 0x379   :  { %10329 = vst [vmem:[#allocation19_spill] sm:$0xff] %v8769_v17  ;;  %v8772_v14 = vpop.permute.xlu0 %3847  ;;  %v10334_v17 = vld [vmem:[#allocation10_spill] sm:$0xff] }
 0x37a   :  { %10331 = vst [vmem:[#allocation20_spill] sm:$0xff] %v8772_v14  ;;  %1719 = vbcast.lane.b32.xlu1 %v1717_v46, 256  ;;  %v1745_v60 = vrot.slane %v154_v42, %v10334_v17  ;;  %v10335_v14 = vld [vmem:[#allocation11_spill] sm:$0xff] }
 0x37b   :  { %1712 = vbcast.lane.b32.xlu0 %v1710_v19, 256  ;;  %v1738_v63 = vrot.slane %v154_v42, %v10335_v14  ;;  %v10337_v19 = vld [vmem:[#allocation14_spill] sm:$0xff] }
 0x37c   :  { %v8775_v50 = vpop.permute.xlu1 %3725  ;;  %v1759_v21 = vrot.slane %v154_v42, %v10337_v19 }
 0x37d   :  { %v8778_v23 = vpop.permute.xlu0 %3723 }
 0x37e   :  { %1733 = vbcast.lane.b32.xlu1 %v1731_v58, 256  ;;  %v10339_v58 = vld [vmem:[#allocation15_spill] sm:$0xff] }
 0x37f   :  { %1726 = vbcast.lane.b32.xlu0 %v1724_v38, 256  ;;  %v1752_v38 = vrot.slane %v154_v42, %v10339_v58 }
 0x380   :  { %v8781_v45 = vpop.permute.xlu1 %3729 }
 0x381   :  { %v8784_v28 = vpop.permute.xlu0 %3727 }
 0x382   :  { %1747 = vbcast.lane.b32.xlu1 %v1745_v60, 256  ;;  %v3172_v60 = vcombine.high %v8659_v2, %v9913_v24 }
 0x383   :  { %1740 = vbcast.lane.b32.xlu0 %v1738_v63, 256  ;;  %v3088_v63 = vrot.slane %v3074_v8, %v10213_v4  ;;  %v3270_v8 = vcombine.high %v8689_v30, %v9913_v24  ;;  %v3235_v30 = vrot.slane %v3221_v49, %v10213_v4 }
 0x384   :  { %v8787_v46 = vpop.permute.xlu1 %3733  ;;  %v3186_v7 = vrot.slane %v3172_v60, %v10213_v4  ;;  %v3368_v60 = vcombine.high %v8715_v3, %v9913_v24 }
 0x385   :  { %10336 = vst [vmem:[#allocation21_spill] sm:$0xff] %v8787_v46  ;;  %v8792_v25 = vpop.permute.xlu0 %3731 }
 0x386   :  { %10338 = vst [vmem:[#allocation23_spill] sm:$0xff] %v8792_v25  ;;  %1761 = vbcast.lane.b32.xlu1 %v1759_v21, 256  ;;  %v3123_v25 = vcombine.high %v8670_v15, %v9913_v24 }
 0x387   :  { %1754 = vbcast.lane.b32.xlu0 %v1752_v38, 256  ;;  %v3284_v38 = vrot.slane %v3270_v8, %v10213_v4 }
 0x388   :  { %v8797_v6 = vpop.permute.xlu1 %3737  ;;  %v3137_v2 = vrot.slane %v3123_v25, %v10213_v4  ;;  %v3319_v25 = vcombine.high %v8722_v35, %v9913_v24  ;;  %v3092_v35 = vcombine.high %v3088_v63, %v9913_v24 }
 0x389   :  { %10340 = vst [vmem:[#allocation16_spill] sm:$0xff] %v8797_v6  ;;  %v8802_v46 = vpop.permute.xlu0 %3735  ;;  %v3382_v6 = vrot.slane %v3368_v60, %v10213_v4 }
 0x38a   :  { %10341 = vst [vmem:[#allocation17_spill] sm:$0xff] %v8802_v46  ;;  %4109 = vrot.lane.b32.xlu1 %v3088_v63, %s6043_s16  ;;  %v3333_v8 = vrot.slane %v3319_v25, %v10213_v4  ;;  %v3190_v25 = vcombine.high %v3186_v7, %v9913_v24 }
 0x38b   :  { %4107 = vrot.lane.b32.xlu0 %v3039_v18, %s6043_s16 }
 0x38c   :  { %v8809_v21 = vpop.permute.xlu1 %3709 }
 0x38d   :  { %v8814_v42 = vpop.permute.xlu0 %3707 }
 0x38e   :  { %4113 = vrot.lane.b32.xlu1 %v3186_v7, %s6043_s16  ;;  %v10348_v7 = vld [vmem:[#allocation12_spill] sm:$0xff] }
 0x38f   :  { %4111 = vrot.lane.b32.xlu0 %v3137_v2, %s6043_s16 }
 0x390   :  { %v8821_v15 = vpop.permute.xlu1 %3713 }
 0x391   :  { %10342 = vst [vmem:[#allocation33_spill] sm:$0xff] %v8821_v15  ;;  %v8826_v46 = vpop.permute.xlu0 %3711 }
 0x392   :  { %10343 = vst [vmem:[#allocation172_spill] sm:$0xff] %v8826_v46  ;;  %4117 = vrot.lane.b32.xlu1 %v3284_v38, %s6043_s16  ;;  %v3043_v46 = vcombine.high %v3039_v18, %v9913_v24  ;;  %v3288_v18 = vcombine.high %v3284_v38, %v9913_v24 }
 0x393   :  { %4115 = vrot.lane.b32.xlu0 %v3235_v30, %s6043_s16 }
 0x394   :  { %v8833_v11 = vpop.permute.xlu1 %3717 }
 0x395   :  { %10344 = vst [vmem:[#allocation175_spill] sm:$0xff] %v8833_v11  ;;  %v8836_v15 = vpop.permute.xlu0 %3715  ;;  %v3141_v11 = vcombine.high %v3137_v2, %v9913_v24  ;;  %v3386_v2 = vcombine.high %v3382_v6, %v9913_v24 }
 0x396   :  { %10345 = vst [vmem:[#allocation178_spill] sm:$0xff] %v8836_v15  ;;  %4121 = vrot.lane.b32.xlu1 %v3382_v6, %s6043_s16  ;;  %v5350_v6 = vld [vmem:[%s9674_s7 + $0x80] sm:$0xff] }
 0x397   :  { %4119 = vrot.lane.b32.xlu0 %v3333_v8, %s6043_s16 }
 0x398   :  { %v8841_v3 = vpop.permute.xlu1 %3721 }
 0x399   :  { %v8844_v49 = vpop.permute.xlu0 %3719 }
 0x39a   :  { %10346 = vst [vmem:[#allocation181_spill] sm:$0xff] %v8844_v49  ;;  %4237 = vrot.lane.b32.xlu1 %v3092_v35, %s6044_s17  ;;  %v155_v35 = vmax.f32 %v10348_v7, 0.0  ;;  %v5334_v7 = vld [vmem:[%s9674_s7] sm:$0xff] }
 0x39b   :  { %4235 = vrot.lane.b32.xlu0 %v3043_v46, %s6044_s17  ;;  %v3239_v46 = vcombine.high %v3235_v30, %v9913_v24 }
 0x39c   :  { %v8849_v60 = vpop.permute.xlu1 %3965  ;;  %v1773_v30 = vrot.slane %v155_v35, %v10330_v29  ;;  %v5335_v29 = vld [vmem:[%s9674_s7 + $0x8] sm:$0xff] }
 0x39d   :  { %v8852_v15 = vpop.permute.xlu0 %3963 }
 0x39e   :  { %10347 = vst [vmem:[#allocation184_spill] sm:$0xff] %v8852_v15  ;;  %4241 = vrot.lane.b32.xlu1 %v3190_v25, %s6044_s17 }
 0x39f   :  { %4239 = vrot.lane.b32.xlu0 %v3141_v11, %s6044_s17  ;;  %v3337_v11 = vcombine.high %v3333_v8, %v9913_v24  ;;  %v5351_v8 = vld [vmem:[%s9674_s7 + $0x88] sm:$0xff]  ;;  %v5882_v24 = vpack.c.bf16 %v5335_v29, %v5334_v7  ;;  %v1815_v7 = vrot.slane %v155_v35, %v10337_v19  ;;  %v5336_v19 = vld [vmem:[%s9674_s7 + $0x10] sm:$0xff] }
 0x3a0   :  { %v8857_v63 = vpop.permute.xlu1 %3969 }
 0x3a1   :  { %v8860_v49 = vpop.permute.xlu0 %3967 }
 0x3a2   :  { %4245 = vrot.lane.b32.xlu1 %v3288_v18, %s6044_s17 }
 0x3a3   :  { %4243 = vrot.lane.b32.xlu0 %v3239_v46, %s6044_s17  ;;  %v1766_v46 = vrot.slane %v155_v35, %v10200_v1 }
 0x3a4   :  { %v8866_v15 = vpop.permute.xlu1 %3973 }
 0x3a5   :  { %v8869_v25 = vpop.permute.xlu0 %3971 }
 0x3a6   :  { %10349 = vst [vmem:[#allocation164_spill] sm:$0xff] %v8869_v25  ;;  %4249 = vrot.lane.b32.xlu1 %v3386_v2, %s6044_s17  ;;  %v5880_v2 = vpack.c.bf16 %v5351_v8, %v5350_v6  ;;  %v1794_v8 = vrot.slane %v155_v35, %v10335_v14  ;;  %v5352_v14 = vld [vmem:[%s9674_s7 + $0x90] sm:$0xff] }
 0x3a7   :  { %4247 = vrot.lane.b32.xlu0 %v3337_v11, %s6044_s17 }
 0x3a8   :  { %v8874_v38 = vpop.permute.xlu1 %3977  ;;  %5881 = vmatprep.subr.bf16.mxu1 %v5880_v2  ;;  %v5353_v2 = vld [vmem:[%s9674_s7 + $0x98] sm:$0xff] }
 0x3a9   :  { %10350 = vst [vmem:[#allocation186_spill] sm:$0xff] %v8874_v38  ;;  %v8877_v18 = vpop.permute.xlu0 %3975  ;;  %v1780_v38 = vrot.slane %v155_v35, %v10333_v22  ;;  %5883 = vmatpush3.bf16.msra.mxu1 %v5882_v24  ;;  %v4900_v22 = vcombine.high %v8300_v32, %v8294_v13  ;;  %v4916_v24 = vcombine.high %v8303_v12, %v8297_v39  ;;  %v5337_v39 = vld [vmem:[%s9674_s7 + $0x18] sm:$0xff]  ;;  %v5354_v32 = vld [vmem:[%s9674_s7 + $0xa0] sm:$0xff]  ;;  %v5355_v12 = vld [vmem:[%s9674_s7 + $0xa8] sm:$0xff] }
 0x3aa   :  { %10351 = vst [vmem:[#allocation166_spill] sm:$0xff] %v8877_v18  ;;  %1775 = vbcast.lane.b32.xlu1 %v1773_v30, 256  ;;  %v1787_v30 = vrot.slane %v155_v35, %v10332_v37  ;;  %v5884_v13 = vpack.c.bf16 %v5353_v2, %v5352_v14  ;;  %v5886_v29 = vpack.c.bf16 %v5337_v39, %v5336_v19  ;;  %v10356_v2 = vld [vmem:[#allocation50_spill] sm:$0xff]  ;;  %v10357_v19 = vld [vmem:[#allocation56_spill] sm:$0xff] }
 0x3ab   :  { %1768 = vbcast.lane.b32.xlu0 %v1766_v46, 256  ;;  %v1801_v46 = vrot.slane %v155_v35, %v10334_v17  ;;  %v1808_v17 = vrot.slane %v155_v35, %v10339_v58  ;;  %v4868_v58 = vcombine.high %v8319_v5, %v8313_v41  ;;  %v4884_v35 = vcombine.high %v8322_v27, %v8316_v43  ;;  %v5357_v41 = vld [vmem:[%s9674_s7 + $0xb8] sm:$0xff] }
 0x3ac   :  { %v8892_v11 = vpop.permute.xlu1 %4093  ;;  %5885 = vmatprep.subr.bf16.mxu1 %v5884_v13  ;;  %v4914_v5 = vrot.slane %v4900_v22, %v10213_v4  ;;  %v4930_v27 = vrot.slane %v4916_v24, %v10213_v4  ;;  %v10358_v39 = vcombine.high %v10356_v2, %v10357_v19  ;;  %v5340_v13 = vld [vmem:[%s9674_s7 + $0x30] sm:$0xff]  ;;  %v10360_v24 = vld [vmem:[#allocation58_spill] sm:$0xff] }
 0x3ad   :  { %v8895_v18 = vpop.permute.xlu0 %4091  ;;  %5887 = vmatpush3.bf16.msra.mxu1 %v5886_v29  ;;  %v10359_v22 = vld [vmem:[#allocation53_spill] sm:$0xff] }
 0x3ae   :  { %1789 = vbcast.lane.b32.xlu1 %v1787_v30, 256  ;;  %v5888_v30 = vpack.c.bf16 %v5355_v12, %v5354_v32  ;;  %v5341_v12 = vld [vmem:[%s9674_s7 + $0x38] sm:$0xff]  ;;  %v10361_v29 = vcombine.low %v10359_v22, %v10360_v24 }
 0x3af   :  { %1782 = vbcast.lane.b32.xlu0 %v1780_v38, 256  ;;  %v5894_v2 = vpack.c.bf16 %v5341_v12, %v5340_v13  ;;  %v4936_v13 = vcombine.high %v8364_v40, %v8350_v10 }
 0x3b0   :  { %v8898_v25 = vpop.permute.xlu1 %4097  ;;  %5889 = vmatprep.subr.bf16.mxu1 %v5888_v30  ;;  %v5358_v30 = vld [vmem:[%s9674_s7 + $0xc0] sm:$0xff] }
 0x3b1   :  { %v8901_v6 = vpop.permute.xlu0 %4095 }
 0x3b2   :  { %1803 = vbcast.lane.b32.xlu1 %v1801_v46, 256  ;;  %v5338_v46 = vld [vmem:[%s9674_s7 + $0x20] sm:$0xff] }
 0x3b3   :  { %1796 = vbcast.lane.b32.xlu0 %v1794_v8, 256  ;;  %v5339_v8 = vld [vmem:[%s9674_s7 + $0x28] sm:$0xff] }
 0x3b4   :  { %v8904_v37 = vpop.permute.xlu1 %4101 }
 0x3b5   :  { %10352 = vst [vmem:[#allocation168_spill] sm:$0xff] %v8904_v37  ;;  %v8911_v38 = vpop.permute.xlu0 %4099 }
 0x3b6   :  { %10353 = vst [vmem:[#allocation170_spill] sm:$0xff] %v8911_v38  ;;  %1817 = vbcast.lane.b32.xlu1 %v1815_v7, 256  ;;  %v5356_v7 = vld [vmem:[%s9674_s7 + $0xb0] sm:$0xff]  ;;  %v10362_v38 = vld [vmem:[#allocation90_spill] sm:$0xff] }
 0x3b7   :  { %1810 = vbcast.lane.b32.xlu0 %v1808_v17, 256  ;;  %v5890_v17 = vpack.c.bf16 %v5339_v8, %v5338_v46  ;;  %v5892_v32 = vpack.c.bf16 %v5357_v41, %v5356_v7  ;;  %v4882_v46 = vrot.slane %v4868_v58, %v10213_v4  ;;  %v4898_v8 = vrot.slane %v4884_v35, %v10213_v4  ;;  %v5359_v7 = vld [vmem:[%s9674_s7 + $0xc8] sm:$0xff] }
 0x3b8   :  { %v8945_v14 = vpop.permute.xlu1 %4105  ;;  %v4764_v41 = vcombine.high %v8612_v56, %v8606_v48  ;;  %v10363_v48 = vld [vmem:[#allocation91_spill] sm:$0xff] }
 0x3b9   :  { %10354 = vst [vmem:[#allocation173_spill] sm:$0xff] %v8945_v14  ;;  %v8950_v43 = vpop.permute.xlu0 %4103  ;;  %v4933_v58 = vcombine.low %v4882_v46, %v4914_v5  ;;  %v4937_v35 = vcombine.low %v4898_v8, %v4930_v27  ;;  %5891 = vmatpush3.bf16.msra.mxu1 %v5890_v17  ;;  %v4748_v14 = vcombine.high %v8640_v36, %v8634_v34  ;;  %v5343_v17 = vld [vmem:[%s9674_s7 + $0x48] sm:$0xff]  ;;  %v5360_v34 = vld [vmem:[%s9674_s7 + $0xd0] sm:$0xff] }
 0x3ba   :  { %10355 = vst [vmem:[#allocation176_spill] sm:$0xff] %v8950_v43  ;;  %1454 = vrot.lane.b32.xlu1 %v10358_v39, %s6038_s26  ;;  %v4780_v39 = vcombine.high %v8615_v52, %v8609_v26  ;;  %v4732_v43 = vcombine.high %v8637_v61, %v8631_v62  ;;  %v10364_v56 = vcombine.high %v10362_v38, %v10363_v48  ;;  %v5342_v52 = vld [vmem:[%s9674_s7 + $0x40] sm:$0xff]  ;;  %v5361_v61 = vld [vmem:[%s9674_s7 + $0xd8] sm:$0xff]  ;;  %v10366_v48 = vld [vmem:[#allocation92_spill] sm:$0xff] }
 0x3bb   :  { %1470 = vrot.lane.b32.xlu0 %v10361_v29, %s6039_s29  ;;  %5893 = vmatprep.subr.bf16.mxu1 %v5892_v32  ;;  %v5896_v26 = vpack.c.bf16 %v5359_v7, %v5358_v30  ;;  %v10365_v62 = vcombine.high %v10359_v22, %v10360_v24  ;;  %v4932_v32 = vcombine.high %v8361_v31, %v8347_v57  ;;  %v10367_v38 = vld [vmem:[#allocation93_spill] sm:$0xff] }
 0x3bc   :  { %v8980_v19 = vpop.permute.xlu1 %4221  ;;  %v4778_v12 = vrot.slane %v4764_v41, %v10213_v4  ;;  %v4794_v22 = vrot.slane %v4780_v39, %v10213_v4  ;;  %v5944_v30 = vpack.i.bf16 %v4933_v58, %v4937_v35  ;;  %v4934_v7 = vcombine.high %v4882_v46, %v4914_v5  ;;  %v5344_v39 = vld [vmem:[%s9674_s7 + $0x50] sm:$0xff]  ;;  %v5345_v5 = vld [vmem:[%s9674_s7 + $0x58] sm:$0xff] }
 0x3bd   :  { %v8982_v29 = vpop.permute.xlu0 %4219  ;;  %5895 = vmatpush3.bf16.msra.mxu1 %v5894_v2  ;;  %v10368_v37 = vcombine.low %v10366_v48, %v10367_v38  ;;  %v4746_v57 = vrot.slane %v4732_v43, %v10213_v4  ;;  %v4762_v31 = vrot.slane %v4748_v14, %v10213_v4  ;;  %v5900_v41 = vpack.c.bf16 %v5361_v61, %v5360_v34  ;;  %v5363_v14 = vld [vmem:[%s9674_s7 + $0xe8] sm:$0xff]  ;;  %v5346_v34 = vld [vmem:[%s9674_s7 + $0x60] sm:$0xff] }
 0x3be   :  { %1456 = vrot.lane.b32.xlu1 %v10364_v56, %s6038_s26  ;;  %v4938_v56 = vcombine.high %v4898_v8, %v4930_v27  ;;  %5897 = vmatprep.subr.bf16.mxu1 %v5896_v26  ;;  %v5939_v27 = vpack.i.bf16 %v4932_v32, %v4936_v13  ;;  %v4796_v35 = vcombine.high %v8699_v0, %v8675_v51  ;;  %v5347_v61 = vld [vmem:[%s9674_s7 + $0x68] sm:$0xff]  ;;  %v5364_v32 = vld [vmem:[%s9674_s7 + $0xf0] sm:$0xff]  ;;  %v5365_v13 = vld [vmem:[%s9674_s7 + $0xf8] sm:$0xff] }
 0x3bf   :  { %1486 = vrot.lane.b32.xlu0 %v10365_v62, %s6041_s14  ;;  %v5898_v62 = vpack.c.bf16 %v5343_v17, %v5342_v52  ;;  %v4797_v2 = vcombine.low %v4746_v57, %v4778_v12  ;;  %v4801_v46 = vcombine.low %v4762_v31, %v4794_v22  ;;  %v4800_v26 = vcombine.high %v8702_v47, %v8678_v44 }
 0x3c0   :  { %v9008_v36 = vpop.permute.xlu1 %4225  ;;  %v5949_v58 = vpack.i.bf16 %v4934_v7, %v4938_v56  ;;  %v5902_v52 = vpack.c.bf16 %v5345_v5, %v5344_v39  ;;  %v4802_v39 = vcombine.high %v4762_v31, %v4794_v22  ;;  %v5906_v5 = vpack.c.bf16 %v5347_v61, %v5346_v34  ;;  %v10370_v22 = vld [vmem:[#allocation97_spill] sm:$0xff] }
 0x3c1   :  { %v9016_v24 = vpop.permute.xlu0 %4223  ;;  %5899 = vmatpush3.bf16.msra.mxu1 %v5898_v62  ;;  %v5959_v7 = vpack.i.bf16 %v4797_v2, %v4801_v46  ;;  %v5954_v62 = vpack.i.bf16 %v4796_v35, %v4800_v26 }
 0x3c2   :  { %1472 = vrot.lane.b32.xlu1 %v10368_v37, %s6039_s29  ;;  %v5362_v37 = vld [vmem:[%s9674_s7 + $0xe0] sm:$0xff]  ;;  %5901 = vmatprep.subr.bf16.mxu1 %v5900_v41  ;;  %v4798_v41 = vcombine.high %v4746_v57, %v4778_v12  ;;  %v10369_v12 = vld [vmem:[#allocation96_spill] sm:$0xff] }
 0x3c3   :  { %5945 = vrot.lane.b32.xlu0 %v5944_v30, %s6045_s28  ;;  %v5904_v17 = vpack.c.bf16 %v5363_v14, %v5362_v37  ;;  %v5908_v37 = vpack.c.bf16 %v5365_v13, %v5364_v32  ;;  %v5348_v14 = vld [vmem:[%s9674_s7 + $0x70] sm:$0xff]  ;;  %v10373_v32 = vld [vmem:[#allocation126_spill] sm:$0xff] }
 0x3c4   :  { %v9037_v43 = vpop.permute.xlu1 %4229  ;;  %v5964_v57 = vpack.i.bf16 %v4798_v41, %v4802_v39  ;;  %v4308_v13 = vsel %vm1562_vm6, %v10373_v32, %v8267_v59 }
 0x3c5   :  { %v9039_v8 = vpop.permute.xlu0 %4227  ;;  %5903 = vmatpush3.bf16.msra.mxu1 %v5902_v52  ;;  %v10372_v52 = vcombine.high %v10366_v48, %v10367_v38  ;;  %v4340_v39 = vsel %vm54_vm0, %v4308_v13, %v8352_v55  ;;  %v10377_v13 = vld [vmem:[#allocation34_spill] sm:$0xff] }
 0x3c6   :  { %5940 = vrot.lane.b32.xlu1 %v5939_v27, %s6046_s19  ;;  %5905 = vmatprep.subr.bf16.mxu1 %v5904_v17  ;;  %v5349_v27 = vld [vmem:[%s9674_s7 + $0x78] sm:$0xff]  ;;  %v4372_v48 = vsel %vm1571_vm7, %v4340_v39, %v8775_v50 }
 0x3c7   :  { %5950 = vrot.lane.b32.xlu0 %v5949_v58, %s6047_s1  ;;  %v5910_v31 = vpack.c.bf16 %v5349_v27, %v5348_v14  ;;  %v10371_v58 = vcombine.low %v10369_v12, %v10370_v22  ;;  %v10375_v14 = vld [vmem:[#allocation130_spill] sm:$0xff] }
 0x3c8   :  { %v9059_v30 = vpop.permute.xlu1 %4233  ;;  %v4310_v27 = vsel %vm1562_vm6, %v10375_v14, %v8284_v54 }
 0x3c9   :  { %v9061_v56 = vpop.permute.xlu0 %4231  ;;  %5907 = vmatpush3.bf16.msra.mxu1 %v5906_v5 }
 0x3ca   :  { %5960 = vrot.lane.b32.xlu1 %v5959_v7, %s6045_s28  ;;  %5909 = vmatprep.subr.bf16.mxu1 %v5908_v37 }
 0x3cb   :  { %5955 = vrot.lane.b32.xlu0 %v5954_v62, %s6046_s19  ;;  %v10374_v62 = vld [vmem:[#allocation128_spill] sm:$0xff] }
 0x3cc   :  { %v3854_v2 = vpop.permute.xlu1 %3853  ;;  %v4307_v41 = vsel %vm1562_vm6, %v10374_v62, %v8274_v16  ;;  %v10378_v62 = vld [vmem:[#allocation134_spill] sm:$0xff] }
 0x3cd   :  { %v3852_v46 = vpop.permute.xlu0 %3851  ;;  %5911 = vmatpush3.bf16.msra.mxu1 %v5910_v31  ;;  %v4339_v38 = vsel %vm54_vm0, %v4307_v41, %v8356_v9  ;;  %v4404_v59 = vsel %vm188_vm1, %v4372_v48, %v3854_v2  ;;  %v10376_v9 = vld [vmem:[#allocation132_spill] sm:$0xff]  ;;  %v4311_v41 = vsel %vm1562_vm6, %v10378_v62, %v10377_v13  ;;  %v10382_v48 = vld [vmem:[#allocation39_spill] sm:$0xff]  ;;  %v10392_v62 = vld [vmem:[#allocation62_spill] sm:$0xff] }
 0x3ce   :  { %1502 = vrot.lane.b32.xlu1 %v10371_v58, %s6040_s4  ;;  %v4371_v5 = vsel %vm1571_vm7, %v4339_v38, %v8778_v23  ;;  %v4309_v50 = vsel %vm1562_vm6, %v10376_v9, %v8290_v33  ;;  %v4342_v23 = vsel %vm54_vm0, %v4310_v27, %v8372_v20  ;;  %v10381_v38 = vld [vmem:[#allocation143_spill] sm:$0xff]  ;;  %v10385_v27 = vld [vmem:[#allocation40_spill] sm:$0xff]  ;;  %v10387_v9 = vld [vmem:[#allocation89_spill] sm:$0xff] }
 0x3cf   :  { %5965 = vrot.lane.b32.xlu0 %v5964_v57, %s6047_s1  ;;  %v4403_v16 = vsel %vm188_vm1, %v4371_v5, %v3852_v46  ;;  %v4341_v31 = vsel %vm54_vm0, %v4309_v50, %v8376_v53  ;;  %v4374_v54 = vsel %vm1571_vm7, %v4342_v23, %v8781_v45  ;;  %v10379_v45 = vld [vmem:[#allocation37_spill] sm:$0xff]  ;;  %v10388_v50 = vld [vmem:[#allocation147_spill] sm:$0xff] }
 0x3d0   :  { %v3858_v35 = vpop.permute.xlu1 %3857  ;;  %v4373_v46 = vsel %vm1571_vm7, %v4341_v31, %v8784_v28  ;;  %v4343_v39 = vsel %vm54_vm0, %v4311_v41, %v10379_v45  ;;  %v10380_v28 = vld [vmem:[#allocation52_spill] sm:$0xff]  ;;  %v4301_v23 = vsel %vm1562_vm6, %v10388_v50, %v10387_v9  ;;  %v10389_v31 = vld [vmem:[#allocation138_spill] sm:$0xff]  ;;  %v10401_v50 = vld [vmem:[#allocation137_spill] sm:$0xff] }
 0x3d1   :  { %v3856_v26 = vpop.permute.xlu0 %3855  ;;  %v4406_v58 = vsel %vm188_vm1, %v4374_v54, %v3858_v35  ;;  %v4300_v35 = vsel %vm1562_vm6, %v10381_v38, %v10380_v28  ;;  %v4333_v41 = vsel %vm54_vm0, %v4301_v23, %v10392_v62  ;;  %v10400_v9 = vld [vmem:[#allocation152_spill] sm:$0xff] }
 0x3d2   :  { %v4405_v33 = vsel %vm188_vm1, %v4373_v46, %v3856_v26  ;;  %v10383_v26 = vld [vmem:[#allocation144_spill] sm:$0xff]  ;;  %v4332_v54 = vsel %vm54_vm0, %v4300_v35, %v10389_v31 }
 0x3d3   :  { %1488 = vrot.lane.b32.xlu0 %v10372_v52, %s6041_s14  ;;  %v4299_v5 = vsel %vm1562_vm6, %v10383_v26, %v10382_v48  ;;  %v10394_v35 = vld [vmem:[#allocation172_spill] sm:$0xff]  ;;  %v10395_v26 = vld [vmem:[#allocation41_spill] sm:$0xff] }
 0x3d4   :  { %v9080_v17 = vpop.permute.xlu1 %3861  ;;  %v4365_v48 = vsel %vm1571_vm7, %v4333_v41, %v10394_v35 }
 0x3d5   :  { %v3860_v34 = vpop.permute.xlu0 %3859 }
 0x3d8   :  { %v9082_v61 = vpop.permute.xlu1 %3865 }
 0x3d9   :  { %v9087_v7 = vpop.permute.xlu0 %3863 }
 0x3dc   :  { %v3982_v37 = vpop.permute.xlu1 %3981 }
 0x3dd   :  { %v9106_v55 = vsel %vm1580_vm8, %v4404_v59, %v3982_v37  ;;  %v3980_v57 = vpop.permute.xlu0 %3979  ;;  %v10384_v59 = vld [vmem:[#allocation23_spill] sm:$0xff] }
 0x3de   :  { %v9114_v2 = vsel %vm1580_vm8, %v4403_v16, %v3980_v57  ;;  %v4375_v37 = vsel %vm1571_vm7, %v4343_v39, %v10384_v59  ;;  %v10386_v16 = vld [vmem:[#allocation145_spill] sm:$0xff]  ;;  %v4364_v39 = vsel %vm1571_vm7, %v4332_v54, %v8809_v21  ;;  %v10403_v54 = vld [vmem:[#allocation63_spill] sm:$0xff] }
 0x3df   :  { %v4302_v57 = vsel %vm1562_vm6, %v10386_v16, %v10385_v27  ;;  %v4407_v46 = vsel %vm188_vm1, %v4375_v37, %v3860_v34  ;;  %v10393_v34 = vld [vmem:[#allocation33_spill] sm:$0xff]  ;;  %v10397_v37 = vld [vmem:[#allocation94_spill] sm:$0xff] }
 0x3e0   :  { %v3986_v52 = vpop.permute.xlu1 %3985  ;;  %v10398_v27 = vld [vmem:[#allocation150_spill] sm:$0xff] }
 0x3e1   :  { %v9125_v32 = vsel %vm1580_vm8, %v4406_v58, %v3986_v52  ;;  %v3984_v20 = vpop.permute.xlu0 %3983  ;;  %v10390_v52 = vld [vmem:[#allocation139_spill] sm:$0xff]  ;;  %v4303_v16 = vsel %vm1562_vm6, %v10398_v27, %v10397_v37  ;;  %v10409_v37 = vld [vmem:[#allocation146_spill] sm:$0xff] }
 0x3e2   :  { %v9131_v53 = vsel %vm1580_vm8, %v4405_v33, %v3984_v20  ;;  %v4331_v33 = vsel %vm54_vm0, %v4299_v5, %v10390_v52  ;;  %v10391_v20 = vld [vmem:[#allocation61_spill] sm:$0xff]  ;;  %v10396_v5 = vld [vmem:[#allocation148_spill] sm:$0xff]  ;;  %v10410_v27 = vld [vmem:[#allocation6_spill] sm:$0xff] }
 0x3e3   :  { %v4334_v13 = vsel %vm54_vm0, %v4302_v57, %v10391_v20  ;;  %v4363_v28 = vsel %vm1571_vm7, %v4331_v33, %v8814_v42  ;;  %v4304_v59 = vsel %vm1562_vm6, %v10396_v5, %v10395_v26  ;;  %v10399_v57 = vld [vmem:[#allocation95_spill] sm:$0xff]  ;;  %v10402_v42 = vld [vmem:[#allocation154_spill] sm:$0xff]  ;;  %v10405_v33 = vld [vmem:[#allocation140_spill] sm:$0xff] }
 0x3e4   :  { %v9143_v14 = vpop.permute.xlu1 %3989  ;;  %v4366_v38 = vsel %vm1571_vm7, %v4334_v13, %v10393_v34  ;;  %v4306_v21 = vsel %vm1562_vm6, %v10400_v9, %v10399_v57  ;;  %v4305_v23 = vsel %vm1562_vm6, %v10402_v42, %v10401_v50  ;;  %v10406_v13 = vld [vmem:[#allocation141_spill] sm:$0xff]  ;;  %v10407_v34 = vld [vmem:[#allocation142_spill] sm:$0xff]  ;;  %v10408_v26 = vld [vmem:[#allocation68_spill] sm:$0xff] }
 0x3e5   :  { %v3988_v58 = vpop.permute.xlu0 %3987  ;;  %v4338_v20 = vsel %vm54_vm0, %v4306_v21, %v10405_v33  ;;  %v4337_v62 = vsel %vm54_vm0, %v4305_v23, %v10406_v13  ;;  %v4396_v35 = vsel %vm188_vm1, %v4364_v39, %v10407_v34  ;;  %v4395_v5 = vsel %vm188_vm1, %v4363_v28, %v10408_v26  ;;  %v10411_v57 = vld [vmem:[#allocation175_spill] sm:$0xff]  ;;  %v10412_v21 = vld [vmem:[#allocation178_spill] sm:$0xff]  ;;  %v10413_v23 = vld [vmem:[#allocation181_spill] sm:$0xff] }
 0x3e6   :  { %v9161_v45 = vsel %vm1580_vm8, %v4407_v46, %v3988_v58  ;;  %v4336_v46 = vsel %vm54_vm0, %v4304_v59, %v10403_v54  ;;  %v10404_v58 = vld [vmem:[#allocation65_spill] sm:$0xff]  ;;  %v4398_v59 = vsel %vm188_vm1, %v4366_v38, %v10409_v37  ;;  %v4370_v28 = vsel %vm1571_vm7, %v4338_v20, %v8841_v3  ;;  %v10415_v20 = vld [vmem:[#allocation22_spill] sm:$0xff]  ;;  %v10418_v26 = vld [vmem:[#allocation20_spill] sm:$0xff] }
 0x3e7   :  { %v4335_v52 = vsel %vm54_vm0, %v4303_v16, %v10404_v58  ;;  %v4397_v16 = vsel %vm188_vm1, %v4365_v48, %v10410_v27  ;;  %v4368_v9 = vsel %vm1571_vm7, %v4336_v46, %v10411_v57  ;;  %v4430_v42 = vsel %vm1580_vm8, %v4398_v59, %v8857_v63  ;;  %v10414_v63 = vld [vmem:[#allocation184_spill] sm:$0xff]  ;;  %v10421_v57 = vld [vmem:[#allocation166_spill] sm:$0xff] }
 0x3e8   :  { %v9183_v31 = vpop.permute.xlu1 %3993  ;;  %v4367_v50 = vsel %vm1571_vm7, %v4335_v52, %v10412_v21  ;;  %v4429_v39 = vsel %vm1580_vm8, %v4397_v16, %v8860_v49  ;;  %v4369_v38 = vsel %vm1571_vm7, %v4337_v62, %v10413_v23  ;;  %v4462_v48 = vsel %vm1585_vm9, %v4430_v42, %v8898_v25  ;;  %v10419_v27 = vld [vmem:[#allocation164_spill] sm:$0xff]  ;;  %v10420_v16 = vld [vmem:[#allocation186_spill] sm:$0xff] }
 0x3e9   :  { %v9193_v41 = vpop.permute.xlu0 %3991  ;;  %v4461_v54 = vsel %vm1585_vm9, %v4429_v39, %v8901_v6  ;;  %v4428_v58 = vsel %vm1580_vm8, %v4396_v35, %v8849_v60  ;;  %v4427_v52 = vsel %vm1580_vm8, %v4395_v5, %v10414_v63  ;;  %v4494_v49 = vsel %vm1590_vm10, %v4462_v48, %v9008_v36  ;;  %v10416_v60 = vld [vmem:[#allocation18_spill] sm:$0xff]  ;;  %v10422_v23 = vld [vmem:[#allocation168_spill] sm:$0xff] }
 0x3ea   :  { %v4493_v3 = vsel %vm1590_vm10, %v4461_v54, %v9016_v24  ;;  %v4460_v25 = vsel %vm1585_vm9, %v4428_v58, %v8892_v11  ;;  %v4459_v6 = vsel %vm1585_vm9, %v4427_v52, %v8895_v18  ;;  %v4400_v13 = vsel %vm188_vm1, %v4368_v9, %v10415_v20  ;;  %v10417_v24 = vld [vmem:[#allocation19_spill] sm:$0xff]  ;;  %v10424_v54 = vld [vmem:[#allocation173_spill] sm:$0xff]  ;;  %v10425_v63 = vld [vmem:[#allocation176_spill] sm:$0xff] }
 0x3eb   :  { %v4399_v62 = vsel %vm188_vm1, %v4367_v50, %v10416_v60  ;;  %v4492_v34 = vsel %vm1590_vm10, %v4460_v25, %v8980_v19  ;;  %v4491_v36 = vsel %vm1590_vm10, %v4459_v6, %v8982_v29  ;;  %v4402_v35 = vsel %vm188_vm1, %v4370_v28, %v10417_v24 }
 0x3ec   :  { %v1720_v46 = vpop.permute.xlu1 %1719  ;;  %v4401_v11 = vsel %vm188_vm1, %v4369_v38, %v10418_v26  ;;  %v4586_v18 = vrot.slane %v4494_v49, %v10200_v1  ;;  %v4582_v37 = vrot.slane %v4493_v3, %v10200_v1  ;;  %v4432_v59 = vsel %vm1580_vm8, %v4400_v13, %v8866_v15  ;;  %v10423_v15 = vld [vmem:[#allocation170_spill] sm:$0xff] }
 0x3ed   :  { %v1713_v33 = vpop.permute.xlu0 %1712  ;;  %v4431_v19 = vsel %vm1580_vm8, %v4399_v62, %v10419_v27  ;;  %v4434_v29 = vsel %vm1580_vm8, %v4402_v35, %v10420_v16  ;;  %v4433_v9 = vsel %vm1580_vm8, %v4401_v11, %v10421_v57  ;;  %v4578_v50 = vrot.slane %v4492_v34, %v10200_v1 }
 0x3ee   :  { %v4574_v42 = vrot.slane %v4491_v36, %v10200_v1  ;;  %v4464_v38 = vsel %vm1585_vm9, %v4432_v59, %v10422_v23  ;;  %v4463_v48 = vsel %vm1585_vm9, %v4431_v19, %v10423_v15  ;;  %v4466_v58 = vsel %vm1585_vm9, %v4434_v29, %v10424_v54 }
 0x3ef   :  { %v4465_v52 = vsel %vm1585_vm9, %v4433_v9, %v10425_v63  ;;  %v4496_v49 = vsel %vm1590_vm10, %v4464_v38, %v9037_v43  ;;  %v4498_v3 = vsel %vm1590_vm10, %v4466_v58, %v9059_v30  ;;  %v4652_v25 = vmul.f32 %v4578_v50, %v1720_v46 }
 0x3f0   :  { %v1734_v5 = vpop.permute.xlu1 %1733  ;;  %v4651_v6 = vmul.f32 %v4574_v42, %v1713_v33  ;;  %v4495_v13 = vsel %vm1590_vm10, %v4463_v48, %v9039_v8  ;;  %v4497_v60 = vsel %vm1590_vm10, %v4465_v52, %v9061_v56  ;;  %v4594_v26 = vrot.slane %v4496_v49, %v10200_v1 }
 0x3f1   :  { %v1727_v21 = vpop.permute.xlu0 %1726  ;;  %v4654_v39 = vmul.f32 %v4586_v18, %v1734_v5  ;;  %v4602_v43 = vrot.slane %v4498_v3, %v10200_v1  ;;  %v4590_v46 = vrot.slane %v4495_v13, %v10200_v1  ;;  %v4598_v18 = vrot.slane %v4497_v60, %v10200_v1  ;;  %v10426_v5 = vld [vmem:[#allocation32_spill] sm:$0xff] }
 0x3f2   :  { %v4653_v28 = vmul.f32 %v4582_v37, %v1727_v21 }
 0x3f3   :  { %v4955_v34 = vcombine.low %v4652_v25, %v4654_v39  ;;  %v4956_v36 = vcombine.high %v4652_v25, %v4654_v39 }
 0x3f4   :  { %v1748_v20 = vpop.permute.xlu1 %1747  ;;  %v4939_v24 = vcombine.low %v4651_v6, %v4653_v28  ;;  %v4940_v35 = vcombine.high %v4651_v6, %v4653_v28 }
 0x3f5   :  { %v1741_v62 = vpop.permute.xlu0 %1740  ;;  %v4656_v30 = vmul.f32 %v4594_v26, %v1748_v20  ;;  %v4963_v37 = vrot.slane %v4955_v34, %v10426_v5  ;;  %v4970_v56 = vrot.slane %v4956_v36, %v10426_v5 }
 0x3f6   :  { %v4947_v59 = vrot.slane %v4939_v24, %v10426_v5  ;;  %v4954_v27 = vrot.slane %v4940_v35, %v10426_v5  ;;  %v4655_v19 = vmul.f32 %v4590_v46, %v1741_v62 }
 0x3f8   :  { %v1762_v11 = vpop.permute.xlu1 %1761  ;;  %v5003_v23 = vcombine.low %v4947_v59, %v4963_v37  ;;  %v5004_v38 = vcombine.high %v4947_v59, %v4963_v37  ;;  %v5019_v15 = vcombine.low %v4954_v27, %v4970_v56  ;;  %v5020_v58 = vcombine.high %v4954_v27, %v4970_v56 }
 0x3f9   :  { %v4658_v33 = vmul.f32 %v4602_v43, %v1762_v11  ;;  %v1755_v8 = vpop.permute.xlu0 %1754  ;;  %v10449_v43 = vld [vmem:[#allocation136_spill] sm:$0xff] }
 0x3fa   :  { %v4657_v57 = vmul.f32 %v4598_v18, %v1755_v8  ;;  %v9288_v20 = vrot.slane %v5003_v23, %v10213_v4  ;;  %v5018_v13 = vrot.slane %v5004_v38, %v10213_v4  ;;  %v9292_v60 = vrot.slane %v5019_v15, %v10213_v4  ;;  %v10431_v23 = vld [vmem:[#allocation101_spill] sm:$0xff] }
 0x3fb   :  { %v4987_v16 = vcombine.low %v4656_v30, %v4658_v33  ;;  %v4988_v29 = vcombine.high %v4656_v30, %v4658_v33  ;;  %v5034_v35 = vrot.slane %v5020_v58, %v10213_v4  ;;  %v10433_v58 = vcombine.high %v10369_v12, %v10370_v22  ;;  %v10438_v12 = vld [vmem:[#allocation105_spill] sm:$0xff] }
 0x3fc   :  { %v9279_v9 = vpop.permute.xlu1 %4109  ;;  %v4971_v42 = vcombine.low %v4655_v19, %v4657_v57  ;;  %v4972_v39 = vcombine.high %v4655_v19, %v4657_v57 }
 0x3fd   :  { %v4995_v21 = vrot.slane %v4987_v16, %v10426_v5  ;;  %v5002_v50 = vrot.slane %v4988_v29, %v10426_v5  ;;  %v9283_v28 = vpop.permute.xlu0 %4107 }
 0x3fe   :  { %v4979_v48 = vrot.slane %v4971_v42, %v10426_v5  ;;  %v4986_v54 = vrot.slane %v4972_v39, %v10426_v5  ;;  %v10430_v39 = vld [vmem:[#allocation100_spill] sm:$0xff] }
 0x3ff   :  { %v10432_v38 = vcombine.high %v10430_v39, %v10431_v23 }
 0x400   :  { %v4114_v63 = vpop.permute.xlu1 %4113  ;;  %v5035_v52 = vcombine.low %v4979_v48, %v4995_v21  ;;  %v5036_v49 = vcombine.high %v4979_v48, %v4995_v21  ;;  %v5051_v3 = vcombine.low %v4986_v54, %v5002_v50  ;;  %v5052_v25 = vcombine.high %v4986_v54, %v5002_v50  ;;  %v10427_v21 = vld [vmem:[#allocation98_spill] sm:$0xff]  ;;  %v10428_v50 = vld [vmem:[#allocation99_spill] sm:$0xff] }
 0x401   :  { %v4112_v6 = vpop.permute.xlu0 %4111  ;;  %v10429_v42 = vcombine.low %v10427_v21, %v10428_v50 }
 0x402   :  { %v9295_v62 = vrot.slane %v5035_v52, %v10213_v4  ;;  %v5050_v34 = vrot.slane %v5036_v49, %v10213_v4  ;;  %v9299_v36 = vrot.slane %v5051_v3, %v10213_v4  ;;  %v5066_v24 = vrot.slane %v5052_v25, %v10213_v4  ;;  %v5366_v3 = vld [vmem:[%s9675_s8] sm:$0xff]  ;;  %v5367_v25 = vld [vmem:[%s9675_s8 + $0x8] sm:$0xff] }
 0x404   :  { %v9303_v26 = vpop.permute.xlu1 %4117  ;;  %v5069_v46 = vcombine.low %v5018_v13, %v5050_v34  ;;  %v5073_v33 = vcombine.low %v5034_v35, %v5066_v24  ;;  %v5068_v18 = vcombine.high %v9288_v20, %v9295_v62  ;;  %v5072_v8 = vcombine.high %v9292_v60, %v9299_v36 }
 0x405   :  { %v9309_v30 = vpop.permute.xlu0 %4115  ;;  %v5070_v16 = vcombine.high %v5018_v13, %v5050_v34  ;;  %v5074_v29 = vcombine.high %v5034_v35, %v5066_v24  ;;  %v10434_v13 = vld [vmem:[#allocation102_spill] sm:$0xff]  ;;  %v10435_v34 = vld [vmem:[#allocation103_spill] sm:$0xff]  ;;  %v10437_v35 = vld [vmem:[#allocation104_spill] sm:$0xff] }
 0x406   :  { %v5974_v37 = vpack.i.bf16 %v5069_v46, %v5073_v33  ;;  %v5969_v56 = vpack.i.bf16 %v5068_v18, %v5072_v8  ;;  %v10436_v24 = vcombine.low %v10434_v13, %v10435_v34  ;;  %v10439_v22 = vcombine.high %v10437_v35, %v10438_v12  ;;  %v5368_v8 = vld [vmem:[%s9675_s8 + $0x10] sm:$0xff] }
 0x407   :  { %v5979_v15 = vpack.i.bf16 %v5070_v16, %v5074_v29  ;;  %v5872_v46 = vpack.c.bf16 %v5367_v25, %v5366_v3  ;;  %v10441_v16 = vld [vmem:[#allocation133_spill] sm:$0xff]  ;;  %v10446_v25 = vld [vmem:[#allocation88_spill] sm:$0xff] }
 0x408   :  { %v9315_v59 = vpop.permute.xlu1 %4121  ;;  %5975 = vrot.lane.b32.xlu0 %v5974_v37, %s6045_s28  ;;  %5970 = vrot.lane.b32.xlu1 %v5969_v56, %s6046_s19  ;;  %v5369_v37 = vld [vmem:[%s9675_s8 + $0x18] sm:$0xff]  ;;  %v10440_v56 = vld [vmem:[#allocation87_spill] sm:$0xff] }
 0x409   :  { %v9317_v27 = vpop.permute.xlu0 %4119  ;;  %5873 = vmatprep.subr.bf16.mxu0 %v5872_v46  ;;  %v4312_v29 = vsel %vm1562_vm6, %v10441_v16, %v10440_v56  ;;  %v5876_v3 = vpack.c.bf16 %v5369_v37, %v5368_v8  ;;  %v4468_v56 = vsel %vm1585_vm9, %v9106_v55, %v9279_v9  ;;  %v4470_v16 = vsel %vm1585_vm9, %v9125_v32, %v4114_v63  ;;  %v10451_v55 = vld [vmem:[#allocation49_spill] sm:$0xff] }
 0x40a   :  { %5875 = vmatpush3.bf16.msra.mxu0 %v5872_v46  ;;  %v10448_v46 = vld [vmem:[#allocation35_spill] sm:$0xff] }
 0x40b   :  { %v4313_v11 = vsel %vm1562_vm6, %v10449_v43, %v10448_v46  ;;  %5877 = vmatprep.subr.bf16.mxu0 %v5876_v3  ;;  %v10450_v43 = vld [vmem:[#allocation47_spill] sm:$0xff] }
 0x40c   :  { %v4238_v19 = vpop.permute.xlu1 %4237  ;;  %1504 = vrot.lane.b32.xlu0 %v10429_v42, %s6040_s4  ;;  %1458 = vrot.lane.b32.xlu1 %v10432_v38, %s6038_s26  ;;  %v10442_v42 = vld [vmem:[#allocation106_spill] sm:$0xff]  ;;  %v10443_v38 = vld [vmem:[#allocation107_spill] sm:$0xff] }
 0x40d   :  { %v4236_v57 = vpop.permute.xlu0 %4235  ;;  %v4500_v8 = vsel %vm1590_vm10, %v4468_v56, %v4238_v19 }
 0x40e   :  { %5879 = vmatpush3.bf16.msra.mxu0 %v5876_v3  ;;  %v10459_v3 = vld [vmem:[#allocation17_spill] sm:$0xff]  ;;  %v4610_v46 = vrot.slane %v4500_v8, %v10200_v1 }
 0x410   :  { %v4242_v48 = vpop.permute.xlu1 %4241  ;;  %5980 = vrot.lane.b32.xlu0 %v5979_v15, %s6047_s1  ;;  %1518 = vrot.lane.b32.xlu1 %v10433_v58, %s6042_s15  ;;  %v10444_v15 = vcombine.low %v10442_v42, %v10443_v38  ;;  %v10445_v58 = vcombine.high %v10427_v21, %v10428_v50  ;;  %v4467_v21 = vsel %vm1585_vm9, %v9114_v2, %v9283_v28  ;;  %v10452_v28 = vld [vmem:[#allocation38_spill] sm:$0xff] }
 0x411   :  { %v4240_v54 = vpop.permute.xlu0 %4239  ;;  %v4469_v50 = vsel %vm1585_vm9, %v9131_v53, %v4112_v6  ;;  %v4502_v37 = vsel %vm1590_vm10, %v4470_v16, %v4242_v48  ;;  %v4499_v32 = vsel %vm1590_vm10, %v4467_v21, %v4236_v57  ;;  %v4345_v53 = vsel %vm54_vm0, %v4313_v11, %v10452_v28  ;;  %v10453_v6 = vld [vmem:[#allocation21_spill] sm:$0xff]  ;;  %v10454_v48 = vld [vmem:[#allocation16_spill] sm:$0xff] }
 0x412   :  { %v4501_v63 = vsel %vm1590_vm10, %v4469_v50, %v4240_v54  ;;  %v10456_v57 = vld [vmem:[#allocation108_spill] sm:$0xff]  ;;  %v4618_v56 = vrot.slane %v4502_v37, %v10200_v1 }
 0x413   :  { %v4614_v50 = vrot.slane %v4501_v63, %v10200_v1 }
 0x414   :  { %v4246_v52 = vpop.permute.xlu1 %4245  ;;  %1474 = vrot.lane.b32.xlu0 %v10436_v24, %s6039_s29  ;;  %1460 = vrot.lane.b32.xlu1 %v10439_v22, %s6038_s26  ;;  %v10447_v24 = vld [vmem:[#allocation135_spill] sm:$0xff] }
 0x415   :  { %v9334_v49 = vpop.permute.xlu0 %4243  ;;  %v4314_v22 = vsel %vm1562_vm6, %v10447_v24, %v10446_v25  ;;  %v10457_v24 = vld [vmem:[#allocation109_spill] sm:$0xff] }
 0x416   :  { %v4346_v9 = vsel %vm54_vm0, %v4314_v22, %v10451_v55  ;;  %v10458_v54 = vcombine.low %v10456_v57, %v10457_v24  ;;  %v4377_v22 = vsel %vm1571_vm7, %v4345_v53, %v10459_v3 }
 0x417   :  { %v4378_v25 = vsel %vm1571_vm7, %v4346_v9, %v10454_v48  ;;  %v10461_v9 = vld [vmem:[#allocation110_spill] sm:$0xff] }
 0x418   :  { %v4250_v33 = vpop.permute.xlu1 %4249  ;;  %1534 = vrot.lane.b32.xlu0 %v10444_v15, %s6043_s16  ;;  %1520 = vrot.lane.b32.xlu1 %v10445_v58, %s6042_s15  ;;  %v4344_v58 = vsel %vm54_vm0, %v4312_v29, %v10450_v43  ;;  %v10455_v29 = vcombine.high %v10434_v13, %v10435_v34  ;;  %v4410_v16 = vsel %vm188_vm1, %v4378_v25, %v9082_v61 }
 0x419   :  { %v9350_v18 = vpop.permute.xlu0 %4247  ;;  %v4376_v19 = vsel %vm1571_vm7, %v4344_v58, %v10453_v6  ;;  %v4409_v13 = vsel %vm188_vm1, %v4377_v22, %v9087_v7  ;;  %v4606_v34 = vrot.slane %v4499_v32, %v10200_v1  ;;  %v10460_v7 = vcombine.high %v10442_v42, %v10443_v38  ;;  %v10462_v32 = vld [vmem:[#allocation111_spill] sm:$0xff] }
 0x41a   :  { %v4408_v11 = vsel %vm188_vm1, %v4376_v19, %v9080_v17  ;;  %v4442_v17 = vsel %vm1580_vm8, %v4410_v16, %v9183_v31  ;;  %v4441_v61 = vsel %vm1580_vm8, %v4409_v13, %v9193_v41  ;;  %v10463_v63 = vcombine.low %v10461_v9, %v10462_v32 }
 0x41b   :  { %v4440_v43 = vsel %vm1580_vm8, %v4408_v11, %v9143_v14  ;;  %v4471_v19 = vsel %vm1585_vm9, %v9161_v45, %v9309_v30  ;;  %v4473_v48 = vsel %vm1585_vm9, %v4441_v61, %v9317_v27  ;;  %v10464_v45 = vcombine.high %v10456_v57, %v10457_v24 }
 0x41c   :  { %v1776_v15 = vpop.permute.xlu1 %1775  ;;  %1490 = vrot.lane.b32.xlu0 %v10455_v29, %s6041_s14  ;;  %1476 = vrot.lane.b32.xlu1 %v10458_v54, %s6039_s29  ;;  %v4472_v31 = vsel %vm1585_vm9, %v4440_v43, %v9303_v26  ;;  %v10465_v57 = vcombine.high %v10461_v9, %v10462_v32  ;;  %v10470_v9 = vld [vmem:[#allocation56_spill] sm:$0xff] }
 0x41d   :  { %v1769_v2 = vpop.permute.xlu0 %1768  ;;  %v4660_v8 = vmul.f32 %v4610_v46, %v1776_v15  ;;  %v4474_v15 = vsel %vm1585_vm9, %v4442_v17, %v9315_v59 }
 0x41e   :  { %v4659_v55 = vmul.f32 %v4606_v34, %v1769_v2  ;;  %v4504_v2 = vsel %vm1590_vm10, %v4472_v31, %v4246_v52  ;;  %v4506_v53 = vsel %vm1590_vm10, %v4474_v15, %v4250_v33  ;;  %v4503_v52 = vsel %vm1590_vm10, %v4471_v19, %v9334_v49 }
 0x41f   :  { %v4505_v33 = vsel %vm1590_vm10, %v4473_v48, %v9350_v18  ;;  %v4626_v30 = vrot.slane %v4504_v2, %v10200_v1  ;;  %v4634_v27 = vrot.slane %v4506_v53, %v10200_v1  ;;  %v4622_v18 = vrot.slane %v4503_v52, %v10200_v1  ;;  %v10473_v52 = vld [vmem:[#allocation91_spill] sm:$0xff] }
 0x420   :  { %v1790_v21 = vpop.permute.xlu1 %1789  ;;  %1550 = vrot.lane.b32.xlu0 %v10460_v7, %s6044_s17  ;;  %1536 = vrot.lane.b32.xlu1 %v10463_v63, %s6043_s16  ;;  %v4630_v13 = vrot.slane %v4505_v33, %v10200_v1  ;;  %v10466_v1 = vld [vmem:[#allocation112_spill] sm:$0xff]  ;;  %v10467_v7 = vld [vmem:[#allocation113_spill] sm:$0xff] }
 0x421   :  { %v4662_v58 = vmul.f32 %v4618_v56, %v1790_v21  ;;  %v1783_v37 = vpop.permute.xlu0 %1782  ;;  %v10468_v63 = vcombine.low %v10466_v1, %v10467_v7 }
 0x422   :  { %v4661_v14 = vmul.f32 %v4614_v50, %v1783_v37 }
 0x423   :  { %v5091_v28 = vcombine.low %v4660_v8, %v4662_v58  ;;  %v5092_v41 = vcombine.high %v4660_v8, %v4662_v58 }
 0x424   :  { %v5075_v42 = vcombine.low %v4659_v55, %v4661_v14  ;;  %v5076_v38 = vcombine.high %v4659_v55, %v4661_v14  ;;  %v1804_v6 = vpop.permute.xlu1 %1803  ;;  %1492 = vrot.lane.b32.xlu0 %v10464_v45, %s6041_s14  ;;  %v10469_v14 = vld [vmem:[#allocation50_spill] sm:$0xff] }
 0x425   :  { %v5099_v26 = vrot.slane %v5091_v28, %v10426_v5  ;;  %v5106_v59 = vrot.slane %v5092_v41, %v10426_v5  ;;  %v1797_v25 = vpop.permute.xlu0 %1796  ;;  %v4664_v56 = vmul.f32 %v4626_v30, %v1804_v6  ;;  %v10471_v32 = vcombine.low %v10469_v14, %v10470_v9 }
 0x426   :  { %v5083_v29 = vrot.slane %v5075_v42, %v10426_v5  ;;  %v5090_v54 = vrot.slane %v5076_v38, %v10426_v5  ;;  %v4663_v24 = vmul.f32 %v4622_v18, %v1797_v25  ;;  %v10472_v25 = vld [vmem:[#allocation90_spill] sm:$0xff] }
 0x427   :  { %v10474_v33 = vcombine.low %v10472_v25, %v10473_v52 }
 0x428   :  { %v5139_v3 = vcombine.low %v5083_v29, %v5099_v26  ;;  %v5140_v22 = vcombine.high %v5083_v29, %v5099_v26  ;;  %v5155_v11 = vcombine.low %v5090_v54, %v5106_v59  ;;  %v5156_v49 = vcombine.high %v5090_v54, %v5106_v59  ;;  %v1818_v46 = vpop.permute.xlu1 %1817  ;;  %1552 = vrot.lane.b32.xlu0 %v10465_v57, %s6044_s17 }
 0x429   :  { %v4666_v16 = vmul.f32 %v4634_v27, %v1818_v46  ;;  %v1811_v34 = vpop.permute.xlu0 %1810 }
 0x42a   :  { %v4665_v43 = vmul.f32 %v4630_v13, %v1811_v34  ;;  %v9478_v2 = vrot.slane %v5139_v3, %v10213_v4  ;;  %v5154_v26 = vrot.slane %v5140_v22, %v10213_v4  ;;  %v9482_v59 = vrot.slane %v5155_v11, %v10213_v4 }
 0x42b   :  { %v5123_v21 = vcombine.low %v4664_v56, %v4666_v16  ;;  %v5124_v50 = vcombine.high %v4664_v56, %v4666_v16  ;;  %v5170_v3 = vrot.slane %v5156_v49, %v10213_v4 }
 0x42c   :  { %v1455_v17 = vpop.permute.xlu1 %1454  ;;  %v5107_v37 = vcombine.low %v4663_v24, %v4665_v43  ;;  %v5108_v61 = vcombine.high %v4663_v24, %v4665_v43  ;;  %1508 = vrot.lane.b32.xlu0 %v10468_v63, %s6040_s4 }
 0x42d   :  { %v5131_v8 = vrot.slane %v5123_v21, %v10426_v5  ;;  %v5138_v58 = vrot.slane %v5124_v50, %v10426_v5  ;;  %v1471_v55 = vpop.permute.xlu0 %1470  ;;  %v1563_v31 = vsel %vm1562_vm6, %v10471_v32, %v1455_v17 }
 0x42e   :  { %v5115_v15 = vrot.slane %v5107_v37, %v10426_v5  ;;  %v5122_v28 = vrot.slane %v5108_v61, %v10426_v5  ;;  %v1567_v41 = vsel %vm54_vm0, %v1563_v31, %v1471_v55  ;;  %v10475_v61 = vld [vmem:[#allocation114_spill] sm:$0xff]  ;;  %v10476_v55 = vld [vmem:[#allocation115_spill] sm:$0xff]  ;;  %v10478_v31 = vld [vmem:[#allocation116_spill] sm:$0xff] }
 0x42f   :  { %v10477_v63 = vcombine.low %v10475_v61, %v10476_v55 }
 0x430   :  { %v1457_v53 = vpop.permute.xlu1 %1456  ;;  %v5171_v42 = vcombine.low %v5115_v15, %v5131_v8  ;;  %v5172_v38 = vcombine.high %v5115_v15, %v5131_v8  ;;  %v5187_v6 = vcombine.low %v5122_v28, %v5138_v58  ;;  %v5188_v19 = vcombine.high %v5122_v28, %v5138_v58  ;;  %v10479_v15 = vld [vmem:[#allocation117_spill] sm:$0xff] }
 0x431   :  { %v1487_v48 = vpop.permute.xlu0 %1486  ;;  %v1564_v5 = vsel %vm1562_vm6, %v10474_v33, %v1457_v53  ;;  %v10480_v28 = vcombine.low %v10478_v31, %v10479_v15  ;;  %v10484_v33 = vcombine.high %v10475_v61, %v10476_v55 }
 0x432   :  { %v9489_v29 = vsel %vm1571_vm7, %v1567_v41, %v1487_v48  ;;  %v9492_v54 = vrot.slane %v5171_v42, %v10213_v4  ;;  %v5186_v45 = vrot.slane %v5172_v38, %v10213_v4  ;;  %v9496_v30 = vrot.slane %v5187_v6, %v10213_v4 }
 0x433   :  { %v5202_v27 = vrot.slane %v5188_v19, %v10213_v4  ;;  %v10481_v42 = vcombine.low %v8702_v47, %v8678_v44  ;;  %v10482_v6 = vcombine.low %v8699_v0, %v8675_v51  ;;  %v10483_v48 = vcombine.low %v8364_v40, %v8350_v10  ;;  %v10485_v40 = vld [vmem:[#allocation36_spill] sm:$0xff] }
 0x434   :  { %v1473_v22 = vpop.permute.xlu1 %1472  ;;  %v5203_v11 = vcombine.low %v9478_v2, %v9492_v54  ;;  %v5207_v46 = vcombine.low %v9482_v59, %v9496_v30  ;;  %v5206_v16 = vcombine.high %v5154_v26, %v5186_v45  ;;  %v5204_v34 = vcombine.high %v9478_v2, %v9492_v54 }
 0x435   :  { %v9505_v56 = vsel %vm54_vm0, %v1564_v5, %v1473_v22  ;;  %v5946_v18 = vpop.permute.xlu0 %5945  ;;  %v5210_v13 = vcombine.high %v5170_v3, %v5202_v27  ;;  %v5208_v57 = vcombine.high %v9482_v59, %v9496_v30  ;;  %v5205_v4 = vcombine.low %v5154_v26, %v5186_v45  ;;  %v10486_v5 = vld [vmem:[#allocation46_spill] sm:$0xff] }
 0x436   :  { %v5209_v49 = vcombine.low %v5170_v3, %v5202_v27  ;;  %v5947_v25 = vunpack.i.l.bf16 %v5946_v18  ;;  %v10487_v45 = vcombine.low %v10485_v40, %v10486_v5  ;;  %v5948_v3 = vunpack.i.h.bf16 %v5946_v18 }
 0x437   :  { %v5994_v24 = vpack.i.bf16 %v5206_v16, %v5210_v13  ;;  %v5984_v50 = vpack.i.bf16 %v5204_v34, %v5208_v57 }
 0x438   :  { %v5941_v21 = vpop.permute.xlu1 %5940  ;;  %v5989_v17 = vpack.i.bf16 %v5205_v4, %v5209_v49  ;;  %v10488_v49 = vcombine.high %v10478_v31, %v10479_v15  ;;  %v10495_v15 = vcombine.low %v9288_v20, %v9295_v62 }
 0x439   :  { %v5951_v43 = vpop.permute.xlu0 %5950  ;;  %5995 = vrot.lane.b32.xlu0 %v5994_v24, %s6047_s1  ;;  %5985 = vrot.lane.b32.xlu1 %v5984_v50, %s6046_s19  ;;  %v5942_v8 = vunpack.i.l.bf16 %v5941_v21  ;;  %v5943_v32 = vunpack.i.h.bf16 %v5941_v21  ;;  %v10489_v24 = vcombine.high %v10466_v1, %v10467_v7  ;;  %v10490_v21 = vld [vmem:[#allocation118_spill] sm:$0xff]  ;;  %v10491_v50 = vld [vmem:[#allocation119_spill] sm:$0xff]  ;;  %s6048_s19 = smov [#allocation2]  }
 0x43a   :  { %v5952_v22 = vunpack.i.l.bf16 %v5951_v43  ;;  %v5953_v4 = vunpack.i.h.bf16 %v5951_v43  ;;  %v10493_v43 = vcombine.high %v10490_v21, %v10491_v50  ;;  %s5721_s1 = sshll.u32 %s6048_s19, 4  ;;  %s5722_s1 = int_to_ptr.vmem [resolvable:$true] %s5721_s1 }
 0x43b   :  { %v5323_v26 = vsel %vm5307_vm11, %v10483_v48, %v5942_v8  ;;  %v5309_v27 = vsel %vm5307_vm11, %v10487_v45, %v5943_v32  ;;  %v10494_v32 = vcombine.low %v9292_v60, %v9299_v36  ;;  %s6009_s6 = scalar_lea.vmem %s5722_s1, 256  ;;  %p6014_p1 = scmp.lt.s32.totalorder %s5722_s1, %s5722_s1 }
 0x43c   :  { %v5961_v58 = vpop.permute.xlu1 %5960  ;;  %v5327_v10 = vsel %vm5312_vm12, %v5323_v26, %v5947_v25  ;;  %v5314_v57 = vsel %vm5312_vm12, %v5309_v27, %v5948_v3  ;;  %p6010_p0 = scmp.ne.s32.totalorder %s5722_s1, %s6009_s6  ;;  %p6015_p2 = scmp.lt.s32.totalorder %s6009_s6, %s6009_s6 }
 0x43d   :  { %v5956_v37 = vpop.permute.xlu0 %5955  ;;  %1538 = vrot.lane.b32.xlu0 %v10477_v63, %s6043_s16  ;;  %1506 = vrot.lane.b32.xlu1 %v10480_v28, %s6040_s4  ;;  %v5963_v41 = vunpack.i.h.bf16 %v5961_v58  ;;  %v5962_v53 = vunpack.i.l.bf16 %v5961_v58  ;;  %v5331_v34 = vsel %vm5317_vm13, %v5327_v10, %v5952_v22  ;;  %v5319_v18 = vsel %vm5317_vm13, %v5314_v57, %v5953_v4 }
 0x43e   :  { %v5958_v14 = vunpack.i.h.bf16 %v5956_v37  ;;  %v5957_v9 = vunpack.i.l.bf16 %v5956_v37  ;;  %p6016_p3 = por %p6015_p2, %p6014_p1 }
 0x440   :  { %v5322_v38 = vsel %vm5307_vm11, %v10481_v42, %v5957_v9  ;;  %v5308_v19 = vsel %vm5307_vm11, %v10482_v6, %v5958_v14  ;;  %v1503_v8 = vpop.permute.xlu1 %1502  ;;  %p6017_p4 = pnand %p6016_p3, %p6010_p0 }
 0x441   :  { %v5966_v52 = vpop.permute.xlu0 %5965  ;;  %1554 = vrot.lane.b32.xlu0 %v10484_v33, %s6044_s17  ;;  %5990 = vrot.lane.b32.xlu1 %v5989_v17, %s6045_s28  ;;  %v5326_v51 = vsel %vm5312_vm12, %v5322_v38, %v5962_v53  ;;  %v5313_v0 = vsel %vm5312_vm12, %v5308_v19, %v5963_v41  ;;  %v10492_v17 = vcombine.low %v10490_v21, %v10491_v50 }
 0x442   :  { %v5968_v44 = vunpack.i.h.bf16 %v5966_v52  ;;  %v5967_v47 = vunpack.i.l.bf16 %v5966_v52  ;;  %v1576_v52 = vsel %vm188_vm1, %v9489_v29, %v1503_v8 }
 0x444   :  { %v5330_v16 = vsel %vm5317_vm13, %v5326_v51, %v5967_v47  ;;  %v5318_v13 = vsel %vm5317_vm13, %v5313_v0, %v5968_v44 }
 0x445   :  { %5531 = vmatprep.mubr.f32.mxu1 %v5330_v16  ;;  %1522 = vrot.lane.b32.xlu1 %v10488_v49, %s6042_s15  ;;  %v1489_v58 = vpop.permute.xlu0 %1488 }
 0x446   :  { %5532 = vmatmul.mubr.f32.vlgmr.msra.gmra.mrb[0].mxu1 %v5318_v13  ;;  %v1573_v40 = vsel %vm1571_vm7, %v9505_v56, %v1489_v58  ;;  %v10496_v56 = vcombine.low %v10430_v39, %v10431_v23 }
 0x447   :  { %5536 = vmatprep.mubr.f32.mxu1 %v5331_v34 }
 0x449   :  { %1524 = vrot.lane.b32.xlu1 %v10489_v24, %s6042_s15 }
 0x44a   :  { %5537 = vmatmul.mubr.f32.gmra.mrb[2].mxu1 %v5319_v18 }
 0x44d   :  { %1540 = vrot.lane.b32.xlu1 %v10492_v17, %s6043_s16 }
 0x451   :  { %1556 = vrot.lane.b32.xlu1 %v10493_v43, %s6044_s17 }
 0x47a   :  { %v5971_v37 = vpop.permute.xlu1 %5970  ;;  %v5976_v61 = vpop.permute.xlu0 %5975 }
 0x47b   :  { %v5973_v55 = vunpack.i.h.bf16 %v5971_v37  ;;  %v5972_v63 = vunpack.i.l.bf16 %v5971_v37  ;;  %v5978_v1 = vunpack.i.h.bf16 %v5976_v61  ;;  %v5977_v7 = vunpack.i.l.bf16 %v5976_v61 }
 0x47d   :  { %v5324_v31 = vsel %vm5307_vm11, %v10494_v32, %v5972_v63  ;;  %v5310_v28 = vsel %vm5307_vm11, %v10495_v15, %v5973_v55 }
 0x47e   :  { %v1459_v14 = vpop.permute.xlu1 %1458  ;;  %v1505_v9 = vpop.permute.xlu0 %1504  ;;  %v5328_v6 = vsel %vm5312_vm12, %v5324_v31, %v5977_v7  ;;  %v5315_v19 = vsel %vm5312_vm12, %v5310_v28, %v5978_v1  ;;  %v10497_v1 = vcombine.low %v10437_v35, %v10438_v12 }
 0x47f   :  { %v1577_v45 = vsel %vm188_vm1, %v1573_v40, %v1505_v9  ;;  %v1565_v18 = vsel %vm1562_vm6, %v10496_v56, %v1459_v14 }
 0x482   :  { %v1519_v41 = vpop.permute.xlu1 %1518  ;;  %v5981_v53 = vpop.permute.xlu0 %5980 }
 0x483   :  { %v5983_v42 = vunpack.i.h.bf16 %v5981_v53  ;;  %v5982_v38 = vunpack.i.l.bf16 %v5981_v53  ;;  %v1581_v33 = vsel %vm1580_vm8, %v1576_v52, %v1519_v41 }
 0x485   :  { %v5332_v48 = vsel %vm5317_vm13, %v5328_v6, %v5982_v38  ;;  %v5320_v26 = vsel %vm5317_vm13, %v5315_v19, %v5983_v42 }
 0x486   :  { %v1461_v60 = vpop.permute.xlu1 %1460  ;;  %v1475_v36 = vpop.permute.xlu0 %1474  ;;  %5541 = vmatprep.mubr.f32.mxu1 %v5332_v48 }
 0x487   :  { %5542 = vmatmul.mubr.f32.gmra.mrb[4].mxu1 %v5320_v26  ;;  %v1569_v50 = vsel %vm54_vm0, %v1565_v18, %v1475_v36  ;;  %v1566_v7 = vsel %vm1562_vm6, %v10497_v1, %v1461_v60  ;;  %v10498_v60 = vld [vmem:[#allocation5_spill] sm:$0xff] }
 0x488   :  { %v5558_v36 = vadd.s32 8, %v10498_v60 }
 0x48a   :  { %v1535_v25 = vpop.permute.xlu0 %1534  ;;  %v1521_v20 = vpop.permute.xlu1 %1520 }
 0x48b   :  { %v1586_v47 = vsel %vm1585_vm9, %v1581_v33, %v1535_v25  ;;  %v1582_v27 = vsel %vm1580_vm8, %v1577_v45, %v1521_v20  ;;  %v5749_v25 = vld [vmem:[%s9667_s0] ss:$0 sm:$0xff]  ;;  %v10499_v20 = vmov 0.0  }
 0x48c   :  { %vm5564_vm14 = vcmp.eq.s32.totalorder %v5749_v25, %v10498_v60  ;;  %vm5565_vm15 = vcmp.eq.s32.totalorder %v5749_v25, %v5558_v36 }
 0x48d   :  { %v5751_v52 = vsel %vm5565_vm15, 1.0, %v10499_v20 }
 0x48e   :  { %v1491_v62 = vpop.permute.xlu0 %1490  ;;  %v1477_v44 = vpop.permute.xlu1 %1476 }
 0x48f   :  { %v1574_v23 = vsel %vm1571_vm7, %v1569_v50, %v1491_v62  ;;  %v1570_v32 = vsel %vm54_vm0, %v1566_v7, %v1477_v44  ;;  %v5750_v62 = vsel %vm5564_vm14, 1.0, %v10499_v20  ;;  %v5654_v44 = vsel %vm5307_vm11, %v5751_v52, 0.0 }
 0x490   :  { %v5651_v33 = vsel %vm5307_vm11, %v5750_v62, 0.0  ;;  %5655 = vadd.xlane.f32.xlu1 %v5654_v44  ;;  %v5755_v44 = vld [vmem:[%s9678_s11] ss:$0 sm:$0xff] }
 0x491   :  { %5652 = vadd.xlane.f32.xlu0 %v5651_v33 }
 0x492   :  { %v1551_v51 = vpop.permute.xlu0 %1550  ;;  %v1537_v5 = vpop.permute.xlu1 %1536 }
 0x493   :  { %v1591_v0 = vsel %vm1590_vm10, %v1586_v47, %v1551_v51  ;;  %v1587_v29 = vsel %vm1585_vm9, %v1582_v27, %v1537_v5 }
 0x494   :  { %5851 = vmatprep.mubr.msk.f32.mxu0 %vm5307_vm11, %v1591_v0 }
 0x496   :  { %v1493_v10 = vpop.permute.xlu0 %1492 }
 0x497   :  { %v1575_v15 = vsel %vm1571_vm7, %v1570_v32, %v1493_v10 }
 0x49a   :  { %v1553_v3 = vpop.permute.xlu0 %1552 }
 0x49b   :  { %v1592_v22 = vsel %vm1590_vm10, %v1587_v29, %v1553_v3 }
 0x49c   :  { %5852 = vmatmul.mubr.msk.f32.vlgmr.msra.gmra.mrb[8].mxu0 %vm5307_vm11, %v1592_v22 }
 0x49e   :  { %v1509_v16 = vpop.permute.xlu0 %1508 }
 0x49f   :  { %v1579_v28 = vsel %vm188_vm1, %v1575_v15, %v1509_v16 }
 0x4ab   :  { %v5986_v13 = vpop.permute.xlu1 %5985  ;;  %v5996_v34 = vpop.permute.xlu0 %5995 }
 0x4ac   :  { %v5988_v4 = vunpack.i.h.bf16 %v5986_v13  ;;  %v5987_v49 = vunpack.i.l.bf16 %v5986_v13  ;;  %v5998_v8 = vunpack.i.h.bf16 %v5996_v34  ;;  %v5997_v58 = vunpack.i.l.bf16 %v5996_v34 }
 0x4ae   :  { %v5325_v37 = vsel %vm5307_vm11, %v5207_v46, %v5987_v49  ;;  %v5311_v39 = vsel %vm5307_vm11, %v5203_v11, %v5988_v4 }
 0x4af   :  { %v1507_v57 = vpop.permute.xlu1 %1506  ;;  %v1539_v24 = vpop.permute.xlu0 %1538 }
 0x4b0   :  { %v1578_v63 = vsel %vm188_vm1, %v1574_v23, %v1507_v57 }
 0x4b3   :  { %v5991_v21 = vpop.permute.xlu1 %5990  ;;  %v1555_v46 = vpop.permute.xlu0 %1554 }
 0x4b4   :  { %v5993_v17 = vunpack.i.h.bf16 %v5991_v21  ;;  %v5992_v43 = vunpack.i.l.bf16 %v5991_v21 }
 0x4b6   :  { %v5329_v61 = vsel %vm5312_vm12, %v5325_v37, %v5992_v43  ;;  %v5316_v55 = vsel %vm5312_vm12, %v5311_v39, %v5993_v17  ;;  %v5664_v39 = vld [vmem:[%s9676_s9 + $0x8] sm:$0xff] }
 0x4b7   :  { %v1523_v14 = vpop.permute.xlu1 %1522  ;;  %v5333_v9 = vsel %vm5317_vm13, %v5329_v61, %v5997_v58  ;;  %v5321_v59 = vsel %vm5317_vm13, %v5316_v55, %v5998_v8  ;;  %v5663_v55 = vld [vmem:[%s9676_s9] sm:$0xff] }
 0x4b8   :  { %v1583_v30 = vsel %vm1580_vm8, %v1578_v63, %v1523_v14  ;;  %5546 = vmatprep.mubr.f32.mxu1 %v5333_v9 }
 0x4b9   :  { %v1588_v2 = vsel %vm1585_vm9, %v1583_v30, %v1539_v24  ;;  %5547 = vmatmul.mubr.f32.gmra.mrb[6].mxu1 %v5321_v59 }
 0x4ba   :  { %v1593_v54 = vsel %vm1590_vm10, %v1588_v2, %v1555_v46 }
 0x4bb   :  { %v1525_v11 = vpop.permute.xlu1 %1524  ;;  %5854 = vmatprep.mubr.msk.f32.mxu0 %vm5307_vm11, %v1593_v54 }
 0x4bc   :  { %v1584_v41 = vsel %vm1580_vm8, %v1579_v28, %v1525_v11 }
 0x4bf   :  { %v1541_v31 = vpop.permute.xlu1 %1540 }
 0x4c0   :  { %v1589_v53 = vsel %vm1585_vm9, %v1584_v41, %v1541_v31 }
 0x4c3   :  { %v1557_v42 = vpop.permute.xlu1 %1556 }
 0x4c4   :  { %v1594_v38 = vsel %vm1590_vm10, %v1589_v53, %v1557_v42 }
 0x4c5   :  { %5855 = vmatmul.mubr.msk.f32.gmra.mrb[10].mxu0 %vm5307_vm11, %v1594_v38 }
 0x4c6   :  { %5865 = vmatprep.mubr.msk.f32.mxu0 %vm5307_vm11, %v5750_v62  ;;  %v5754_v62 = vld [vmem:[%s9677_s10] ss:$0 sm:$0xff] }
 0x519   :  { %v5807_v6 = vpop.f32.mrb[0].mxu1 }
 0x51a   :  { %v5808_v35 = vpop.f32.mrb[1].mxu1 }
 0x51b   :  { %v5809_v12 = vadd.f32 %v5808_v35, %v5807_v6 }
 0x51d   :  { %v5810_v19 = vpop.f32.mrb[2].mxu1  ;;  %v5656_v21 = vpop.xlane.xlu1 %5655 }
 0x51e   :  { %v5811_v48 = vpop.f32.mrb[3].mxu1  ;;  %v5653_v50 = vpop.xlane.xlu0 %5652  ;;  %v5658_v17 = vmax.f32 %v5656_v21, 1.0 }
 0x51f   :  { %v5812_v26 = vadd.f32 %v5811_v48, %v5810_v19  ;;  %v5657_v43 = vmax.f32 %v5653_v50, 1.0 }
 0x520   :  { %6003 = vrcp.f32 %v5658_v17 }
 0x521   :  { %6005 = vrcp.f32 %v5657_v43 }
 0x52a   :  { %v6004_v8 = vpop.eup %6003 }
 0x52b   :  { %v6006_v58 = vpop.eup %6005 }
 0x55a   :  { %v5813_v47 = vpop.f32.mrb[4].mxu1 }
 0x55b   :  { %v5814_v51 = vpop.f32.mrb[5].mxu1 }
 0x55c   :  { %v5815_v0 = vadd.f32 %v5814_v51, %v5813_v47 }
 0x56f   :  { %v5853_v10 = vpop.f32.mrb[8].mxu0 }
 0x570   :  { %v5539_v40 = vadd.f32 %v5853_v10, %v5812_v26  ;;  %v5448_v5 = vpop.f32.mrb[9].mxu0 }
 0x571   :  { %v5534_v45 = vadd.f32 %v5809_v12, %v5448_v5 }
 0x572   :  { %v5553_v27 = vmul.f32 0.17677669, %v5539_v40 }
 0x573   :  { %v5552_v29 = vmul.f32 0.17677669, %v5534_v45 }
 0x575   :  { %v5912_v3 = vpack.c.bf16 %v5553_v27, %v5552_v29 }
 0x577   :  { %5913 = vmatprep.subr.bf16.mxu0 %v5912_v3 }
 0x578   :  { %5915 = vmatpush3.bf16.msra.mxu0 %v5912_v3 }
 0x58c   :  { %v5816_v22 = vpop.f32.mrb[6].mxu1 }
 0x58d   :  { %v5817_v16 = vpop.f32.mrb[7].mxu1 }
 0x58e   :  { %v5818_v13 = vadd.f32 %v5817_v16, %v5816_v22 }
 0x598   :  { %v5856_v34 = vpop.f32.mrb[10].mxu0 }
 0x599   :  { %v5549_v57 = vadd.f32 %v5856_v34, %v5818_v13  ;;  %v5458_v4 = vpop.f32.mrb[11].mxu0 }
 0x59a   :  { %v5544_v49 = vadd.f32 %v5815_v0, %v5458_v4 }
 0x59b   :  { %v5555_v56 = vmul.f32 0.17677669, %v5549_v57 }
 0x59c   :  { %v5554_v18 = vmul.f32 0.17677669, %v5544_v49 }
 0x59e   :  { %v5916_v24 = vpack.c.bf16 %v5555_v56, %v5554_v18 }
 0x5a0   :  { %5917 = vmatprep.subr.bf16.mxu0 %v5916_v24 }
 0x5a1   :  { %5919 = vmatpush3.bf16.msra.mxu0 %v5916_v24 }
 0x5a4   :  { %5866 = vmatmul.mubr.msk.f32.vlgmr.msra.gmra.mrb[12].mxu0 %vm5307_vm11, %v5751_v52 }
 0x677   :  { %v5867_v37 = vpop.f32.mrb[12].mxu0 }
 0x678   :  { %v5662_v23 = vmul.f32 %v6004_v8, %v5867_v37  ;;  %v5642_v61 = vpop.f32.mrb[13].mxu0 }
 0x679   :  { %v5660_v63 = vmul.f32 %v6006_v58, %v5642_v61 }
 0x67a   :  { %v5666_v14 = vadd.f32 %v5664_v39, %v5662_v23 }
 0x67b   :  { %v5665_v9 = vadd.f32 %v5663_v55, %v5660_v63 }
 0x67c   :  { %v5668_v59 = vsel %vm188_vm1, %v5666_v14, 0.0 }
 0x67d   :  { %v5667_v30 = vsel %vm188_vm1, %v5665_v9, 0.0 }
 0x67e   :  { %v5669_v46 = vadd.f32 %v5668_v59, %v5667_v30 }
 0x680   :  { %v5670_v2 = vrot.slane %v5669_v46, 4 }
 0x682   :  { %v5671_v54 = vadd.f32 %v5670_v2, %v5669_v46 }
 0x684   :  { %v5672_v11 = vrot.slane %v5671_v54, 2 }
 0x686   :  { %v5673_v1 = vadd.f32 %v5672_v11, %v5671_v54 }
 0x688   :  { %v5674_v7 = vrot.slane %v5673_v1, 1 }
 0x68a   :  { %v5675_v32 = vadd.f32 %v5674_v7, %v5673_v1 }
 0x68c   :  { %v5677_v31 = vmul.f32 0.0625, %v5675_v32 }
 0x68e   :  { %v5678_v15 = vsub.f32 %v5665_v9, %v5677_v31  ;;  %v5679_v28 = vsub.f32 %v5666_v14, %v5677_v31 }
 0x690   :  { %v5680_v41 = vmul.f32 %v5678_v15, %v5678_v15  ;;  %v5681_v53 = vmul.f32 %v5679_v28, %v5679_v28 }
 0x692   :  { %v5682_v42 = vsel %vm188_vm1, %v5680_v41, 0.0  ;;  %v5683_v38 = vsel %vm188_vm1, %v5681_v53, 0.0 }
 0x693   :  { %v5684_v6 = vadd.f32 %v5683_v38, %v5682_v42 }
 0x695   :  { %v5685_v35 = vrot.slane %v5684_v6, 4 }
 0x697   :  { %v5686_v12 = vadd.f32 %v5685_v35, %v5684_v6 }
 0x699   :  { %v5687_v19 = vrot.slane %v5686_v12, 2 }
 0x69b   :  { %v5688_v48 = vadd.f32 %v5687_v19, %v5686_v12 }
 0x69d   :  { %v5689_v26 = vrot.slane %v5688_v48, 1 }
 0x69f   :  { %v5690_v60 = vadd.f32 %v5689_v26, %v5688_v48 }
 0x6a1   :  { %v5691_v36 = vmul.f32 0.0625, %v5690_v60 }
 0x6a3   :  { %v5692_v25 = vadd.f32 1e-05, %v5691_v36 }
 0x6a5   :  { %6007 = vrsqrt.f32 %v5692_v25 }
 0x6af   :  { %v6008_v20 = vpop.eup %6007 }
 0x6b0   :  { %v5694_v52 = vmul.f32 %v6008_v20, %v5678_v15  ;;  %v5695_v33 = vmul.f32 %v6008_v20, %v5679_v28 }
 0x6b2   :  { %v5703_v47 = vmul.f32 %v5754_v62, %v5694_v52  ;;  %v5704_v51 = vmul.f32 %v5754_v62, %v5695_v33 }
 0x6b4   :  { %v5712_v0 = vadd.f32 %v5755_v44, %v5703_v47  ;;  %v5713_v10 = vadd.f32 %v5755_v44, %v5704_v51 }
 0x6b6   :  { %5714 = vst.msk [vmem:[#allocation2] sm:$0xff] %vm188_vm1, %v5712_v0  ;;  %5715 = vst.msk [vmem:[#allocation2 + $0x8] sm:$0xff] %vm188_vm1, %v5713_v10 }
 0x6b7   :  { %6020 = shalt.err (!%p6017_p4)
}
 0x6b8   :  { %s6021_s23 = scalar_lea.hbm %s9679_s12, 256 }
 0x6b9   :  { %p6022_p5 = scmp.ne.s32.totalorder %s9679_s12, %s6021_s23  ;;  %p6025_p6 = scmp.lt.u32.totalorder %s6021_s23, %s9679_s12 }
 0x6bb   :  { %p6027_p7 = pnand %p6025_p6, %p6022_p5 }
 0x6bd   :  { %6030 = shalt.err (!%p6027_p7)
}
 0x6be   :  { %s6049_s13 = smov 128  }
 0x6bf   :  { %5727 = dma.vmem_to_hbm [thread:$0]  %s5722_s1, 256, %s9679_s12, [#allocation3], %s6049_s13, %s6049_s13, %s6039_s29  }
 0x6c0   :  { %6031 = dma.done.wait [#allocation3], 256  }
 0x6c1   :  { %6032 = vsyncadd [#allocation3], 4294967040 }
 0x6c2   :  { %5731 = vsyncpa [#allocation3], 1 }

</bundles_post_ra>
